<compile_context>
chip_gen: v5e
topology: v5e:2x2
jax: 0.10.0
libtpu: 0.0.40
codegen_flags: <defaults>
</compile_context>

<pallas_src>
import jax
import jax.numpy as jnp
from jax import lax
from jax.experimental import pallas as pl
from jax.experimental.pallas import tpu as pltpu


# ----------------------------------------------------------------------------
# Small helpers
# ----------------------------------------------------------------------------
def _nbytes(x):
    return int(x.size) * x.dtype.itemsize


def _round_up(n, m):
    return ((n + m - 1) // m) * m


def _vmem_capacity():
    """Physical VMEM bytes for the local TPU generation (safe fallback: 64 MiB)."""
    try:
        info = pltpu.get_tpu_info()
        cap = getattr(info, "vmem_capacity_bytes", None)
        if cap:
            return int(cap)
    except Exception:
        pass
    return 64 << 20


def _vmem_limit(resident_bytes, cap):
    # Generation-aware scoped-VMEM budget: resident blocks + headroom for Mosaic
    # temporaries, capped ~20% under physical VMEM (≈52 MiB v7x, ≈102 MiB v5e/v6e).
    hi = max(cap - max(12 << 20, cap // 5), 16 << 20)
    return int(min(max(resident_bytes + (8 << 20), 16 << 20), hi))


def _pick_tile(n, target, unit):
    """Largest t <= target with t % unit == 0 and n % t == 0; fall back to n."""
    if n <= target:
        return n
    t = (min(target, n) // unit) * unit
    while t >= unit:
        if n % t == 0:
            return t
        t -= unit
    return n


_WEIGHT_PIPELINE_MODE = "unset"


def _single_buffer_mode():
    """pl.Buffered(1) single-buffers constant-index weight blocks (halves their
    resident VMEM).  Probe once and fall back to default double-buffering if
    this build rejects it."""
    global _WEIGHT_PIPELINE_MODE
    if isinstance(_WEIGHT_PIPELINE_MODE, str):
        try:
            def _copy(x_ref, o_ref):
                o_ref[...] = x_ref[...]
            probe = pl.pallas_call(
                _copy,
                out_shape=jax.ShapeDtypeStruct((8, 128), jnp.float32),
                grid=(2,),
                in_specs=[pl.BlockSpec((8, 128), lambda i: (0, 0),
                                       pipeline_mode=pl.Buffered(1))],
                out_specs=pl.BlockSpec((8, 128), lambda i: (0, 0)),
            )(jnp.zeros((8, 128), jnp.float32))
            jax.block_until_ready(probe)
            _WEIGHT_PIPELINE_MODE = pl.Buffered(1)
        except Exception:
            _WEIGHT_PIPELINE_MODE = None
    return _WEIGHT_PIPELINE_MODE


def _const_block_spec(shape, index_map, mode):
    if mode is None:
        return pl.BlockSpec(shape, index_map)
    return pl.BlockSpec(shape, index_map, pipeline_mode=mode)


def _ln_cols(x, g, b, eps=1e-5):
    """LayerNorm over the feature (sublane) axis of a (features, tokens) tile;
    g/b are (features, 1) columns.  fp32 throughout."""
    mu = jnp.mean(x, axis=0, keepdims=True)
    var = jnp.mean(jnp.square(x - mu), axis=0, keepdims=True)
    return (x - mu) * lax.rsqrt(var + eps) * g + b


# ----------------------------------------------------------------------------
# AttentionFusion kernel (fuse_layer) — channel-major tiles: block = (C, TS)
# with tokens on the lane axis.  One grid step == one (batch, token-tile).
# Everything depending only on the single hidden token is hoisted outside,
# and norm1 is folded into the fusion_layer weight so x1 never materializes.
# ----------------------------------------------------------------------------
def fuse_kernel(vqa_ref, qa_ref, cpk_ref,
                wq_ref, wdfv_ref, wflv_ref, wflxg_ref,
                out_ref):
    vqa = vqa_ref[...].astype(jnp.float32)          # (C, TS) fp32
    vqa_bf = vqa.astype(jnp.bfloat16)               # bf16 MXU operand only

    # packed per-batch C-side columns (C, 16):
    #   0: db (hexp half of direct_fusion + its bias)      1: folded fusion bias
    #   2: row-sums of wflx*gamma1                          3,4: direct_norm g/b
    #   5,6: norm2 g/b                                      7,8: final_norm g/b
    cpk = cpk_ref[...]
    db, bfl, rflx = cpk[:, 0:1], cpk[:, 1:2], cpk[:, 2:3]
    dn_g, dn_b = cpk[:, 3:4], cpk[:, 4:5]
    n2_g, n2_b = cpk[:, 5:6], cpk[:, 6:7]
    fn_g, fn_b = cpk[:, 7:8], cpk[:, 8:9]

    # qa = query^T + hoisted (bq + out_proj(v_proj(hidden))) per-batch column.
    # (softmax over the single hidden key/value token is identically 1.)
    qa = jnp.dot(wq_ref[...], vqa_bf,
                 preferred_element_type=jnp.float32) + qa_ref[...]

    # norm1 gamma/beta are folded into wflxg / bfl / rflx -> only its per-token
    # stats are needed; x1 is never materialized (saves (H,TS) fp32 + bf16 copy).
    mu1 = jnp.mean(qa, axis=0, keepdims=True)
    var1 = jnp.mean(jnp.square(qa - mu1), axis=0, keepdims=True)
    rstd1 = lax.rsqrt(var1 + 1e-5)

    # direct branch: direct_fusion(cat[vqa, hexp]); hexp half pre-folded into db.
    direct = jnp.dot(wdfv_ref[...], vqa_bf,
                     preferred_element_type=jnp.float32) + db
    direct = _ln_cols(vqa + direct, dn_g, dn_b)                          # direct_norm

    # attention branch: wflx @ LayerNorm1(qa) == rstd1*(wflxg@qa - mu1*rflx) + folded bias
    attn_x = (jnp.dot(wflxg_ref[...], qa.astype(jnp.bfloat16),
                      preferred_element_type=jnp.float32) - mu1 * rflx) * rstd1
    attn_fused = jnp.dot(wflv_ref[...], vqa_bf,
                         preferred_element_type=jnp.float32) + attn_x + bfl
    combined = _ln_cols(direct + attn_fused, n2_g, n2_b)                 # norm2

    # residual with original vqa features + final_norm (the reshape round-trip
    # in the PyTorch code is an identity in this layout)
    out_ref[...] = _ln_cols(vqa + combined, fn_g, fn_b).astype(out_ref.dtype)


def _hoist_hidden_rows(hidden_states, params, vqa_dtype):
    """All M=1 GEMMs depending only on the last hidden token, done once per batch
    as tiny batched XLA GEMMs.  Exact because the module slices hidden_states to
    its last token before the MHA, so softmax over a length-1 key axis == 1."""
    hid = hidden_states[:, -1, :].astype(vqa_dtype).astype(jnp.float32)     # (B, H)
    v = hid @ params["wv_a"] + params["bv_a"]              # MHA v_proj
    attn = v @ params["wo_a"] + params["bo_a"]             # MHA out_proj
    qa = attn + params["bq"]                               # fold query_proj bias
    hrow = hid @ params["whp"] + params["bhp"]             # hidden_proj
    C = params["whp"].shape[1]
    db = hrow @ params["wdf"][C:, :] + params["bdf"]       # hexp half of direct_fusion
    return qa[:, :, None], db[:, :, None]                  # (B,H,1), (B,C,1)


def attention_fusion(hidden_states, vqa_features, params, *, token_tile=None):
    """fuse_layer(hidden_states, vqa_features) — returns (b, c, d, h, w)."""
    B, C, D, Hs, Ws = vqa_features.shape
    S = D * Hs * Ws
    H = params["wq"].shape[1]
    dt = vqa_features.dtype
    cap = _vmem_capacity()

    vqa3 = vqa_features.reshape(B, C, S)        # free reshape, stays channel-major
    S_pad = _round_up(S, 128)                   # lane-dense tiles even for odd S
    if S_pad != S:
        vqa3 = jnp.pad(vqa3, ((0, 0), (0, 0), (0, S_pad - S)))

    qa_cols, db_cols = _hoist_hidden_rows(hidden_states, params, dt)

    bf16, f32 = jnp.bfloat16, jnp.float32
    g1 = params["n1"][0].astype(f32)                        # norm1 gamma (H,)
    be1 = params["n1"][1].astype(f32)                       # norm1 beta  (H,)
    wflx = params["wfl"][C:, :].astype(f32)                 # (H, C) x1-half of fusion_layer
    wflx_g = wflx * g1[:, None]                             # fold gamma into the weight

    wq_t = params["wq"].T.astype(bf16)                      # (H, C)
    wdfv_t = params["wdf"][:C, :].T.astype(bf16)            # (C, C) vqa half only
    wflv_t = params["wfl"][:C, :].T.astype(bf16)            # (C, C)
    wflxg_t = wflx_g.T.astype(bf16)                         # (C, H) gamma-folded

    bfl_fold = params["bfl"][0] + be1 @ wflx                # fold wflx@beta1 into bias (C,)
    rflx = jnp.sum(wflx_g, axis=0)                          # row sums of wflx*gamma1 (C,)

    # Pack all C-side small operands into one (B, C, 16) block: one lane-padded
    # DMA per batch step instead of six.
    base = jnp.zeros((C, 16), f32)
    base = base.at[:, 1].set(bfl_fold)
    base = base.at[:, 2].set(rflx)
    base = base.at[:, 3].set(params["dn"][0]); base = base.at[:, 4].set(params["dn"][1])
    base = base.at[:, 5].set(params["n2"][0]); base = base.at[:, 6].set(params["n2"][1])
    base = base.at[:, 7].set(params["fn"][0]); base = base.at[:, 8].set(params["fn"][1])
    cpk = jnp.broadcast_to(base[None], (B, C, 16)).at[:, :, 0].set(db_cols[:, :, 0])
    cpk = cpk.astype(f32)

    if token_tile is None:
        token_tile = 512 if cap >= (96 << 20) else 256      # smaller tiles on 64 MiB parts
    TS = _pick_tile(S_pad, token_tile, 128)
    n_s = S_pad // TS
    mode = _single_buffer_mode()
    wbuf = 1 if mode is not None else 2

    weights = (wq_t, wdfv_t, wflv_t, wflxg_t)
    resident = (wbuf * sum(_nbytes(w) for w in weights)     # (single-)buffered weights
                + 2 * (H * 128 * 4 + C * 128 * 4)           # lane-padded qa/cpk columns
                + 4 * C * TS * dt.itemsize                  # in/out tiles (2x buffered)
                + (2 * H * TS + 6 * C * TS) * 4)            # fp32/bf16 temporaries
    cp = pltpu.CompilerParams(
        dimension_semantics=("parallel", "parallel"),
        vmem_limit_bytes=_vmem_limit(resident, cap))

    in_specs = [
        pl.BlockSpec((None, C, TS), lambda b, s: (b, 0, s)),   # vqa tile (channel-major)
        pl.BlockSpec((None, H, 1), lambda b, s: (b, 0, 0)),    # hoisted attn+bq column
        pl.BlockSpec((None, C, 16), lambda b, s: (b, 0, 0)),   # packed C-side operands
    ] + [_const_block_spec(w.shape, lambda b, s: (0, 0), mode) for w in weights]

    out = pl.pallas_call(
        fuse_kernel,
        out_shape=jax.ShapeDtypeStruct((B, C, S_pad), dt),
        grid=(B, n_s),
        in_specs=in_specs,
        out_specs=pl.BlockSpec((None, C, TS), lambda b, s: (b, 0, s)),
        compiler_params=cp,
    )(vqa3, qa_cols, cpk, *weights)

    if S_pad != S:
        out = out[:, :, :S]
    return out.reshape(B, C, D, Hs, Ws)


# ----------------------------------------------------------------------------
# quality2text_model: Linear -> GELU(exact) -> Dropout(eval=identity) -> Linear
# Preferred path: full w2 resident in VMEM (no per-step w2 re-streaming).
# Fallback path (only if w2 doesn't fit): embed-tiling with the first-layer
# activation cached in VMEM scratch and reused across embed tiles.
# ----------------------------------------------------------------------------
def _gelu_exact(h):
    return 0.5 * h * (1.0 + lax.erf(h * 0.7071067811865476))


def q2t_kernel_resident(x_ref, w1_ref, b1_ref, w2_ref, b2_ref, o_ref):
    # channel-major (C, TS) tile; contract over the sublane axis directly so the
    # MXU is fed without a separate XLU transpose pass.
    x = x_ref[...].astype(jnp.bfloat16)
    h = lax.dot_general(x, w1_ref[...], (((0,), (0,)), ((), ())),
                        preferred_element_type=jnp.float32) + b1_ref[...]
    h = _gelu_exact(h)                                                   # exact GELU, fp32
    # TODO(synk): Dropout(0.5) is identity at inference; training would need pltpu.prng_*.
    o = jnp.dot(h.astype(jnp.bfloat16), w2_ref[...],
                preferred_element_type=jnp.float32) + b2_ref[...]
    o_ref[...] = o.astype(o_ref.dtype)


def q2t_kernel_tiled(x_ref, w1_ref, b1_ref, w2_ref, b2_ref, o_ref, h_ref):
    # NOTE: the h_ref scratch reuse is only correct because the embed axis is
    # the innermost, sequentially-iterated ('arbitrary') grid axis.
    @pl.when(pl.program_id(2) == 0)
    def _():
        x = x_ref[...].astype(jnp.bfloat16)
        h = lax.dot_general(x, w1_ref[...], (((0,), (0,)), ((), ())),
                            preferred_element_type=jnp.float32) + b1_ref[...]
        h_ref[...] = _gelu_exact(h).astype(jnp.bfloat16)
    o = jnp.dot(h_ref[...], w2_ref[...],
                preferred_element_type=jnp.float32) + b2_ref[...]
    o_ref[...] = o.astype(o_ref.dtype)


def quality2text(quality_features, params, *, token_tile=None, embed_tile=1024):
    """rearrange('b c d h w -> (b d) (h w) c') + MLP; returns bf16 (matches .bfloat16())."""
    B, C, D, Hs, Ws = quality_features.shape
    S = D * Hs * Ws
    E = params["q2t_w1"].shape[1]
    cap = _vmem_capacity()

    x3 = quality_features.reshape(B, C, S)          # free reshape, channel-major
    S_pad = _round_up(S, 128)
    if S_pad != S:
        x3 = jnp.pad(x3, ((0, 0), (0, 0), (0, S_pad - S)))

    w1 = params["q2t_w1"].astype(jnp.bfloat16)      # (C, E)
    b1 = params["q2t_b1"].astype(jnp.float32)       # (1, E)
    w2 = params["q2t_w2"].astype(jnp.bfloat16)      # (E, E)
    b2 = params["q2t_b2"].astype(jnp.float32)       # (1, E)

    mode = _single_buffer_mode()
    wbuf = 1 if mode is not None else 2
    in_item = x3.dtype.itemsize
    headroom = 12 << 20

    # Plan: prefer full-w2 residency (otherwise w2 is re-streamed from HBM once
    # per token tile and layer 2 becomes HBM-bound on v5e/v6e); on 64 MiB parts
    # drop the token tile to 256 before giving up and falling back to e-tiling.
    ts_targets = (512, 256) if token_tile is None else (token_tile,)
    plan = None
    for ts_t in ts_targets:
        TS = _pick_tile(S_pad, ts_t, 128)
        need = (wbuf * (_nbytes(w1) + _nbytes(w2) + 2 * 8 * E * 4)
                + 2 * C * TS * in_item              # input tiles (double-buffered)
                + 2 * TS * E * 2                    # output tiles (bf16)
                + 3 * TS * E * 4)                   # fp32 temporaries (h / GELU)
        if need + headroom <= cap:
            plan = ("resident", TS, E, need)
            break
    if plan is None:
        TS = _pick_tile(S_pad, 512 if token_tile is None else token_tile, 128)
        TE = _pick_tile(E, embed_tile, 128)
        need = (wbuf * (_nbytes(w1) + 8 * E * 4)
                + 2 * (E * TE * 2 + 8 * TE * 4)     # streamed w2/b2 tiles
                + 2 * C * TS * in_item + 2 * TS * TE * 2
                + TS * E * 2 + 3 * TS * E * 4)
        plan = ("tiled", TS, TE, need)

    kind, TS, TE, resident = plan
    n_s = S_pad // TS
    vmem_limit = _vmem_limit(resident, cap)

    if kind == "resident":
        cp = pltpu.CompilerParams(
            dimension_semantics=("parallel", "parallel"),
            vmem_limit_bytes=vmem_limit)
        out = pl.pallas_call(
            q2t_kernel_resident,
            out_shape=jax.ShapeDtypeStruct((B * S_pad, E), jnp.bfloat16),
            grid=(B, n_s),
            in_specs=[
                pl.BlockSpec((None, C, TS), lambda b, s: (b, 0, s)),
                _const_block_spec((C, E), lambda b, s: (0, 0), mode),
                _const_block_spec((1, E), lambda b, s: (0, 0), mode),
                _const_block_spec((E, E), lambda b, s: (0, 0), mode),   # w2 resident
                _const_block_spec((1, E), lambda b, s: (0, 0), mode),
            ],
            out_specs=pl.BlockSpec((TS, E), lambda b, s: (b * n_s + s, 0)),
            compiler_params=cp,
        )(x3, w1, b1, w2, b2)
    else:
        n_e = E // TE
        cp = pltpu.CompilerParams(
            dimension_semantics=("parallel", "parallel", "arbitrary"),
            vmem_limit_bytes=vmem_limit)
        out = pl.pallas_call(
            q2t_kernel_tiled,
            out_shape=jax.ShapeDtypeStruct((B * S_pad, E), jnp.bfloat16),
            grid=(B, n_s, n_e),
            in_specs=[
                pl.BlockSpec((None, C, TS), lambda b, s, e: (b, 0, s)),
                _const_block_spec((C, E), lambda b, s, e: (0, 0), mode),
                _const_block_spec((1, E), lambda b, s, e: (0, 0), mode),
                pl.BlockSpec((E, TE), lambda b, s, e: (0, e)),
                pl.BlockSpec((1, TE), lambda b, s, e: (0, e)),
            ],
            out_specs=pl.BlockSpec((TS, TE), lambda b, s, e: (b * n_s + s, e)),
            scratch_shapes=[pltpu.VMEM((TS, E), jnp.bfloat16)],
            compiler_params=cp,
        )(x3, w1, b1, w2, b2)

    out = out.reshape(B, S_pad, E)
    if S_pad != S:
        out = out[:, :S, :]
    # rows are already in '(b d) (h w)' order -> free reshape
    return out.reshape(B * D, Hs * Ws, E)


# ----------------------------------------------------------------------------
# Losses (tiny scalar reductions — plain JAX glue, mirrors the torch code)
# ----------------------------------------------------------------------------
def plcc_loss(y_pred, y):
    # torch.std_mean(..., unbiased=False) == population std == jnp.std
    m_hat, s_hat = jnp.mean(y_pred), jnp.std(y_pred)
    y_pred = (y_pred - m_hat) / (s_hat + 1e-8)
    m, s = jnp.mean(y), jnp.std(y)
    y = (y - m) / (s + 1e-8)
    loss0 = jnp.mean((y_pred - y) ** 2) / 4
    rho = jnp.mean(y_pred * y)
    loss1 = jnp.mean((rho * y_pred - y) ** 2) / 4
    return (loss0 + loss1) / 2


def rank_loss(y_pred, y):
    # y_pred, y: (B, 1) column vectors (pairwise matrix via transpose)
    rl = jax.nn.relu((y_pred - y_pred.T) * jnp.sign(y.T - y))
    scale = 1.0 + jnp.max(rl)
    n = y_pred.shape[0]
    return jnp.sum(rl) / n / max(n - 1, 1) / scale   # guard n == 1


# ----------------------------------------------------------------------------
# Pure-JAX references (full MHA path / plain MLP) for correctness checks
# ----------------------------------------------------------------------------
def attention_fusion_ref(hidden_states, vqa_features, params):
    B, C, D, Hs, Ws = vqa_features.shape
    hs = hidden_states[:, -1:, :].astype(vqa_features.dtype)          # (B,1,H)
    vqa = vqa_features.reshape(B, C, -1).transpose(0, 2, 1)           # (B,S,C)

    def ln(x, gb):
        mu = x.mean(-1, keepdims=True)
        var = ((x - mu) ** 2).mean(-1, keepdims=True)
        return (x - mu) * lax.rsqrt(var + 1e-5) * gb[0] + gb[1]

    query = vqa @ params["wq"] + params["bq"]
    nh = 4
    E = query.shape[-1]
    dh = E // nh
    q = query @ params["wq_a"] + params["bq_a"]
    k = hs @ params["wk_a"] + params["bk_a"]
    v = hs @ params["wv_a"] + params["bv_a"]
    qh = q.reshape(B, -1, nh, dh).transpose(0, 2, 1, 3)
    kh = k.reshape(B, 1, nh, dh).transpose(0, 2, 1, 3)
    vh = v.reshape(B, 1, nh, dh).transpose(0, 2, 1, 3)
    scores = (qh @ kh.transpose(0, 1, 3, 2)) / jnp.sqrt(float(dh))
    w = jax.nn.softmax(scores, axis=-1)
    attn = (w @ vh).transpose(0, 2, 1, 3).reshape(B, -1, E)
    attn = attn @ params["wo_a"] + params["bo_a"]
    x1 = ln(query + attn, params["n1"])

    hproj = hs @ params["whp"] + params["bhp"]
    hexp = jnp.broadcast_to(hproj, vqa.shape)
    direct = jnp.concatenate([vqa, hexp], -1) @ params["wdf"] + params["bdf"]
    direct = ln(vqa + direct, params["dn"])
    attn_fused = jnp.concatenate([vqa, x1], -1) @ params["wfl"] + params["bfl"]
    combined = ln(direct + attn_fused, params["n2"])

    fused = combined.transpose(0, 2, 1).reshape(B, C, D, Hs, Ws) + vqa_features
    flat = fused.reshape(B, C, -1).transpose(0, 2, 1)
    flat = ln(flat, params["fn"])
    return flat.transpose(0, 2, 1).reshape(B, C, D, Hs, Ws)


def quality2text_ref(quality_features, params):
    B, C, D, Hs, Ws = quality_features.shape
    qf = quality_features.transpose(0, 2, 3, 4, 1).reshape(B * D, Hs * Ws, C)
    h = qf @ params["q2t_w1"] + params["q2t_b1"]
    h = 0.5 * h * (1.0 + lax.erf(h * 0.7071067811865476))
    return h @ params["q2t_w2"] + params["q2t_b2"]


# ----------------------------------------------------------------------------
# Deterministic parameter init (weights stored as (in, out) = torch W.T)
# ----------------------------------------------------------------------------
def init_params(key, hidden_dim, vqa_dim):
    ks = jax.random.split(key, 10)

    def lin(k, fin, fout):
        k1, k2 = jax.random.split(k)
        w = jax.random.normal(k1, (fin, fout), jnp.float32) * 0.05
        b = jax.random.normal(k2, (1, fout), jnp.float32) * 0.01
        return w, b

    p = {}
    p["wq"], p["bq"] = lin(ks[0], vqa_dim, hidden_dim)            # query_proj
    p["wq_a"], p["bq_a"] = lin(ks[1], hidden_dim, hidden_dim)     # MHA q_proj
    p["wk_a"], p["bk_a"] = lin(ks[2], hidden_dim, hidden_dim)     # MHA k_proj
    p["wv_a"], p["bv_a"] = lin(ks[3], hidden_dim, hidden_dim)     # MHA v_proj
    p["wo_a"], p["bo_a"] = lin(ks[4], hidden_dim, hidden_dim)     # MHA out_proj
    p["whp"], p["bhp"] = lin(ks[5], hidden_dim, vqa_dim)          # hidden_proj
    p["wdf"], p["bdf"] = lin(ks[6], 2 * vqa_dim, vqa_dim)         # direct_fusion
    p["wfl"], p["bfl"] = lin(ks[7], hidden_dim + vqa_dim, vqa_dim)  # fusion_layer
    # LayerNorms: row0 = gamma (ones), row1 = beta (zeros)  (PyTorch default init)
    ln_h = jnp.stack([jnp.ones(hidden_dim), jnp.zeros(hidden_dim)]).astype(jnp.float32)
    ln_c = jnp.stack([jnp.ones(vqa_dim), jnp.zeros(vqa_dim)]).astype(jnp.float32)
    p["n1"], p["dn"], p["n2"], p["fn"] = ln_h, ln_c, ln_c, ln_c
    # quality2text_model: Linear(vqa_dim->embed) / GELU / Dropout / Linear(embed->embed)
    p["q2t_w1"], p["q2t_b1"] = lin(ks[8], vqa_dim, hidden_dim)
    p["q2t_w2"], p["q2t_b2"] = lin(ks[9], hidden_dim, hidden_dim)
    return p


# ----------------------------------------------------------------------------
if __name__ == "__main__":
    key = jax.random.PRNGKey(0)
    # Small stand-in shapes (lane-aligned, S = D*Hs*Ws = 128):
    # vqa_dim=128 (real: 768), embed=256 (real: 3584)
    B, C, D, Hs, Ws = 2, 128, 2, 8, 8
    HID, T = 256, 8

    k1, k2, k3, k4 = jax.random.split(key, 4)
    params = init_params(k1, HID, C)
    # TODO(synk): quality_encoder (quality_backbone) is a checkpoint-loaded CNN; use
    # synthetic quality features of the same (b,c,d,h,w) layout instead.
    quality_features = jax.random.normal(k2, (B, C, D, Hs, Ws), jnp.float32)
    # TODO(synk): the mPLUG-Owl3 LLM (HyperQwen2) last_hidden_state is external; use a
    # synthetic bf16 hidden-state tensor of shape (B, T, embed_dim).
    hidden_states = jax.random.normal(k3, (B, T, HID), jnp.float32).astype(jnp.bfloat16)
    labels = jax.random.uniform(k4, (B, 1), jnp.float32) * 5.0

    # quality2text path: reads the (b,c,d,h,w) tensor directly, outputs (b*d, h*w, E) bf16
    quality_embed = quality2text(quality_features, params)

    # fuse_layer (AttentionFusion) kernel
    fused = attention_fusion(hidden_states, quality_features, params)
    jax.block_until_ready((quality_embed, fused))

    # correctness checks vs pure-JAX references (bf16 MXU operands => loose tolerance)
    ref_f = attention_fusion_ref(hidden_states, quality_features, params)
    err_f = float(jnp.max(jnp.abs(fused - ref_f)))
    assert err_f < 1e-1, f"fusion kernel mismatch: max abs err {err_f}"

    ref_q = quality2text_ref(quality_features, params)
    err_q = float(jnp.max(jnp.abs(quality_embed.astype(jnp.float32) - ref_q)))
    assert err_q < 1e-1, f"quality2text kernel mismatch: max abs err {err_q}"

    # TODO(synk): VQAHead weights are checkpoint-loaded and unavailable; use the mean of
    # the fused features as the score solely to exercise the loss path.
    score = fused.mean(axis=(-1, -2, -3, -4)).reshape(B, 1)
    loss = (plcc_loss(score[:, 0], labels[:, 0]), rank_loss(score, labels), score)
    jax.block_until_ready(loss)

    print("KERNEL_OK")
</pallas_src>

<mosaic_0001>
module attributes {stable_mosaic.version = 11 : i64} {
  func.func @_copy(%arg0: i32, %arg1: memref<8x128xf32, #tpu.memory_space<vmem>>, %arg2: memref<8x128xf32, #tpu.memory_space<vmem>>) attributes {dimension_semantics = [#tpu.dimension_semantics<arbitrary>], iteration_bounds = array<i64: 2>, scalar_prefetch = 0 : i64, scratch_operands = 0 : i64, tpu.core_type = #tpu.core_type<tc>, window_params = [{pipeline_mode = #tpu.pipeline_mode<synchronous>, transform_indices = @transform_0, window_bounds = array<i64: 8, 128>}, {pipeline_mode = #tpu.pipeline_mode<synchronous>, transform_indices = @transform_1, window_bounds = array<i64: 8, 128>}]} {
    %c0 = arith.constant 0 : index
    %c0_0 = arith.constant 0 : index
    %0 = vector.load %arg1[%c0, %c0_0] : memref<8x128xf32, #tpu.memory_space<vmem>>, vector<8x128xf32>
    %c0_1 = arith.constant 0 : index
    %c0_2 = arith.constant 0 : index
    %1 = vector.load %arg2[%c0_1, %c0_2] : memref<8x128xf32, #tpu.memory_space<vmem>>, vector<8x128xf32>
    tpu.vector_store %arg2[%c0_1, %c0_2], %0 {strides = array<i32>} : memref<8x128xf32, #tpu.memory_space<vmem>>, vector<8x128xf32>,
    return
  }
  func.func @transform_0(%arg0: i32) -> (i32, i32) {
    %c0_i32 = arith.constant 0 : i32
    %c0_i32_0 = arith.constant 0 : i32
    %c0_i32_1 = arith.constant 0 : i32
    return %c0_i32, %c0_i32_0 : i32, i32
  }
  func.func @transform_1(%arg0: i32) -> (i32, i32) {
    %c0_i32 = arith.constant 0 : i32
    %c0_i32_0 = arith.constant 0 : i32
    %c0_i32_1 = arith.constant 0 : i32
    return %c0_i32, %c0_i32_0 : i32, i32
  }
}

module attributes {stable_mosaic.version = 11 : i64} {
  func.func @q2t_kernel_resident(%arg0: i32, %arg1: i32, %arg2: memref<1x128x128xf32, #tpu.memory_space<vmem>>, %arg3: memref<128x256xbf16, #tpu.memory_space<vmem>>, %arg4: memref<1x256xf32, #tpu.memory_space<vmem>>, %arg5: memref<256x256xbf16, #tpu.memory_space<vmem>>, %arg6: memref<1x256xf32, #tpu.memory_space<vmem>>, %arg7: memref<128x256xbf16, #tpu.memory_space<vmem>>) attributes {dimension_semantics = [#tpu.dimension_semantics<parallel>, #tpu.dimension_semantics<parallel>], iteration_bounds = array<i64: 2, 1>, scalar_prefetch = 0 : i64, scratch_operands = 0 : i64, tpu.core_type = #tpu.core_type<tc>, window_params = [{transform_indices = @transform_0, window_bounds = array<i64: 1, 128, 128>}, {pipeline_mode = #tpu.pipeline_mode<synchronous>, transform_indices = @transform_1, window_bounds = array<i64: 128, 256>}, {pipeline_mode = #tpu.pipeline_mode<synchronous>, transform_indices = @transform_2, window_bounds = array<i64: 1, 256>}, {pipeline_mode = #tpu.pipeline_mode<synchronous>, transform_indices = @transform_3, window_bounds = array<i64: 256, 256>}, {pipeline_mode = #tpu.pipeline_mode<synchronous>, transform_indices = @transform_4, window_bounds = array<i64: 1, 256>}, {transform_indices = @transform_5, window_bounds = array<i64: 128, 256>}]} {
    %c0 = arith.constant 0 : index
    %c0_0 = arith.constant 0 : index
    %c0_1 = arith.constant 0 : index
    %0 = vector.load %arg2[%c0, %c0_0, %c0_1] : memref<1x128x128xf32, #tpu.memory_space<vmem>>, vector<1x128x128xf32>
    %1 = vector.shape_cast %0 : vector<1x128x128xf32> to vector<128x128xf32>
    %2 = arith.truncf %1 : vector<128x128xf32> to vector<128x128xbf16>
    %c0_2 = arith.constant 0 : index
    %c0_3 = arith.constant 0 : index
    %3 = vector.load %arg3[%c0_2, %c0_3] : memref<128x256xbf16, #tpu.memory_space<vmem>>, vector<128x256xbf16>
    %cst = arith.constant dense<0.000000e+00> : vector<128x256xf32>
    %4 = tpu.matmul %2, %3, %cst {dimension_numbers = #tpu.dot_dimension_numbers<[0], [0], [1], [1], [0, 1, 1, 1], [], []>} : vector<128x128xbf16>, vector<128x256xbf16>, vector<128x256xf32> -> vector<128x256xf32>
    %c0_4 = arith.constant 0 : index
    %c0_5 = arith.constant 0 : index
    %5 = vector.load %arg4[%c0_4, %c0_5] : memref<1x256xf32, #tpu.memory_space<vmem>>, vector<1x256xf32>
    %6 = vector.broadcast %5 : vector<1x256xf32> to vector<128x256xf32>
    %7 = arith.addf %4, %6 : vector<128x256xf32>
    %cst_6 = arith.constant 5.000000e-01 : f32
    %8 = vector.broadcast %cst_6 : f32 to vector<128x256xf32>
    %9 = arith.mulf %8, %7 : vector<128x256xf32>
    %cst_7 = arith.constant 0.707106769 : f32
    %10 = vector.broadcast %cst_7 : f32 to vector<128x256xf32>
    %11 = arith.mulf %7, %10 : vector<128x256xf32>
    %12 = math.erf %11 : vector<128x256xf32>
    %cst_8 = arith.constant 1.000000e+00 : f32
    %13 = vector.broadcast %cst_8 : f32 to vector<128x256xf32>
    %14 = arith.addf %13, %12 : vector<128x256xf32>
    %15 = arith.mulf %9, %14 : vector<128x256xf32>
    %16 = arith.truncf %15 : vector<128x256xf32> to vector<128x256xbf16>
    %c0_9 = arith.constant 0 : index
    %c0_10 = arith.constant 0 : index
    %17 = vector.load %arg5[%c0_9, %c0_10] : memref<256x256xbf16, #tpu.memory_space<vmem>>, vector<256x256xbf16>
    %cst_11 = arith.constant dense<0.000000e+00> : vector<128x256xf32>
    %18 = tpu.matmul %16, %17, %cst_11 {dimension_numbers = #tpu.dot_dimension_numbers<[1], [0], [0], [1], [0, 0, 1, 1], [], []>} : vector<128x256xbf16>, vector<256x256xbf16>, vector<128x256xf32> -> vector<128x256xf32>
    %c0_12 = arith.constant 0 : index
    %c0_13 = arith.constant 0 : index
    %19 = vector.load %arg6[%c0_12, %c0_13] : memref<1x256xf32, #tpu.memory_space<vmem>>, vector<1x256xf32>
    %20 = vector.broadcast %19 : vector<1x256xf32> to vector<128x256xf32>
    %21 = arith.addf %18, %20 : vector<128x256xf32>
    %22 = arith.truncf %21 : vector<128x256xf32> to vector<128x256xbf16>
    %c0_14 = arith.constant 0 : index
    %c0_15 = arith.constant 0 : index
    %23 = vector.load %arg7[%c0_14, %c0_15] : memref<128x256xbf16, #tpu.memory_space<vmem>>, vector<128x256xbf16>
    tpu.vector_store %arg7[%c0_14, %c0_15], %22 {strides = array<i32>} : memref<128x256xbf16, #tpu.memory_space<vmem>>, vector<128x256xbf16>,
    return
  }
  func.func @transform_0(%arg0: i32, %arg1: i32) -> (i32, i32, i32) {
    %c0_i32 = arith.constant 0 : i32
    %c0_i32_0 = arith.constant 0 : i32
    return %arg0, %c0_i32, %arg1 : i32, i32, i32
  }
  func.func @transform_1(%arg0: i32, %arg1: i32) -> (i32, i32) {
    %c0_i32 = arith.constant 0 : i32
    %c0_i32_0 = arith.constant 0 : i32
    %c0_i32_1 = arith.constant 0 : i32
    return %c0_i32, %c0_i32_0 : i32, i32
  }
  func.func @transform_2(%arg0: i32, %arg1: i32) -> (i32, i32) {
    %c0_i32 = arith.constant 0 : i32
    %c0_i32_0 = arith.constant 0 : i32
    %c0_i32_1 = arith.constant 0 : i32
    return %c0_i32, %c0_i32_0 : i32, i32
  }
  func.func @transform_3(%arg0: i32, %arg1: i32) -> (i32, i32) {
    %c0_i32 = arith.constant 0 : i32
    %c0_i32_0 = arith.constant 0 : i32
    %c0_i32_1 = arith.constant 0 : i32
    return %c0_i32, %c0_i32_0 : i32, i32
  }
  func.func @transform_4(%arg0: i32, %arg1: i32) -> (i32, i32) {
    %c0_i32 = arith.constant 0 : i32
    %c0_i32_0 = arith.constant 0 : i32
    %c0_i32_1 = arith.constant 0 : i32
    return %c0_i32, %c0_i32_0 : i32, i32
  }
  func.func @transform_5(%arg0: i32, %arg1: i32) -> (i32, i32) {
    %c1_i32 = arith.constant 1 : i32
    %0 = arith.muli %arg0, %c1_i32 : i32
    %1 = arith.addi %0, %arg1 : i32
    %c0_i32 = arith.constant 0 : i32
    %c0_i32_0 = arith.constant 0 : i32
    return %1, %c0_i32 : i32, i32
  }
}

</mosaic_0001>

<bundles_post_ra>
// kernel: tpu_custom_call.1
= control target key start
LH: loop header
LB: loop body
LE: loop exit
PB: predicated region body
PF: predicated region fallthrough
CT: control target
= control target key end

     0   :  { %6 = vsyncpa [#allocation3], 0  ;;  %s286_s0 = inlined_call_operand.hbm [shape: f32[8,128], index: 0, kind: input, shape index: {}]   ;;  %s287_s1 = inlined_call_operand.hbm [shape: f32[8,128], index: 1, kind: output, shape index: {}]  }
   0x1   :  { %7 = vsyncpa [#allocation4], 0  ;;  %s269_s6 = smov 0  }
   0x2 LB: > { %s148_s7 = sadd.s32 4294967295, %s255_s6   ;;  %p149_p0 = scmp.ge.s32.totalorder %s255_s6, 1  ;;  %s255_s6 = sphi %s269_s6, %s13_s6  }
   0x3   : > { %p60_p1 = scmp.lt.s32.totalorder %s255_s6, 3  ;;  %s72_s10 = sshll.u32 %s286_s0, 4  ;;  %s73_s10 = int_to_ptr.hbm [resolvable:$true] %s72_s10 }
   0x4   : > { %p169_p3 = scmp.eq.s32.totalorder %s148_s7, 0  ;;  %s257_s11 = smov [#allocation2]  }
   0x5   : > { %p61_p2 = pnand %p149_p0, %p60_p1  ;;  %s74_s12 = sshll.u32 %s257_s11, 4  ;;  %s75_s12 = int_to_ptr.vmem [resolvable:$true] %s74_s12 }
   0x7   : > { %p165_p4 = pneg %p61_p2  ;;  %87 = sbr.rel (%p61_p2) target bundleno = 19 (0x13), region = 24 }
   0x9   : > { %p166_p5 = pnand %p169_p3, %p165_p4 }
   0xb   : > { %168 = dma.hbm_to_vmem [thread:$0]  (!%p166_p5), %s73_s10, 128, %s75_s12, [#allocation3]  }
   0xc   : > { %246 = dma.done.wait (%p169_p3), [#allocation3], 128  }
   0xd   : > { %248 = vsyncadd (%p169_p3), [#allocation3], 4294967168  ;;  %s258_s13 = smov [#allocation5]   ;;  %s108_s17 = sshll.u32 %s287_s1, 4  ;;  %v98_v0 = vld [vmem:[#allocation2] sm:$0xff]  ;;  %s109_s17 = int_to_ptr.hbm [resolvable:$true] %s108_s17 }
   0xe   : > { %s106_s14 = sshll.u32 %s258_s13, 4  ;;  %p171_p6 = scmp.eq.s32.totalorder %s148_s7, 1  ;;  %99 = vst [vmem:[#allocation5] sm:$0xff] %v98_v0  ;;  %s107_s14 = int_to_ptr.vmem [resolvable:$true] %s106_s14 }
  0x10   : > { %162 = dma.vmem_to_hbm [thread:$0]  (%p171_p6), %s107_s14, 128, %s109_s17, [#allocation4]  }
  0x11   : > { %250 = dma.done.wait (%p171_p6), [#allocation4], 128  }
  0x12   : > { %252 = vsyncadd (%p171_p6), [#allocation4], 4294967168 }
  0x13 PF: > { %s13_s6 = sadd.s32 1, %s255_s6  }
  0x14   : > { %p10_p7 = scmp.ge.s32.totalorder %s13_s6, 4  }
  0x16   :  { %12 = sbr.rel (!%p10_p7) target bundleno = 2 (0x2), region = 53 }
  0x1b   :  { %122 = vsyncpa [#allocation3], 1 }
  0x1c   :  { %124 = vsyncpa [#allocation3 + $0x1], 1 }
  0x1d   :  { %125 = vsyncpa [#allocation4], 1 }
  0x1e   :  { %127 = vsyncpa [#allocation4 + $0x1], 1 }

// kernel: tpu_custom_call.1
= control target key start
LH: loop header
LB: loop body
LE: loop exit
PB: predicated region body
PF: predicated region fallthrough
CT: control target
= control target key end

     0   :  { %s4889_s0 = inlined_call_operand.hbm [shape: f32[2,128,128], index: 0, kind: input, shape index: {}]   ;;  %s4890_s1 = inlined_call_operand.hbm [shape: bf16[128,256], index: 1, kind: input, shape index: {}]   ;;  %s4891_s2 = inlined_call_operand.hbm [shape: f32[1,256], index: 2, kind: input, shape index: {}]   ;;  %s4892_s3 = inlined_call_operand.hbm [shape: bf16[256,256], index: 3, kind: input, shape index: {}]   ;;  %s4893_s4 = inlined_call_operand.vmem [shape: f32[1,256], index: 4, kind: input, shape index: {}]   ;;  %s4894_s5 = inlined_call_operand.hbm [shape: bf16[256,256], index: 5, kind: output, shape index: {}]  }
   0x1   :  { %4916 = sst [smem:[#allocation39_spill]] %s4890_s1 }
   0x2   :  { %4917 = sst [smem:[#allocation40_spill]] %s4891_s2 }
   0x3   :  { %4918 = sst [smem:[#allocation41_spill]] %s4892_s3 }
   0x4   :  { %10 = vsyncpa [#allocation3], 0 }
   0x5   :  { %12 = vsyncpa [#allocation3 + $0x1], 0 }
   0x6   :  { %13 = vsyncpa [#allocation6], 0 }
   0x7   :  { %14 = vsyncpa [#allocation9], 0 }
   0x8   :  { %15 = vsyncpa [#allocation4], 0 }
   0x9   :  { %17 = vsyncpa [#allocation4 + $0x1], 0  ;;  %s3256_s18 = smov 0   ;;  %s3258_s19 = smov 0  }
   0xa   :  { %s3260_s20 = smov 0   ;;  %s3262_s21 = smov 0  }
   0xb   :  { %s3264_s22 = smov 0   ;;  %s3266_s23 = smov 0  }
   0xc LB: > { %s2533_s24 = sadd.s32 4294967295, %s3217_s23   ;;  %s2534_s25 = sadd.s32 4294967294, %s3217_s23   ;;  %s3217_s23 = sphi %s3266_s23, %s23_s23   ;;  %s3213_s22 = sphi %s3264_s22, %s5048_s22   ;;  %s3209_s21 = sphi %s3262_s21, %s5047_s21   ;;  %s3205_s20 = sphi %s3260_s20, %s5046_s20   ;;  %s3201_s19 = sphi %s3258_s19, %s5045_s19   ;;  %s3197_s18 = sphi %s3256_s18, %s5044_s18  }
   0xd   : > { %p57_p0 = scmp.ne.s32.totalorder %s3201_s19, %s3197_s18  ;;  %p3290_p1 = scmp.eq.s32.totalorder %s2533_s24, 0 }
   0xe   : > { %p3294_p2 = scmp.eq.s32.totalorder %s2533_s24, 1  ;;  %p173_p3 = scmp.eq.s32.totalorder %s2534_s25, 1 }
   0xf   : > { %p3300_p4 = por %p3290_p1, %p57_p0  ;;  %p2535_p5 = scmp.ge.s32.totalorder %s3217_s23, 1 }
  0x10   : > { %p3305_p6 = por %p173_p3, %p57_p0  ;;  %p180_p7 = scmp.lt.s32.totalorder %s3217_s23, 3 }
  0x11   : > { %s4923_s1 = sld [smem:[#allocation39_spill]]  ;;  %s3219_s9 = smov [#allocation5]  }
  0x12   : > { %p3313_p8 = pnand %p2535_p5, %p180_p7  ;;  %s193_s10 = sshll.u32 %s3219_s9, 4  ;;  %s194_s10 = int_to_ptr.vmem [resolvable:$true] %s193_s10 }
  0x13   : > { %p2539_p11 = scmp.ge.s32.totalorder %s3217_s23, 2  ;;  %s4926_s2 = sld [smem:[#allocation40_spill]] }
  0x14   : > { %p2862_p9 = pneg %p3313_p8  ;;  %s4895_s15 = smov 128  }
  0x15   : > { %s4896_s16 = smov 8   ;;  %s3222_s17 = smov [#allocation7]  }
  0x16   : > { %p3321_p10 = pnand %p2862_p9, %p3290_p1  ;;  %s208_s24 = sshll.u32 %s3222_s17, 4  ;;  %s209_s24 = int_to_ptr.vmem [resolvable:$true] %s208_s24 }
  0x17   : > { %s191_s7 = sshll.u32 %s4923_s1, 4  ;;  %s4927_s3 = sld [smem:[#allocation41_spill]]  ;;  %s192_s7 = int_to_ptr.hbm [resolvable:$true] %s191_s7 }
  0x18   : > { %2865 = dma.hbm_to_vmem [thread:$0]  (!%p3321_p10), %s192_s7, 2048, %s194_s10, [#allocation6], %s4895_s15, %s4895_s15, %s4896_s16  }
  0x19   : > { %s206_s14 = sshll.u32 %s4926_s2, 4  ;;  %s3223_s9 = smov [#allocation8]   ;;  %s207_s14 = int_to_ptr.hbm [resolvable:$true] %s206_s14 }
  0x1a   : > { %2868 = dma.hbm_to_vmem [thread:$0]  (!%p3321_p10), %s207_s14, 32, %s209_s24, [#allocation6]  }
  0x1b   : > { %s219_s12 = sshll.u32 %s3223_s9, 4  ;;  %s35_s7 = sadd.s32 1, %s3213_s22  ;;  %s220_s12 = int_to_ptr.vmem [resolvable:$true] %s219_s12 }
  0x1c   : > { %p37_p12 = scmp.ge.s32.totalorder %s35_s7, 2  ;;  %s44_s10 = sadd.s32 1, %s3205_s20 }
  0x1d   : > { %s217_s6 = sshll.u32 %s4927_s3, 4  ;;  %p51_p13 = scmp.ne.s32.totalorder %s3205_s20, %s3201_s19  ;;  %s218_s6 = int_to_ptr.hbm [resolvable:$true] %s217_s6 }
  0x1e   : > { %2871 = dma.hbm_to_vmem [thread:$0]  (!%p3321_p10), %s218_s6, 4096, %s220_s12, [#allocation9], %s4895_s15, %s4895_s15, %s4896_s16  }
  0x1f   : > { %p52_p0 = scmp.eq.s32.totalorder %s3217_s23, 0  ;;  %s5050_s7 = smov (%p37_p12, %s35_s7), 0 }
  0x20   : > { %p3357_p5 = por %p3294_p2, %p51_p13  ;;  %s39_s14 = ssub.s32 %s3213_s22, %s5050_s7 }
  0x21   : > { %p3351_p3 = por %p52_p0, %p51_p13  ;;  %p2883_p7 = scmp.lt.s32.totalorder %s3217_s23, 2 }
  0x22   : > { %p42_p9 = scmp.eq.s32.totalorder %s39_s14, 0  ;;  %s236_s17 = sand.u32 1, %s3205_s20  }
  0x23   : > { %s2540_s24 = sshll.u32 %s236_s17, 7  ;;  %s2779_s30 = sshll.u32 %s3213_s22, 7 }
  0x24   : > { %s3366_s25 = scalar_select %p42_p9, %s3205_s20, %s44_s10  }
  0x25   : > { %s246_s12 = scalar_lea.hbm %s4889_s0, %s2779_s30  ;;  %s240_s15 = scalar_lea.vmem [#allocation2], %s2540_s24 }
  0x26   : > { %s249_s16 = sshll.u32 %s240_s15, 4  ;;  %s247_s27 = sshll.u32 %s246_s12, 4  ;;  %s250_s16 = int_to_ptr.vmem [resolvable:$true] %s249_s16  ;;  %s248_s27 = int_to_ptr.hbm [resolvable:$true] %s247_s27 }
  0x27   : > { %p2873_p2 = pnand %p2883_p7, %p3351_p3  ;;  %s237_s1 = scalar_lea.sflag [#allocation3], %s236_s17 }
  0x28   : > { %s4930_s2 = smov 8   ;;  %s4931_s3 = smov 128  }
  0x29   : > { %2875 = dma.hbm_to_vmem [thread:$0]  (!%p2873_p2), %s248_s27, 2048, %s250_s16, %s237_s1, %s4931_s3, %s4931_s3, %s4930_s2  }
  0x2a   : > { %261 = sbr.rel (%p3313_p8) target bundleno = 883 (0x373), region = 40 }
  0x2f   : > { %s3380_s10 = sand.u32 1, %s3201_s19  }
  0x30   : > { %s2544_s15 = sshll.u32 %s3380_s10, 7  ;;  %s264_s14 = scalar_lea.sflag [#allocation3], %s3380_s10 }
  0x31   : > { %s3386_s13 = scalar_lea.vmem [#allocation2], %s2544_s15 }
  0x32   : > { %3180 = dma.done.wait (%p3300_p4), %s264_s14, 2048  }
  0x33   : > { %3182 = vsyncadd (%p3300_p4), %s264_s14, 4294965248 }
  0x34   : > { %3184 = dma.done.wait (%p3290_p1), [#allocation6], 2080  }
  0x35   : > { %3186 = vsyncadd (%p3290_p1), [#allocation6], 4294965216 }
  0x36   : > { %3188 = dma.done.wait (%p3290_p1), [#allocation9], 4096  }
  0x37   : > { %3190 = vsyncadd (%p3290_p1), [#allocation9], 4294963200  ;;  %v312_v0 = vld [vmem:[%s3386_s13] sm:$0xff]  ;;  %v313_v1 = vld [vmem:[%s3386_s13 + $0x8] sm:$0xff]  ;;  %s4796_s3 = scalar_lea.vmem [#allocation10], %s2544_s15  ;;  %s2829_s26 = sshll.u32 %s3209_s21, 7 }
  0x38   : > { %v328_v2 = vpack.c.bf16 %v313_v1, %v312_v0  ;;  %v314_v3 = vld [vmem:[%s3386_s13 + $0x10] sm:$0xff]  ;;  %v315_v4 = vld [vmem:[%s3386_s13 + $0x18] sm:$0xff]  ;;  %v316_v6 = vld [vmem:[%s3386_s13 + $0x20] sm:$0xff]  ;;  %s2416_s16 = scalar_lea.hbm %s4894_s5, %s2829_s26  ;;  %s2417_s17 = sshll.u32 %s4796_s3, 4  ;;  %s2418_s17 = int_to_ptr.vmem [resolvable:$true] %s2417_s17 }
  0x39   : > { %v329_v5 = vpack.c.bf16 %v315_v4, %v314_v3  ;;  %v317_v7 = vld [vmem:[%s3386_s13 + $0x28] sm:$0xff]  ;;  %v318_v9 = vld [vmem:[%s3386_s13 + $0x30] sm:$0xff]  ;;  %v319_v10 = vld [vmem:[%s3386_s13 + $0x38] sm:$0xff]  ;;  %s2419_s24 = sshll.u32 %s2416_s16, 4  ;;  %s2403_s21 = scalar_lea.sflag [#allocation4], %s3380_s10  ;;  %s2420_s24 = int_to_ptr.hbm [resolvable:$true] %s2419_s24 }
  0x3a   : > { %358 = vxpose.xlu0.c.b16.start [1/8] %v328_v2, 128  ;;  %v330_v8 = vpack.c.bf16 %v317_v7, %v316_v6  ;;  %v331_v11 = vpack.c.bf16 %v319_v10, %v318_v9  ;;  %v320_v12 = vld [vmem:[%s3386_s13 + $0x40] sm:$0xff]  ;;  %v321_v13 = vld [vmem:[%s3386_s13 + $0x48] sm:$0xff]  ;;  %v322_v15 = vld [vmem:[%s3386_s13 + $0x50] sm:$0xff]  ;;  %s3141_s30 = sshra.s32 %s2420_s24, 4  ;;  %s3147_s27 = scalar_lea.hbm %s4894_s5, 256  ;;  %s3142_s30 = int_to_ptr.hbm [resolvable:$true] %s3141_s30 }
  0x3b   : > { %v332_v14 = vpack.c.bf16 %v321_v13, %v320_v12  ;;  %v323_v16 = vld [vmem:[%s3386_s13 + $0x58] sm:$0xff]  ;;  %v2607_v18 = vld [vmem:[#allocation5 + $0x70] sm:$0xf]  ;;  %v2794_v20 = vld [vmem:[#allocation5 + $0x74] sm:$0xf]  ;;  %s3143_s6 = scalar_lea.hbm %s3142_s30, 128  ;;  %p3148_p10 = scmp.lt.s32.totalorder %s3142_s30, %s4894_s5 }
  0x3c   : > { %v333_v17 = vpack.c.bf16 %v323_v16, %v322_v15  ;;  %v2795_v19 = vld [vmem:[#allocation5 + $0x74] sm:$0xf0]  ;;  %v2609_v22 = vld [vmem:[#allocation5 + $0x78] sm:$0xf0]  ;;  %v2599_v23 = vld [vmem:[#allocation5 + $0x60] sm:$0xf]  ;;  %p3144_p1 = scmp.ne.s32.totalorder %s3142_s30, %s3143_s6  ;;  %p3149_p12 = scmp.lt.s32.totalorder %s3147_s27, %s3143_s6 }
  0x3d   : > { %v2608_v21 = vor.u32 %v2795_v19, %v2607_v18  ;;  %v2793_v24 = vld [vmem:[#allocation5 + $0x64] sm:$0xf0]  ;;  %v2612_v25 = vor.u32 %v2794_v20, %v2609_v22  ;;  %v2792_v26 = vld [vmem:[#allocation5 + $0x64] sm:$0xf]  ;;  %v2601_v27 = vld [vmem:[#allocation5 + $0x68] sm:$0xf0] }
  0x3e   : > { %v2600_v28 = vor.u32 %v2793_v24, %v2599_v23  ;;  %v2604_v29 = vor.u32 %v2792_v26, %v2601_v27  ;;  %v2591_v30 = vld [vmem:[#allocation5 + $0x50] sm:$0xf]  ;;  %v2791_v31 = vld [vmem:[#allocation5 + $0x54] sm:$0xf0]  ;;  %v2790_v32 = vld [vmem:[#allocation5 + $0x54] sm:$0xf]  ;;  %p3145_p4 = pnand %p3144_p1, %p3357_p5  ;;  %p3150_p13 = por %p3149_p12, %p3148_p10 }
  0x3f   : > { %454 = vmatpush.bf16.msra.mxu0 %v2608_v21  ;;  %2830 = vmatpush.bf16.msra.mxu2 %v2608_v21  ;;  %v2593_v33 = vld [vmem:[#allocation5 + $0x58] sm:$0xf0]  ;;  %v2592_v34 = vor.u32 %v2791_v31, %v2591_v30  ;;  %v324_v35 = vld [vmem:[%s3386_s13 + $0x60] sm:$0xff]  ;;  %v2789_v38 = vld [vmem:[#allocation5 + $0x44] sm:$0xf0] }
  0x40   : > { %503 = vmatpush.bf16.msra.mxu1 %v2612_v25  ;;  %2838 = vmatpush.bf16.msra.mxu3 %v2612_v25  ;;  %v2596_v36 = vor.u32 %v2790_v32, %v2593_v33  ;;  %v2583_v37 = vld [vmem:[#allocation5 + $0x40] sm:$0xf]  ;;  %v325_v39 = vld [vmem:[%s3386_s13 + $0x68] sm:$0xff]  ;;  %v2788_v40 = vld [vmem:[#allocation5 + $0x44] sm:$0xf]  ;;  %p3146_p8 = pneg %p3145_p4 }
  0x41   : > { %v2585_v41 = vld [vmem:[#allocation5 + $0x48] sm:$0xf0]  ;;  %v2584_v42 = vor.u32 %v2789_v38, %v2583_v37  ;;  %v334_v43 = vpack.c.bf16 %v325_v39, %v324_v35  ;;  %v2575_v45 = vld [vmem:[#allocation5 + $0x30] sm:$0xf]  ;;  %v2787_v46 = vld [vmem:[#allocation5 + $0x34] sm:$0xf0] }
  0x42   : > { %v2588_v44 = vor.u32 %v2788_v40, %v2585_v41  ;;  %v2786_v47 = vld [vmem:[#allocation5 + $0x34] sm:$0xf]  ;;  %v2577_v48 = vld [vmem:[#allocation5 + $0x38] sm:$0xf0]  ;;  %v2576_v49 = vor.u32 %v2787_v46, %v2575_v45  ;;  %v2567_v51 = vld [vmem:[#allocation5 + $0x20] sm:$0xf]  ;;  %p3151_p0 = pnand %p3150_p13, %p3146_p8 }
  0x43   : > { %455 = vmatpush.bf16.msra.mxu0 %v2600_v28  ;;  %2831 = vmatpush.bf16.msra.mxu2 %v2600_v28  ;;  %v2580_v50 = vor.u32 %v2786_v47, %v2577_v48  ;;  %v2785_v52 = vld [vmem:[#allocation5 + $0x24] sm:$0xf0]  ;;  %v2784_v53 = vld [vmem:[#allocation5 + $0x24] sm:$0xf]  ;;  %v2569_v54 = vld [vmem:[#allocation5 + $0x28] sm:$0xf0] }
  0x44   : > { %504 = vmatpush.bf16.msra.mxu1 %v2604_v29  ;;  %2839 = vmatpush.bf16.msra.mxu3 %v2604_v29  ;;  %v2568_v55 = vor.u32 %v2785_v52, %v2567_v51  ;;  %v2572_v56 = vor.u32 %v2784_v53, %v2569_v54  ;;  %v2559_v57 = vld [vmem:[#allocation5 + $0x10] sm:$0xf]  ;;  %v2783_v58 = vld [vmem:[#allocation5 + $0x14] sm:$0xf0]  ;;  %v2782_v59 = vld [vmem:[#allocation5 + $0x14] sm:$0xf] }
  0x45   : > { %v2561_v60 = vld [vmem:[#allocation5 + $0x18] sm:$0xf0]  ;;  %v2560_v61 = vor.u32 %v2783_v58, %v2559_v57  ;;  %v326_v62 = vld [vmem:[%s3386_s13 + $0x70] sm:$0xff]  ;;  %v2551_v0 = vld [vmem:[#allocation5] sm:$0xf] }
  0x46   : > { %v2564_v63 = vor.u32 %v2782_v59, %v2561_v60  ;;  %v2781_v1 = vld [vmem:[#allocation5 + $0x4] sm:$0xf0]  ;;  %v327_v2 = vld [vmem:[%s3386_s13 + $0x78] sm:$0xff]  ;;  %v2780_v3 = vld [vmem:[#allocation5 + $0x4] sm:$0xf] }
  0x47   : > { %456 = vmatpush.bf16.msra.mxu0 %v2592_v34  ;;  %2832 = vmatpush.bf16.msra.mxu2 %v2592_v34  ;;  %v2553_v4 = vld [vmem:[#allocation5 + $0x8] sm:$0xf0]  ;;  %v335_v6 = vpack.c.bf16 %v327_v2, %v326_v62  ;;  %v352_v16 = vld [vmem:[#allocation7] sm:$0x3]  ;;  %v2703_v21 = vld [vmem:[#allocation8 + $0x70] sm:$0xf] }
  0x48   : > { %505 = vmatpush.bf16.msra.mxu1 %v2596_v36  ;;  %2840 = vmatpush.bf16.msra.mxu3 %v2596_v36  ;;  %v2556_v7 = vor.u32 %v2780_v3, %v2553_v4  ;;  %v3418_v18 = vperm.slane %v352_v16, 1  ;;  %v2811_v22 = vld [vmem:[#allocation8 + $0x74] sm:$0xf0]  ;;  %v2767_v40 = vld [vmem:[#allocation8 + $0xf0] sm:$0xf] }
  0x49   : > { %v2704_v25 = vor.u32 %v2811_v22, %v2703_v21  ;;  %v2827_v41 = vld [vmem:[#allocation8 + $0xf4] sm:$0xf0]  ;;  %v2810_v51 = vld [vmem:[#allocation8 + $0x74] sm:$0xf]  ;;  %v2705_v52 = vld [vmem:[#allocation8 + $0x78] sm:$0xf0] }
  0x4a   : > { %359 = vxpose.xlu0.c.b16.cont [2/8] %v329_v5, 128  ;;  %v2552_v5 = vor.u32 %v2781_v1, %v2551_v0  ;;  %v2768_v45 = vor.u32 %v2827_v41, %v2767_v40  ;;  %v2809_v57 = vld [vmem:[#allocation8 + $0x64] sm:$0xf0]  ;;  %v2769_v1 = vld [vmem:[#allocation8 + $0xf8] sm:$0xf0] }
  0x4b   : > { %457 = vmatpush.bf16.msra.mxu0 %v2584_v42  ;;  %2833 = vmatpush.bf16.msra.mxu2 %v2584_v42 }
  0x4c   : > { %506 = vmatpush.bf16.msra.mxu1 %v2588_v44  ;;  %2841 = vmatpush.bf16.msra.mxu3 %v2588_v44 }
  0x4f   : > { %458 = vmatpush.bf16.msra.mxu0 %v2576_v49  ;;  %2834 = vmatpush.bf16.msra.mxu2 %v2576_v49 }
  0x50   : > { %507 = vmatpush.bf16.msra.mxu1 %v2580_v50  ;;  %2842 = vmatpush.bf16.msra.mxu3 %v2580_v50 }
  0x53   : > { %459 = vmatpush.bf16.msra.mxu0 %v2568_v55  ;;  %2835 = vmatpush.bf16.msra.mxu2 %v2568_v55  ;;  %v2708_v55 = vor.u32 %v2810_v51, %v2705_v52 }
  0x54   : > { %508 = vmatpush.bf16.msra.mxu1 %v2572_v56  ;;  %2843 = vmatpush.bf16.msra.mxu3 %v2572_v56  ;;  %v2695_v56 = vld [vmem:[#allocation8 + $0x60] sm:$0xf] }
  0x55   : > { %v2696_v0 = vor.u32 %v2809_v57, %v2695_v56  ;;  %v2759_v57 = vld [vmem:[#allocation8 + $0xe0] sm:$0xf] }
  0x57   : > { %460 = vmatpush.bf16.msra.mxu0 %v2560_v61  ;;  %2836 = vmatpush.bf16.msra.mxu2 %v2560_v61  ;;  %v2826_v61 = vld [vmem:[#allocation8 + $0xf4] sm:$0xf] }
  0x58   : > { %509 = vmatpush.bf16.msra.mxu1 %v2564_v63  ;;  %2844 = vmatpush.bf16.msra.mxu3 %v2564_v63 }
  0x5a   : > { %360 = vxpose.xlu0.c.b16.cont [3/8] %v330_v8, 128 }
  0x5b   : > { %461 = vmatpush.bf16.msra.mxu0 %v2552_v5  ;;  %2837 = vmatpush.bf16.msra.mxu2 %v2552_v5 }
  0x5c   : > { %510 = vmatpush.bf16.msra.mxu1 %v2556_v7  ;;  %2845 = vmatpush.bf16.msra.mxu3 %v2556_v7 }
  0x5f   : > { %2174 = vmatpush.bf16.msrb.mxu2 %v2704_v25  ;;  %2272 = vmatpush.bf16.msrb.mxu0 %v2708_v55 }
  0x60   : > { %2223 = vmatpush.bf16.msrb.mxu3 %v2768_v45 }
  0x63   : > { %2175 = vmatpush.bf16.msrb.mxu2 %v2696_v0 }
  0x6a   : > { %361 = vxpose.xlu0.c.b16.cont [4/8] %v331_v11, 128 }
  0x7a   : > { %362 = vxpose.xlu0.c.b16.cont [5/8] %v332_v14, 128 }
  0x8a   : > { %363 = vxpose.xlu0.c.b16.cont [6/8] %v333_v17, 128  ;;  %v3416_v17 = vperm.slane %v352_v16, 0 }
  0x9a   : > { %364 = vxpose.xlu0.c.b16.cont [7/8] %v334_v43, 128 }
  0xaa   : > { %365 = vxpose.xlu0.c.b16.end [8/8] %v335_v6, 128 }
  0xe6   : > { %v366_v8 = vpop.trf.xlu0 }
  0xe7   : > { %462 = vmatmul.bf16.vlgmr.msra.gmra.mxu0 %v366_v8  ;;  %511 = vmatmul.bf16.vlgmr.msra.gmra.mxu1 %v366_v8  ;;  %v2772_v8 = vor.u32 %v2826_v61, %v2769_v1 }
  0xe9   : > { %2321 = vmatpush.bf16.msrb.mxu1 %v2772_v8 }
  0xf6   : > { %v367_v9 = vpop.trf.xlu0 }
  0xf7   : > { %467 = vmatmul.bf16.gmra.mxu0 %v367_v9  ;;  %516 = vmatmul.bf16.gmra.mxu1 %v367_v9 }
 0x106   : > { %v368_v10 = vpop.trf.xlu0 }
 0x107   : > { %472 = vmatmul.bf16.gmra.mxu0 %v368_v10  ;;  %521 = vmatmul.bf16.gmra.mxu1 %v368_v10 }
 0x116   : > { %v369_v11 = vpop.trf.xlu0 }
 0x117   : > { %477 = vmatmul.bf16.gmra.mxu0 %v369_v11  ;;  %526 = vmatmul.bf16.gmra.mxu1 %v369_v11 }
 0x126   : > { %v370_v12 = vpop.trf.xlu0 }
 0x127   : > { %482 = vmatmul.bf16.vlgmr.msra.gmra.mxu2 %v370_v12  ;;  %531 = vmatmul.bf16.vlgmr.msra.gmra.mxu3 %v370_v12 }
 0x136   : > { %v371_v13 = vpop.trf.xlu0 }
 0x137   : > { %487 = vmatmul.bf16.gmra.mxu2 %v371_v13  ;;  %536 = vmatmul.bf16.gmra.mxu3 %v371_v13 }
 0x146   : > { %v372_v14 = vpop.trf.xlu0 }
 0x147   : > { %492 = vmatmul.bf16.gmra.mxu2 %v372_v14  ;;  %541 = vmatmul.bf16.gmra.mxu3 %v372_v14 }
 0x156   : > { %v373_v15 = vpop.trf.xlu0 }
 0x157   : > { %497 = vmatmul.bf16.gmra.mxu2 %v373_v15  ;;  %546 = vmatmul.bf16.gmra.mxu3 %v373_v15 }
 0x164   : > { %v463_v19 = vpop.f32.mrf.mxu0  ;;  %v512_v20 = vpop.f32.mrf.mxu1 }
 0x165   : > { %v3421_v23 = vadd.f32 %v463_v19, %v3416_v17  ;;  %v3424_v24 = vadd.f32 %v512_v20, %v3418_v18 }
 0x167   : > { %v3427_v26 = vmul.f32 0.70710677, %v3421_v23  ;;  %v3430_v27 = vmul.f32 0.70710677, %v3424_v24 }
 0x169   : > { %v616_v28 = vmul.f32 %v3427_v26, %v3427_v26  ;;  %v656_v29 = vmul.f32 %v3430_v27, %v3430_v27 }
 0x16b   : > { %v3436_v30 = vmin.f32 %v616_v28, 16.0  ;;  %v3438_v31 = vmin.f32 %v656_v29, 16.0 }
 0x16c   : > { %v465_v32 = vpop.f32.mrf.mxu0  ;;  %v514_v33 = vpop.f32.mrf.mxu1 }
 0x16d   : > { %v618_v34 = vmul.f32 2.1237322e-06, %v3436_v30  ;;  %v629_v35 = vmul.f32 3.8918573e-05, %v3436_v30  ;;  %v658_v36 = vmul.f32 2.1237322e-06, %v3438_v31  ;;  %v3444_v37 = vadd.f32 %v465_v32, %v3416_v17 }
 0x16e   : > { %v669_v38 = vmul.f32 3.8918573e-05, %v3438_v31  ;;  %v3448_v39 = vadd.f32 %v514_v33, %v3418_v18 }
 0x16f   : > { %v619_v42 = vadd.f32 0.00028619796, %v618_v34  ;;  %v630_v43 = vadd.f32 0.001143296, %v629_v35  ;;  %v659_v44 = vadd.f32 0.00028619796, %v658_v36 }
 0x170   : > { %v670_v46 = vadd.f32 0.001143296, %v669_v38  ;;  %v3451_v47 = vmul.f32 0.70710677, %v3444_v37  ;;  %v3456_v50 = vmul.f32 0.70710677, %v3448_v39 }
 0x171   : > { %v620_v48 = vmul.f32 %v619_v42, %v3436_v30  ;;  %v631_v49 = vmul.f32 %v630_v43, %v3436_v30  ;;  %v660_v59 = vmul.f32 %v659_v44, %v3438_v31 }
 0x172   : > { %v671_v53 = vmul.f32 %v670_v46, %v3438_v31  ;;  %v696_v54 = vmul.f32 %v3451_v47, %v3451_v47  ;;  %v736_v60 = vmul.f32 %v3456_v50, %v3456_v50 }
 0x173   : > { %v632_v58 = vadd.f32 0.014752088, %v631_v49  ;;  %v621_v2 = vadd.f32 0.0036580483, %v620_v48  ;;  %v661_v10 = vadd.f32 0.0036580483, %v660_v59 }
 0x174   : > { %v672_v62 = vadd.f32 0.014752088, %v671_v53  ;;  %v3464_v63 = vmin.f32 %v696_v54, 16.0  ;;  %v3467_v4 = vmin.f32 %v736_v60, 16.0  ;;  %v468_v46 = vpop.f32.mrf.mxu0  ;;  %v517_v56 = vpop.f32.mrf.mxu1 }
 0x175   : > { %v633_v3 = vmul.f32 %v632_v58, %v3436_v30  ;;  %v622_v15 = vmul.f32 %v621_v2, %v3436_v30  ;;  %v662_v22 = vmul.f32 %v661_v10, %v3438_v31  ;;  %v3492_v51 = vadd.f32 %v468_v46, %v3416_v17  ;;  %v2825_v58 = vld [vmem:[#allocation8 + $0xe4] sm:$0xf0] }
 0x176   : > { %v673_v5 = vmul.f32 %v672_v62, %v3438_v31  ;;  %v698_v6 = vmul.f32 2.1237322e-06, %v3464_v63  ;;  %v709_v7 = vmul.f32 3.8918573e-05, %v3464_v63  ;;  %v749_v20 = vmul.f32 3.8918573e-05, %v3467_v4 }
 0x177   : > { %v634_v9 = vadd.f32 0.112945676, %v633_v3  ;;  %v623_v33 = vadd.f32 0.05243302, %v622_v15  ;;  %v663_v40 = vadd.f32 0.05243302, %v662_v22  ;;  %v3505_v2 = vadd.f32 %v517_v56, %v3418_v18 }
 0x178   : > { %v674_v11 = vadd.f32 0.112945676, %v673_v5  ;;  %v699_v12 = vadd.f32 0.00028619796, %v698_v6  ;;  %v710_v13 = vadd.f32 0.001143296, %v709_v7  ;;  %v2760_v3 = vor.u32 %v2825_v58, %v2759_v57 }
 0x179   : > { %v635_v14 = vmul.f32 %v634_v9, %v3436_v30  ;;  %v750_v36 = vadd.f32 0.001143296, %v749_v20  ;;  %v738_v41 = vmul.f32 2.1237322e-06, %v3467_v4  ;;  %v624_v48 = vmul.f32 %v623_v33, %v3436_v30  ;;  %v2687_v57 = vld [vmem:[#allocation8 + $0x50] sm:$0xf] }
 0x17a   : > { %v675_v16 = vmul.f32 %v674_v11, %v3438_v31  ;;  %v711_v19 = vmul.f32 %v710_v13, %v3464_v63  ;;  %v700_v28 = vmul.f32 %v699_v12, %v3464_v63  ;;  %v664_v52 = vmul.f32 %v663_v40, %v3438_v31  ;;  %2224 = vmatpush.bf16.msrb.mxu3 %v2760_v3  ;;  %v2807_v58 = vld [vmem:[#allocation8 + $0x54] sm:$0xf0] }
 0x17b   : > { %v636_v21 = vadd.f32 0.4994258, %v635_v14  ;;  %v751_v45 = vmul.f32 %v750_v36, %v3467_v4  ;;  %v739_v49 = vadd.f32 0.00028619796, %v738_v41  ;;  %v625_v59 = vadd.f32 0.18741608, %v624_v48 }
 0x17c   : > { %v676_v25 = vadd.f32 0.4994258, %v675_v16  ;;  %v712_v29 = vadd.f32 0.014752088, %v711_v19  ;;  %v701_v43 = vadd.f32 0.0036580483, %v700_v28  ;;  %v470_v48 = vpop.f32.mrf.mxu0 }
 0x17d   : > { %v637_v32 = vmul.f32 %v636_v21, %v3436_v30  ;;  %v752_v55 = vadd.f32 0.014752088, %v751_v45  ;;  %v740_v0 = vmul.f32 %v739_v49, %v3467_v4  ;;  %v3502_v1 = vmul.f32 0.70710677, %v3492_v51  ;;  %v2808_v28 = vld [vmem:[#allocation8 + $0x64] sm:$0xf] }
 0x17e   : > { %v677_v34 = vmul.f32 %v676_v25, %v3438_v31  ;;  %v713_v35 = vmul.f32 %v712_v29, %v3464_v63  ;;  %v702_v53 = vmul.f32 %v701_v43, %v3464_v63  ;;  %v665_v7 = vadd.f32 0.18741608, %v664_v52  ;;  %v2697_v29 = vld [vmem:[#allocation8 + $0x68] sm:$0xf0] }
 0x17f   : > { %v3482_v38 = vadd.f32 1.0, %v637_v32  ;;  %v753_v61 = vmul.f32 %v752_v55, %v3467_v4  ;;  %v3513_v10 = vmul.f32 0.5, %v3421_v23  ;;  %v626_v13 = vmul.f32 %v625_v59, %v3436_v30 }
 0x180   : > { %v3485_v42 = vadd.f32 1.0, %v677_v34  ;;  %v714_v44 = vadd.f32 0.112945676, %v713_v35  ;;  %v703_v8 = vadd.f32 0.05243302, %v702_v53  ;;  %v3519_v15 = vmul.f32 0.5, %v3424_v24 }
 0x181   : > { %2943 = vrcp.f32 %v3482_v38  ;;  %v754_v12 = vadd.f32 0.112945676, %v753_v61  ;;  %v741_v19 = vadd.f32 0.0036580483, %v740_v0  ;;  %v776_v23 = vmul.f32 %v3502_v1, %v3502_v1 }
 0x182   : > { %2945 = vrcp.f32 %v3485_v42  ;;  %v715_v54 = vmul.f32 %v714_v44, %v3464_v63  ;;  %v3527_v21 = vmul.f32 0.70710677, %v3505_v2  ;;  %v666_v22 = vmul.f32 %v665_v7, %v3438_v31  ;;  %v2753_v7 = vld [vmem:[#allocation8 + $0xd8] sm:$0xf0] }
 0x183   : > { %v755_v20 = vmul.f32 %v754_v12, %v3467_v4  ;;  %v704_v30 = vmul.f32 %v703_v8, %v3464_v63  ;;  %v627_v32 = vadd.f32 1.1283791, %v626_v13  ;;  %v3534_v34 = vmul.f32 0.5, %v3444_v37  ;;  %v519_v37 = vpop.f32.mrf.mxu1  ;;  %v2761_v12 = vld [vmem:[#allocation8 + $0xe8] sm:$0xf0] }
 0x184   : > { %v716_v60 = vadd.f32 0.4994258, %v715_v54  ;;  %v3537_v35 = vmul.f32 0.5, %v3448_v39  ;;  %v742_v36 = vmul.f32 %v741_v19, %v3467_v4  ;;  %v3541_v40 = vmin.f32 %v776_v23, 16.0 }
 0x185   : > { %v756_v24 = vadd.f32 0.4994258, %v755_v20  ;;  %v816_v41 = vmul.f32 %v3527_v21, %v3527_v21  ;;  %v667_v43 = vadd.f32 1.1283791, %v666_v22  ;;  %v705_v45 = vadd.f32 0.18741608, %v704_v30 }
 0x186   : > { %v717_v9 = vmul.f32 %v716_v60, %v3464_v63  ;;  %v2700_v46 = vor.u32 %v2808_v28, %v2697_v29  ;;  %v648_v49 = vand.u32 2147483647, %v3482_v38  ;;  %v650_v39 = vand.u32 2147483648, %v3482_v38  ;;  %v2751_v20 = vld [vmem:[#allocation8 + $0xd0] sm:$0xf] }
 0x187   : > { %v3498_v62 = vpop.eup %2943  ;;  %v757_v31 = vmul.f32 %v756_v24, %v3467_v4  ;;  %v688_v52 = vand.u32 2147483647, %v3485_v42  ;;  %vm644_vm0 = vweird.f32 %v3482_v38  ;;  %v690_v56 = vand.u32 2147483648, %v3485_v42  ;;  %v2823_v24 = vld [vmem:[#allocation8 + $0xd4] sm:$0xf0] }
 0x188   : > { %v3507_v5 = vpop.eup %2945  ;;  %v640_v6 = vmul.f32 %v3498_v62, %v3482_v38  ;;  %v3521_v16 = vadd.f32 1.0, %v717_v9  ;;  %vm645_vm1 = vweird.f32 %v3498_v62  ;;  %2273 = vmatpush.bf16.msrb.mxu0 %v2700_v46  ;;  %vm684_vm2 = vweird.f32 %v3485_v42 }
 0x189   : > { %v680_v11 = vmul.f32 %v3507_v5, %v3485_v42  ;;  %v3549_v53 = vadd.f32 1.0, %v757_v31  ;;  %v743_v59 = vadd.f32 0.05243302, %v742_v36  ;;  %v778_v60 = vmul.f32 2.1237322e-06, %v3541_v40  ;;  %vm3567_vm4 = vmor %vm644_vm0, %vm645_vm1 }
 0x18a   : > { %v641_v14 = vsub.f32 1.0, %v640_v6  ;;  %2947 = vrcp.f32 %v3521_v16  ;;  %v3559_v61 = vmin.f32 %v816_v41, 16.0  ;;  %vm685_vm3 = vweird.f32 %v3507_v5  ;;  %v2824_v6 = vld [vmem:[#allocation8 + $0xe4] sm:$0xf]  ;;  %v2806_v31 = vld [vmem:[#allocation8 + $0x54] sm:$0xf] }
 0x18b   : > { %v681_v25 = vsub.f32 1.0, %v680_v11  ;;  %v706_v3 = vmul.f32 %v705_v45, %v3464_v63  ;;  %2949 = vrcp.f32 %v3549_v53  ;;  %vm3571_vm5 = vcmp.eq.f32.partialorder %v648_v49, 8.507059e+37  ;;  %vm3592_vm7 = vmor %vm684_vm2, %vm685_vm3  ;;  %v2689_v41 = vld [vmem:[#allocation8 + $0x58] sm:$0xf0]  ;;  %v2679_v49 = vld [vmem:[#allocation8 + $0x40] sm:$0xf] }
 0x18c   : > { %v642_v33 = vmul.f32 %v3498_v62, %v641_v14  ;;  %v651_v9 = vor.u32 1.1754944e-38, %v650_v39  ;;  %vm3575_vm6 = vcmp.eq.f32.partialorder %v688_v52, 8.507059e+37  ;;  %v691_v13 = vor.u32 1.1754944e-38, %v690_v56  ;;  %v473_v39 = vpop.f32.mrf.mxu0 }
 0x18d   : > { %v682_v44 = vmul.f32 %v3507_v5, %v681_v25  ;;  %v3585_v14 = vmul.f32 0.5, %v3492_v51  ;;  %v2688_v19 = vor.u32 %v2807_v58, %v2687_v57  ;;  %v628_v23 = vmul.f32 %v627_v32, %v3427_v26  ;;  %v2805_v57 = vld [vmem:[#allocation8 + $0x44] sm:$0xf0] }
 0x18e   : > { %v643_v55 = vadd.f32 %v3498_v62, %v642_v33  ;;  %v744_v25 = vmul.f32 %v743_v59, %v3467_v4  ;;  %v779_v30 = vadd.f32 0.00028619796, %v778_v60  ;;  %v707_v28 = vadd.f32 1.1283791, %v706_v3  ;;  %v2822_v59 = vld [vmem:[#allocation8 + $0xd4] sm:$0xf] }
 0x18f   : > { %v683_v0 = vadd.f32 %v3507_v5, %v682_v44  ;;  %4938 = vst [vmem:[#allocation15_spill] sm:$0xff] %v3585_v14  ;;  %2176 = vmatpush.bf16.msrb.mxu2 %v2688_v19  ;;  %v2764_v26 = vor.u32 %v2824_v6, %v2761_v12  ;;  %v3602_v29 = vadd.f32 %v470_v48, %v3416_v17  ;;  %v3607_v33 = vmul.f32 0.5, %v3505_v2  ;;  %v522_v2 = vpop.f32.mrf.mxu1  ;;  %v2812_v14 = vld [vmem:[#allocation8 + $0x84] sm:$0xf] }
 0x190   : > { %v3551_v54 = vpop.eup %2947  ;;  %v647_v38 = vsel %vm3567_vm4, %v3498_v62, %v643_v55  ;;  %v818_v62 = vmul.f32 2.1237322e-06, %v3559_v61  ;;  %v3610_v36 = vadd.f32 %v519_v37, %v3418_v18  ;;  %v728_v45 = vand.u32 2147483647, %v3521_v16 }
 0x191   : > { %v720_v63 = vmul.f32 %v3551_v54, %v3521_v16  ;;  %v687_v51 = vsel %vm3592_vm7, %v3507_v5, %v683_v0  ;;  %v652_v42 = vsel %vm3571_vm5, %v651_v9, %v647_v38  ;;  %4941 = vst [vmem:[#allocation16_spill] sm:$0xff] %v3607_v33  ;;  %v3612_v44 = vpop.eup %2949  ;;  %v668_v5 = vmul.f32 %v667_v43, %v3430_v27 }
 0x192   : > { %2322 = vmatpush.bf16.msrb.mxu1 %v2764_v26  ;;  %v3617_v46 = vmul.f32 0.70710677, %v3602_v29  ;;  %v2752_v48 = vor.u32 %v2823_v24, %v2751_v20  ;;  %v692_v37 = vsel %vm3575_vm6, %v691_v13, %v687_v51  ;;  %v745_v52 = vadd.f32 0.18741608, %v744_v25  ;;  %v2743_v24 = vld [vmem:[#allocation8 + $0xc0] sm:$0xf] }
 0x193   : > { %v721_v32 = vsub.f32 1.0, %v720_v63  ;;  %v780_v55 = vmul.f32 %v779_v30, %v3541_v40  ;;  %v819_v56 = vadd.f32 0.00028619796, %v818_v62  ;;  %v653_v58 = vmul.f32 %v652_v42, %v628_v23  ;;  %v2821_v51 = vld [vmem:[#allocation8 + $0xc4] sm:$0xf0] }
 0x194   : > { %v3623_v27 = vmul.f32 %v707_v28, %v3451_v47  ;;  %vm724_vm8 = vweird.f32 %v3521_v16  ;;  %v856_v43 = vmul.f32 %v3617_v46, %v3617_v46  ;;  %2225 = vmatpush.bf16.msrb.mxu3 %v2752_v48  ;;  %v730_v0 = vand.u32 2147483648, %v3521_v16  ;;  %v2804_v48 = vld [vmem:[#allocation8 + $0x44] sm:$0xf]  ;;  %v2802_v63 = vld [vmem:[#allocation8 + $0x34] sm:$0xf] }
 0x195   : > { %v722_v60 = vmul.f32 %v3551_v54, %v721_v32  ;;  %v760_v3 = vmul.f32 %v3612_v44, %v3549_v53  ;;  %v3633_v6 = vmul.f32 0.70710677, %v3610_v36  ;;  %v693_v47 = vmul.f32 %v692_v37, %v668_v5  ;;  %v2801_v37 = vld [vmem:[#allocation8 + $0x24] sm:$0xf0] }
 0x196   : > { %v3635_v8 = vmin.f32 %v856_v43, 16.0  ;;  %v2692_v9 = vor.u32 %v2806_v31, %v2689_v41  ;;  %v2680_v11 = vor.u32 %v2805_v57, %v2679_v49  ;;  %vm3637_vm9 = vcmp.eq.f32.partialorder %v728_v45, 8.507059e+37  ;;  %v2681_v49 = vld [vmem:[#allocation8 + $0x48] sm:$0xf0]  ;;  %v475_v57 = vpop.f32.mrf.mxu0 }
 0x197   : > { %v746_v12 = vmul.f32 %v745_v52, %v3467_v4  ;;  %v781_v38 = vadd.f32 0.0036580483, %v780_v55  ;;  %v820_v13 = vmul.f32 %v819_v56, %v3559_v61  ;;  %v896_v19 = vmul.f32 %v3633_v6, %v3633_v6 }
 0x198   : > { %v2613_v20 = vclamps-f32 %v653_v58, 1.0  ;;  %v858_v23 = vmul.f32 2.1237322e-06, %v3635_v8  ;;  %2274 = vmatpush.bf16.msrb.mxu0 %v2692_v9  ;;  %2177 = vmatpush.bf16.msrb.mxu2 %v2680_v11  ;;  %v2756_v22 = vor.u32 %v2822_v59, %v2753_v7  ;;  %v3647_v25 = vadd.f32 %v473_v39, %v3416_v17  ;;  %v524_v58 = vpop.f32.mrf.mxu1  ;;  %v2820_v7 = vld [vmem:[#allocation8 + $0xc4] sm:$0xf] }
 0x199   : > { %v723_v30 = vadd.f32 %v3551_v54, %v722_v60  ;;  %vm725_vm10 = vweird.f32 %v3551_v54  ;;  %v761_v4 = vsub.f32 1.0, %v760_v3  ;;  %v3651_v62 = vmin.f32 %v896_v19, 16.0  ;;  %v2803_v3 = vld [vmem:[#allocation8 + $0x34] sm:$0xf0] }
 0x19a   : > { %v2614_v28 = vclamps-f32 %v693_v47, 1.0  ;;  %v731_v26 = vor.u32 1.1754944e-38, %v730_v0  ;;  %v859_v42 = vadd.f32 0.00028619796, %v858_v23  ;;  %2323 = vmatpush.bf16.msrb.mxu1 %v2756_v22  ;;  %v3654_v32 = vmul.f32 0.70710677, %v3647_v25  ;;  %vm3665_vm11 = vmor %vm724_vm8, %vm725_vm10 }
 0x19b   : > { %v770_v31 = vand.u32 2147483648, %v3549_v53  ;;  %v782_v41 = vmul.f32 %v781_v38, %v3541_v40  ;;  %v821_v5 = vadd.f32 0.0036580483, %v820_v13  ;;  %v898_v45 = vmul.f32 2.1237322e-06, %v3651_v62 }
 0x19c   : > { %v3659_v39 = vadd.f32 1.0, %v2613_v20  ;;  %v747_v52 = vadd.f32 1.1283791, %v746_v12  ;;  %v768_v55 = vand.u32 2147483647, %v3549_v53  ;;  %v936_v56 = vmul.f32 %v3654_v32, %v3654_v32 }
 0x19d   : > { %v727_v43 = vsel %vm3665_vm11, %v3551_v54, %v723_v30  ;;  %v762_v59 = vmul.f32 %v3612_v44, %v761_v4  ;;  %v860_v16 = vmul.f32 %v859_v42, %v3635_v8  ;;  %v3678_v60 = vadd.f32 %v522_v2, %v3418_v18  ;;  %v2671_v0 = vld [vmem:[#allocation8 + $0x30] sm:$0xf]  ;;  %v2745_v38 = vld [vmem:[#allocation8 + $0xc8] sm:$0xf0] }
 0x19e   : > { %v3680_v47 = vadd.f32 1.0, %v2614_v28  ;;  %v899_v9 = vadd.f32 0.00028619796, %v898_v45  ;;  %v3682_v11 = vmin.f32 %v936_v56, 16.0  ;;  %v2744_v12 = vor.u32 %v2821_v51, %v2743_v24  ;;  %v2735_v24 = vld [vmem:[#allocation8 + $0xb0] sm:$0xf] }
 0x19f   : > { %v771_v13 = vor.u32 1.1754944e-38, %v770_v31  ;;  %v783_v19 = vadd.f32 0.05243302, %v782_v41  ;;  %v822_v54 = vmul.f32 %v821_v5, %v3559_v61  ;;  %v3686_v20 = vmul.f32 0.70710677, %v3678_v60 }
 0x1a0   : > { %v732_v2 = vsel %vm3637_vm9, %v731_v26, %v727_v43  ;;  %vm3690_vm12 = vcmp.eq.f32.partialorder %v768_v55, 8.507059e+37  ;;  %v938_v22 = vmul.f32 2.1237322e-06, %v3682_v11  ;;  %2226 = vmatpush.bf16.msrb.mxu3 %v2744_v12  ;;  %v2684_v30 = vor.u32 %v2804_v48, %v2681_v49  ;;  %v2819_v51 = vld [vmem:[#allocation8 + $0xb4] sm:$0xf0] }
 0x1a1   : > { %v2672_v4 = vor.u32 %v2803_v3, %v2671_v0  ;;  %v763_v28 = vadd.f32 %v3612_v44, %v762_v59  ;;  %v861_v42 = vadd.f32 0.0036580483, %v860_v16  ;;  %v976_v31 = vmul.f32 %v3686_v20, %v3686_v20  ;;  %v2673_v48 = vld [vmem:[#allocation8 + $0x38] sm:$0xf0]  ;;  %v2663_v49 = vld [vmem:[#allocation8 + $0x20] sm:$0xf] }
 0x1a2   : > { %v2748_v41 = vor.u32 %v2820_v7, %v2745_v38  ;;  %vm765_vm13 = vweird.f32 %v3612_v44  ;;  %v900_v26 = vmul.f32 %v899_v9, %v3651_v62  ;;  %2275 = vmatpush.bf16.msrb.mxu0 %v2684_v30  ;;  %v3701_v5 = vadd.f32 %v475_v57, %v3416_v17  ;;  %v2818_v16 = vld [vmem:[#allocation8 + $0xb4] sm:$0xf]  ;;  %v2665_v23 = vld [vmem:[#allocation8 + $0x28] sm:$0xf0] }
 0x1a3   : > { %2178 = vmatpush.bf16.msrb.mxu2 %v2672_v4  ;;  %v3704_v45 = vadd.f32 %v524_v58, %v3418_v18  ;;  %v784_v55 = vmul.f32 %v783_v19, %v3541_v40  ;;  %v823_v56 = vadd.f32 0.05243302, %v822_v54  ;;  %v3707_v43 = vmin.f32 %v976_v31, 16.0  ;;  %v2737_v58 = vld [vmem:[#allocation8 + $0xb8] sm:$0xf0]  ;;  %v478_v54 = vpop.f32.mrf.mxu0 }
 0x1a4   : > { %2324 = vmatpush.bf16.msrb.mxu1 %v2748_v41  ;;  %v2736_v59 = vor.u32 %v2819_v51, %v2735_v24  ;;  %v748_v0 = vmul.f32 %v747_v52, %v3456_v50  ;;  %vm764_vm14 = vweird.f32 %v3549_v53  ;;  %v939_v57 = vadd.f32 0.00028619796, %v938_v22  ;;  %v2727_v51 = vld [vmem:[#allocation8 + $0xa0] sm:$0xf] }
 0x1a5   : > { %v3712_v3 = vmul.f32 0.70710677, %v3701_v5  ;;  %v733_v7 = vmul.f32 %v732_v2, %v3623_v27  ;;  %vm3717_vm15 = vmor %vm764_vm14, %vm765_vm13  ;;  %v862_v12 = vmul.f32 %v861_v42, %v3635_v8  ;;  %v978_v38 = vmul.f32 2.1237322e-06, %v3707_v43  ;;  %v527_v2 = vpop.f32.mrf.mxu1  ;;  %v2817_v42 = vld [vmem:[#allocation8 + $0xa4] sm:$0xf0] }
 0x1a6   : > { %2227 = vmatpush.bf16.msrb.mxu3 %v2736_v59  ;;  %v2676_v50 = vor.u32 %v2802_v63, %v2673_v48  ;;  %v767_v53 = vsel %vm3717_vm15, %v3612_v44, %v763_v28  ;;  %v901_v52 = vadd.f32 0.0036580483, %v900_v26  ;;  %v3729_v19 = vmul.f32 0.70710677, %v3704_v45 }
 0x1a7   : > { %v1016_v27 = vmul.f32 %v3712_v3, %v3712_v3  ;;  %v785_v22 = vadd.f32 0.18741608, %v784_v55  ;;  %v824_v30 = vmul.f32 %v823_v56, %v3559_v61  ;;  %v2664_v4 = vor.u32 %v2801_v37, %v2663_v49 }
 0x1a8   : > { %2276 = vmatpush.bf16.msrb.mxu0 %v2676_v50  ;;  %v2740_v24 = vor.u32 %v2818_v16, %v2737_v58  ;;  %v940_v31 = vmul.f32 %v939_v57, %v3682_v11  ;;  %v979_v44 = vadd.f32 0.00028619796, %v978_v38  ;;  %v1056_v41 = vmul.f32 %v3729_v19, %v3729_v19  ;;  %v2800_v16 = vld [vmem:[#allocation8 + $0x24] sm:$0xf] }
 0x1a9   : > { %v3733_v28 = vmin.f32 %v1016_v27, 16.0  ;;  %v772_v63 = vsel %vm3690_vm12, %v771_v13, %v767_v53  ;;  %v3740_v26 = vmul.f32 0.5, %v3602_v29  ;;  %v863_v48 = vadd.f32 0.05243302, %v862_v12  ;;  %2179 = vmatpush.bf16.msrb.mxu2 %v2664_v4  ;;  %v2816_v53 = vld [vmem:[#allocation8 + $0xa4] sm:$0xf] }
 0x1aa   : > { %2325 = vmatpush.bf16.msrb.mxu1 %v2740_v24  ;;  %v3743_v49 = vadd.f32 %v478_v54, %v3416_v17  ;;  %v902_v37 = vmul.f32 %v901_v52, %v3651_v62  ;;  %v3748_v56 = vadd.f32 %v527_v2, %v3418_v18  ;;  %v2728_v59 = vor.u32 %v2817_v42, %v2727_v51  ;;  %v2729_v52 = vld [vmem:[#allocation8 + $0xa8] sm:$0xf0]  ;;  %v2655_v2 = vld [vmem:[#allocation8 + $0x10] sm:$0xf] }
 0x1ab   : > { %4950 = vst [vmem:[#allocation17_spill] sm:$0xff] %v3740_v26  ;;  %v1018_v55 = vmul.f32 2.1237322e-06, %v3733_v28  ;;  %v2615_v13 = vclamps-f32 %v733_v7, 1.0  ;;  %v825_v57 = vadd.f32 0.18741608, %v824_v30  ;;  %v786_v9 = vmul.f32 %v785_v22, %v3541_v40 }
 0x1ac   : > { %v3751_v29 = vmul.f32 0.5, %v3610_v36  ;;  %v3753_v58 = vmin.f32 %v1056_v41, 16.0  ;;  %v941_v12 = vadd.f32 0.0036580483, %v940_v31  ;;  %v980_v38 = vmul.f32 %v979_v44, %v3707_v43  ;;  %2228 = vmatpush.bf16.msrb.mxu3 %v2728_v59  ;;  %v2799_v22 = vld [vmem:[#allocation8 + $0x14] sm:$0xf0]  ;;  %v480_v41 = vpop.f32.mrf.mxu0 }
 0x1ad   : > { %v3758_v50 = vmul.f32 0.70710677, %v3743_v49  ;;  %v3762_v7 = vmul.f32 %v3659_v39, %v3513_v10  ;;  %v3766_v36 = vmul.f32 %v3680_v47, %v3519_v15  ;;  %v773_v27 = vmul.f32 %v772_v63, %v748_v0  ;;  %v529_v63 = vpop.f32.mrf.mxu1 }
 0x1ae   : > { %4951 = vst [vmem:[#allocation18_spill] sm:$0xff] %v3751_v29  ;;  %v1058_v54 = vmul.f32 2.1237322e-06, %v3753_v58  ;;  %v864_v30 = vmul.f32 %v863_v48, %v3635_v8  ;;  %v903_v4 = vadd.f32 0.05243302, %v902_v37  ;;  %v1898_v42 = vadd.f32 1.0, %v2615_v13 }
 0x1af   : > { %v1019_v24 = vadd.f32 0.00028619796, %v1018_v55  ;;  %v3771_v51 = vmul.f32 0.70710677, %v3748_v56  ;;  %v1096_v10 = vmul.f32 %v3758_v50, %v3758_v50  ;;  %v2668_v39 = vor.u32 %v2800_v16, %v2665_v23 }
 0x1b0   : > { %v1059_v31 = vadd.f32 0.00028619796, %v1058_v54  ;;  %v787_v15 = vadd.f32 1.1283791, %v786_v9  ;;  %v826_v47 = vmul.f32 %v825_v57, %v3559_v61  ;;  %v942_v0 = vmul.f32 %v941_v12, %v3682_v11 }
 0x1b1   : > { %v981_v44 = vadd.f32 0.0036580483, %v980_v38  ;;  %v2616_v48 = vclamps-f32 %v773_v27, 1.0  ;;  %v1136_v37 = vmul.f32 %v3771_v51, %v3771_v51  ;;  %2277 = vmatpush.bf16.msrb.mxu0 %v2668_v39  ;;  %v2732_v55 = vor.u32 %v2816_v53, %v2729_v52  ;;  %v2719_v53 = vld [vmem:[#allocation8 + $0x90] sm:$0xf] }
 0x1b2   : > { %v2656_v59 = vor.u32 %v2799_v22, %v2655_v2  ;;  %v865_v13 = vadd.f32 0.18741608, %v864_v30  ;;  %v904_v54 = vmul.f32 %v903_v4, %v3651_v62  ;;  %v3781_v16 = vmul.f32 0.5, %v3647_v25  ;;  %v2815_v22 = vld [vmem:[#allocation8 + $0x94] sm:$0xf0] }
 0x1b3   : > { %v1020_v23 = vmul.f32 %v1019_v24, %v3733_v28  ;;  %v1060_v57 = vmul.f32 %v1059_v31, %v3753_v58  ;;  %v3785_v9 = vmin.f32 %v1096_v10, 16.0  ;;  %2326 = vmatpush.bf16.msrb.mxu1 %v2732_v55  ;;  %v3788_v12 = vadd.f32 %v480_v41, %v3416_v17  ;;  %v2798_v10 = vld [vmem:[#allocation8 + $0x14] sm:$0xf]  ;;  %v2657_v39 = vld [vmem:[#allocation8 + $0x18] sm:$0xf0]  ;;  %v3805_v41 = vpop.f32.mrf.mxu2 }
 0x1b4   : > { %4952 = vst [vmem:[#allocation19_spill] sm:$0xff] %v3781_v16  ;;  %2180 = vmatpush.bf16.msrb.mxu2 %v2656_v59  ;;  %v3791_v38 = vadd.f32 %v529_v63, %v3418_v18  ;;  %v3794_v52 = vmul.f32 %v1898_v42, %v3534_v34  ;;  %v827_v25 = vadd.f32 1.1283791, %v826_v47  ;;  %v943_v27 = vadd.f32 0.05243302, %v942_v0 }
 0x1b5   : > { %v982_v2 = vmul.f32 %v981_v44, %v3707_v43  ;;  %v1899_v30 = vadd.f32 1.0, %v2616_v48  ;;  %v3798_v4 = vmul.f32 %v787_v15, %v3502_v1  ;;  %v3800_v24 = vmin.f32 %v1136_v37, 16.0  ;;  %v2814_v44 = vld [vmem:[#allocation8 + $0x94] sm:$0xf]  ;;  %v2721_v63 = vld [vmem:[#allocation8 + $0x98] sm:$0xf0] }
 0x1b6   : > { %v3803_v31 = vmul.f32 0.70710677, %v3788_v12  ;;  %v866_v34 = vmul.f32 %v865_v13, %v3635_v8  ;;  %v905_v42 = vadd.f32 0.18741608, %v904_v54  ;;  %v3809_v47 = vmul.f32 0.5, %v3678_v60 }
 0x1b7   : > { %4953 = vst [vmem:[#allocation20_spill] sm:$0xff] %v3798_v4  ;;  %v1021_v0 = vadd.f32 0.0036580483, %v1020_v23  ;;  %v1061_v1 = vadd.f32 0.0036580483, %v1060_v57  ;;  %v3818_v59 = vmul.f32 %v827_v25, %v3527_v21  ;;  %v944_v13 = vmul.f32 %v943_v27, %v3682_v11 }
 0x1b8   : > { %4954 = vst [vmem:[#allocation21_spill] sm:$0xff] %v3803_v31  ;;  %v1098_v15 = vmul.f32 2.1237322e-06, %v3785_v9  ;;  %v1176_v48 = vmul.f32 %v3803_v31, %v3803_v31  ;;  %v3815_v37 = vmul.f32 0.70710677, %v3791_v38  ;;  %v2720_v54 = vor.u32 %v2815_v22, %v2719_v53  ;;  %v532_v22 = vpop.f32.mrf.mxu3 }
 0x1b9   : > { %4955 = vst [vmem:[#allocation22_spill] sm:$0xff] %v3809_v47  ;;  %v2647_v55 = vld [vmem:[#allocation8] sm:$0xf]  ;;  %v983_v60 = vadd.f32 0.05243302, %v982_v2  ;;  %v1931_v57 = vmul.f32 %v1899_v30, %v3537_v35  ;;  %v906_v21 = vmul.f32 %v905_v42, %v3651_v62  ;;  %v1022_v25 = vmul.f32 %v1021_v0, %v3733_v28 }
 0x1ba   : > { %4956 = vst [vmem:[#allocation23_spill] sm:$0xff] %v3815_v37  ;;  %v2797_v23 = vld [vmem:[#allocation8 + $0x4] sm:$0xf0]  ;;  %v2711_v47 = vld [vmem:[#allocation8 + $0x80] sm:$0xf]  ;;  %v3823_v29 = vmin.f32 %v1176_v48, 16.0  ;;  %v1216_v33 = vmul.f32 %v3815_v37, %v3815_v37  ;;  %2229 = vmatpush.bf16.msrb.mxu3 %v2720_v54  ;;  %v2660_v27 = vor.u32 %v2798_v10, %v2657_v39  ;;  %v1062_v35 = vmul.f32 %v1061_v1, %v3753_v58 }
 0x1bb   : > { %4957 = vst [vmem:[#allocation24_spill] sm:$0xff] %v3818_v59  ;;  %v1138_v16 = vmul.f32 2.1237322e-06, %v3800_v24  ;;  %v2813_v31 = vld [vmem:[#allocation8 + $0x84] sm:$0xf0]  ;;  %v2724_v48 = vor.u32 %v2814_v44, %v2721_v63  ;;  %v984_v37 = vmul.f32 %v983_v60, %v3707_v43  ;;  %v2648_v42 = vor.u32 %v2797_v23, %v2647_v55  ;;  %v485_v60 = vpop.f32.mrf.mxu2 }
 0x1bc   : > { %v867_v26 = vadd.f32 1.1283791, %v866_v34  ;;  %v2796_v53 = vld [vmem:[#allocation8 + $0x4] sm:$0xf]  ;;  %v2649_v2 = vld [vmem:[#allocation8 + $0x8] sm:$0xf0]  ;;  %2278 = vmatpush.bf16.msrb.mxu0 %v2660_v27  ;;  %v2712_v1 = vor.u32 %v2813_v31, %v2711_v47 }
 0x1bd   : > { %v1099_v30 = vadd.f32 0.00028619796, %v1098_v15  ;;  %v3830_v59 = vmin.f32 %v1216_v33, 16.0  ;;  %v945_v4 = vadd.f32 0.18741608, %v944_v13  ;;  %v3834_v34 = vmul.f32 0.5, %v3701_v5  ;;  %2327 = vmatpush.bf16.msrb.mxu1 %v2724_v48  ;;  %2181 = vmatpush.bf16.msrb.mxu2 %v2648_v42 }
 0x1be   : > { %v2713_v0 = vld [vmem:[#allocation8 + $0x88] sm:$0xf0]  ;;  %v1139_v10 = vadd.f32 0.00028619796, %v1138_v16  ;;  %v1178_v39 = vmul.f32 2.1237322e-06, %v3823_v29  ;;  %v3839_v33 = vmul.f32 %v867_v26, %v3617_v46  ;;  %v2652_v5 = vor.u32 %v2796_v53, %v2649_v2  ;;  %2230 = vmatpush.bf16.msrb.mxu3 %v2712_v1 }
 0x1bf   : > { %4958 = vst [vmem:[#allocation25_spill] sm:$0xff] %v3830_v59  ;;  %v1218_v54 = vmul.f32 2.1237322e-06, %v3830_v59  ;;  %v1023_v44 = vadd.f32 0.05243302, %v1022_v25  ;;  %v3842_v63 = vmul.f32 0.5, %v3704_v45  ;;  %v1100_v55 = vmul.f32 %v1099_v30, %v3785_v9 }
 0x1c0   : > { %v907_v15 = vadd.f32 1.1283791, %v906_v21  ;;  %v1063_v13 = vadd.f32 0.05243302, %v1062_v35  ;;  %v2716_v16 = vor.u32 %v2812_v14, %v2713_v0  ;;  %v946_v23 = vmul.f32 %v945_v4, %v3682_v11  ;;  %2279 = vmatpush.bf16.msrb.mxu0 %v2652_v5 }
 0x1c1   : > { %4959 = vst [vmem:[#allocation26_spill] sm:$0xff] %v3842_v63  ;;  %v985_v27 = vadd.f32 0.18741608, %v984_v37  ;;  %v1960_v46 = vpack.c.bf16 %v3794_v52, %v3762_v7  ;;  %v1961_v26 = vpack.c.bf16 %v1931_v57, %v3766_v36  ;;  %v1140_v45 = vmul.f32 %v1139_v10, %v3800_v24 }
 0x1c2   : > { %v1179_v31 = vadd.f32 0.00028619796, %v1178_v39  ;;  %v1219_v47 = vadd.f32 0.00028619796, %v1218_v54  ;;  %2328 = vmatpush.bf16.msrb.mxu1 %v2716_v16  ;;  %v3852_v21 = vadd.f32 %v3805_v41, %v3416_v17  ;;  %v1024_v14 = vmul.f32 %v1023_v44, %v3733_v28  ;;  %v4982_v63 = vld [vmem:[#allocation24_spill] sm:$0xff] }
 0x1c3   : > { %v3856_v4 = vmul.f32 0.5, %v3743_v49  ;;  %2182 = vmatmul.bf16.vlgmr.msrb.gmra.mxu2 %v1960_v46  ;;  %2231 = vmatmul.bf16.vlgmr.msrb.gmra.mxu3 %v1961_v26  ;;  %v3859_v7 = vadd.f32 %v532_v22, %v3418_v18  ;;  %v3862_v36 = vadd.f32 %v485_v60, %v3416_v17  ;;  %v1064_v52 = vmul.f32 %v1063_v13, %v3753_v58  ;;  %v534_v22 = vpop.f32.mrf.mxu3 }
 0x1c4   : > { %v1101_v37 = vadd.f32 0.0036580483, %v1100_v55  ;;  %v3866_v57 = vmul.f32 0.5, %v3748_v56  ;;  %2280 = vmatmul.bf16.vlgmr.msrb.gmra.mxu0 %v1960_v46  ;;  %v3869_v41 = vmul.f32 0.70710677, %v3852_v21  ;;  %v3872_v49 = vmul.f32 %v907_v15, %v3633_v6 }
 0x1c5   : > { %4960 = vst [vmem:[#allocation27_spill] sm:$0xff] %v3856_v4  ;;  %v947_v25 = vadd.f32 1.1283791, %v946_v23  ;;  %v986_v53 = vmul.f32 %v985_v27, %v3707_v43  ;;  %2329 = vmatmul.bf16.vlgmr.msrb.gmra.mxu1 %v1961_v26  ;;  %v3876_v2 = vmul.f32 0.70710677, %v3859_v7  ;;  %v1180_v30 = vmul.f32 %v1179_v31, %v3823_v29 }
 0x1c6   : > { %4961 = vst [vmem:[#allocation28_spill] sm:$0xff] %v3866_v57  ;;  %v1141_v35 = vadd.f32 0.0036580483, %v1140_v45  ;;  %v1220_v56 = vmul.f32 %v1219_v47, %v3830_v59  ;;  %v1256_v48 = vmul.f32 %v3869_v41, %v3869_v41  ;;  %v1025_v42 = vadd.f32 0.18741608, %v1024_v14 }
 0x1c7   : > { %v3883_v6 = vmul.f32 0.5, %v3788_v12  ;;  %v1296_v0 = vmul.f32 %v3876_v2, %v3876_v2  ;;  %v3888_v10 = vmul.f32 0.70710677, %v3862_v36  ;;  %v1065_v39 = vadd.f32 0.18741608, %v1064_v52 }
 0x1c8   : > { %v1102_v54 = vmul.f32 %v1101_v37, %v3785_v9  ;;  %v3891_v1 = vmin.f32 %v1256_v48, 16.0  ;;  %v3894_v44 = vadd.f32 %v534_v22, %v3418_v18  ;;  %v987_v5 = vadd.f32 1.1283791, %v986_v53 }
 0x1c9   : > { %4962 = vst [vmem:[#allocation29_spill] sm:$0xff] %v3883_v6  ;;  %v3896_v15 = vmin.f32 %v1296_v0, 16.0  ;;  %v1336_v12 = vmul.f32 %v3888_v10, %v3888_v10  ;;  %v789_v13 = vmul.f32 3.8918573e-05, %v3541_v40  ;;  %v1142_v55 = vmul.f32 %v1141_v35, %v3800_v24 }
 0x1ca   : > { %4963 = vst [vmem:[#allocation30_spill] sm:$0xff] %v3891_v1  ;;  %v1181_v16 = vadd.f32 0.0036580483, %v1180_v30  ;;  %v1221_v60 = vadd.f32 0.0036580483, %v1220_v56  ;;  %v1026_v27 = vmul.f32 %v1025_v42, %v3733_v28  ;;  %v1066_v31 = vmul.f32 %v1065_v39, %v3753_v58 }
 0x1cb   : > { %4964 = vst [vmem:[#allocation31_spill] sm:$0xff] %v3896_v15  ;;  %v1258_v23 = vmul.f32 2.1237322e-06, %v3891_v1  ;;  %v1298_v46 = vmul.f32 2.1237322e-06, %v3896_v15  ;;  %v3905_v26 = vmin.f32 %v1336_v12, 16.0 }
 0x1cc   : > { %v3908_v45 = vmul.f32 0.70710677, %v3894_v44  ;;  %v1103_v47 = vadd.f32 0.05243302, %v1102_v54  ;;  %v790_v52 = vadd.f32 0.001143296, %v789_v13  ;;  %v1182_v56 = vmul.f32 %v1181_v16, %v3823_v29 }
 0x1cd   : > { %v1259_v14 = vadd.f32 0.00028619796, %v1258_v23  ;;  %v1299_v37 = vadd.f32 0.00028619796, %v1298_v46  ;;  %v1338_v53 = vmul.f32 2.1237322e-06, %v3905_v26  ;;  %v1222_v0 = vmul.f32 %v1221_v60, %v3830_v59 }
 0x1ce   : > { %v1376_v22 = vmul.f32 %v3908_v45, %v3908_v45  ;;  %v869_v35 = vmul.f32 3.8918573e-05, %v3635_v8  ;;  %v1143_v30 = vadd.f32 0.05243302, %v1142_v55  ;;  %v791_v42 = vmul.f32 %v790_v52, %v3541_v40 }
 0x1cf   : > { %v1260_v48 = vmul.f32 %v1259_v14, %v3891_v1  ;;  %v1300_v39 = vmul.f32 %v1299_v37, %v3896_v15  ;;  %v1339_v54 = vadd.f32 0.00028619796, %v1338_v53  ;;  %v1027_v13 = vadd.f32 1.1283791, %v1026_v27 }
 0x1d0   : > { %v870_v12 = vadd.f32 0.001143296, %v869_v35  ;;  %v3921_v23 = vmul.f32 0.5, %v3791_v38  ;;  %v3923_v46 = vmin.f32 %v1376_v22, 16.0  ;;  %v792_v57 = vadd.f32 0.014752088, %v791_v42 }
 0x1d1   : > { %v1104_v55 = vmul.f32 %v1103_v47, %v3785_v9  ;;  %v1261_v16 = vadd.f32 0.0036580483, %v1260_v48  ;;  %v1340_v14 = vmul.f32 %v1339_v54, %v3905_v26  ;;  %v1067_v6 = vadd.f32 1.1283791, %v1066_v31 }
 0x1d2   : > { %4965 = vst [vmem:[#allocation32_spill] sm:$0xff] %v3921_v23  ;;  %v871_v52 = vmul.f32 %v870_v12, %v3635_v8  ;;  %v1301_v60 = vadd.f32 0.0036580483, %v1300_v39  ;;  %v793_v37 = vmul.f32 %v792_v57, %v3541_v40  ;;  %v829_v53 = vmul.f32 3.8918573e-05, %v3559_v61 }
 0x1d3   : > { %v1144_v27 = vmul.f32 %v1143_v30, %v3800_v24  ;;  %v1183_v38 = vadd.f32 0.05243302, %v1182_v56  ;;  %v1223_v35 = vadd.f32 0.05243302, %v1222_v0  ;;  %v3932_v42 = vmul.f32 %v947_v25, %v3654_v32 }
 0x1d4   : > { %v872_v22 = vadd.f32 0.014752088, %v871_v52  ;;  %v1378_v47 = vmul.f32 2.1237322e-06, %v3923_v46  ;;  %v794_v48 = vadd.f32 0.112945676, %v793_v37  ;;  %v1262_v31 = vmul.f32 %v1261_v16, %v3891_v1 }
 0x1d5   : > { %v830_v54 = vadd.f32 0.001143296, %v829_v53  ;;  %v1105_v23 = vadd.f32 0.18741608, %v1104_v55  ;;  %v1341_v39 = vadd.f32 0.0036580483, %v1340_v14  ;;  %v1302_v12 = vmul.f32 %v1301_v60, %v3896_v15 }
 0x1d6   : > { %v873_v57 = vmul.f32 %v872_v22, %v3635_v8  ;;  %v795_v30 = vmul.f32 %v794_v48, %v3541_v40  ;;  %v909_v0 = vmul.f32 3.8918573e-05, %v3651_v62  ;;  %v1145_v32 = vadd.f32 0.18741608, %v1144_v27 }
 0x1d7   : > { %v831_v56 = vmul.f32 %v830_v54, %v3559_v61  ;;  %v1184_v25 = vmul.f32 %v1183_v38, %v3823_v29  ;;  %v1224_v52 = vmul.f32 %v1223_v35, %v3830_v59  ;;  %v3944_v55 = vmul.f32 %v987_v5, %v3686_v20 }
 0x1d8   : > { %v874_v37 = vadd.f32 0.112945676, %v873_v57  ;;  %v1379_v16 = vadd.f32 0.00028619796, %v1378_v47  ;;  %v796_v14 = vadd.f32 0.4994258, %v795_v30  ;;  %v1106_v60 = vmul.f32 %v1105_v23, %v3785_v9 }
 0x1d9   : > { %v832_v53 = vadd.f32 0.014752088, %v831_v56  ;;  %v1263_v22 = vadd.f32 0.05243302, %v1262_v31  ;;  %v1342_v48 = vmul.f32 %v1341_v39, %v3905_v26  ;;  %v1303_v4 = vadd.f32 0.05243302, %v1302_v12 }
 0x1da   : > { %v875_v54 = vmul.f32 %v874_v37, %v3635_v8  ;;  %v797_v27 = vmul.f32 %v796_v14, %v3541_v40  ;;  %v910_v35 = vadd.f32 0.001143296, %v909_v0  ;;  %v1146_v57 = vmul.f32 %v1145_v32, %v3800_v24 }
 0x1db   : > { %v833_v38 = vmul.f32 %v832_v53, %v3559_v61  ;;  %v1185_v20 = vadd.f32 0.18741608, %v1184_v25  ;;  %v1225_v5 = vadd.f32 0.18741608, %v1224_v52  ;;  %v1380_v30 = vmul.f32 %v1379_v16, %v3923_v46 }
 0x1dc   : > { %v876_v47 = vadd.f32 0.4994258, %v875_v54  ;;  %v3953_v56 = vadd.f32 1.0, %v797_v27  ;;  %v911_v31 = vmul.f32 %v910_v35, %v3651_v62  ;;  %v3957_v39 = vmul.f32 %v1027_v13, %v3712_v3 }
 0x1dd   : > { %v834_v23 = vadd.f32 0.112945676, %v833_v38  ;;  %v1264_v40 = vmul.f32 %v1263_v22, %v3891_v1  ;;  %v1343_v12 = vadd.f32 0.05243302, %v1342_v48  ;;  %v3962_v32 = vmul.f32 %v1067_v6, %v3729_v19 }
 0x1de   : > { %v877_v0 = vmul.f32 %v876_v47, %v3635_v8  ;;  %v1107_v25 = vadd.f32 1.1283791, %v1106_v60  ;;  %v1304_v52 = vmul.f32 %v1303_v4, %v3896_v15  ;;  %2951 = vrcp.f32 %v3953_v56 }
 0x1df   : > { %v1147_v37 = vadd.f32 1.1283791, %v1146_v57  ;;  %v1186_v16 = vmul.f32 %v1185_v20, %v3823_v29  ;;  %v1226_v14 = vmul.f32 %v1225_v5, %v3830_v59  ;;  %v3969_v3 = vmul.f32 0.5, %v3852_v21 }
 0x1e0   : > { %v1381_v13 = vadd.f32 0.0036580483, %v1380_v30  ;;  %v3971_v53 = vadd.f32 1.0, %v877_v0  ;;  %v835_v8 = vmul.f32 %v834_v23, %v3559_v61  ;;  %v912_v19 = vadd.f32 0.014752088, %v911_v31 }
 0x1e1   : > { %4966 = vst [vmem:[#allocation33_spill] sm:$0xff] %v3969_v3  ;;  %v1265_v6 = vadd.f32 0.18741608, %v1264_v40  ;;  %v3975_v60 = vmul.f32 0.5, %v3859_v7  ;;  %v1344_v4 = vmul.f32 %v1343_v12, %v3905_v26  ;;  %v949_v22 = vmul.f32 3.8918573e-05, %v3682_v11 }
 0x1e2   : > { %v3980_v48 = vmul.f32 %v1107_v25, %v3758_v50  ;;  %v1305_v54 = vadd.f32 0.18741608, %v1304_v52  ;;  %v3983_v21 = vmul.f32 0.5, %v3862_v36  ;;  %2953 = vrcp.f32 %v3971_v53 }
 0x1e3   : > { %4967 = vst [vmem:[#allocation34_spill] sm:$0xff] %v3975_v60  ;;  %v3987_v27 = vmul.f32 %v1147_v37, %v3771_v51  ;;  %v836_v38 = vadd.f32 0.4994258, %v835_v8  ;;  %v913_v7 = vmul.f32 %v912_v19, %v3651_v62  ;;  %v950_v35 = vadd.f32 0.001143296, %v949_v22 }
 0x1e4   : > { %4968 = vst [vmem:[#allocation35_spill] sm:$0xff] %v3980_v48  ;;  %v2952_v57 = vpop.eup %2951  ;;  %v3990_v20 = vadd.f32 1.1283791, %v1186_v16  ;;  %v3992_v5 = vadd.f32 1.1283791, %v1226_v14  ;;  %v3995_v50 = vmul.f32 %v1381_v13, %v3923_v46  ;;  %v3999_v47 = vmul.f32 %v1265_v6, %v3891_v1 }
 0x1e5   : > { %4969 = vst [vmem:[#allocation36_spill] sm:$0xff] %v3983_v21  ;;  %v1029_v36 = vmul.f32 3.8918573e-05, %v3733_v28  ;;  %v4001_v30 = vadd.f32 0.18741608, %v1344_v4  ;;  %v800_v51 = vmul.f32 %v2952_v57, %v3953_v56  ;;  %v837_v23 = vmul.f32 %v836_v38, %v3559_v61 }
 0x1e6   : > { %4970 = vst [vmem:[#allocation37_spill] sm:$0xff] %v3987_v27  ;;  %v4006_v31 = vmul.f32 %v1305_v54, %v3896_v15  ;;  %v808_v40 = vand.u32 2147483647, %v3953_v56  ;;  %v810_v12 = vand.u32 2147483648, %v3953_v56  ;;  %v914_v0 = vadd.f32 0.112945676, %v913_v7 }
 0x1e7   : > { %v801_v25 = vsub.f32 1.0, %v800_v51  ;;  %v888_v52 = vand.u32 2147483647, %v3971_v53  ;;  %v4011_v37 = vadd.f32 1.0, %v837_v23  ;;  %v951_v16 = vmul.f32 %v950_v35, %v3682_v11  ;;  %v537_v51 = vpop.f32.mrf.mxu3 }
 0x1e8   : > { %v2954_v14 = vpop.eup %2953  ;;  %vm804_vm0 = vweird.f32 %v3953_v56  ;;  %v890_v61 = vand.u32 2147483648, %v3971_v53  ;;  %v915_v13 = vmul.f32 %v914_v0, %v3651_v62  ;;  %v1030_v8 = vadd.f32 0.001143296, %v1029_v36  ;;  %v488_v36 = vpop.f32.mrf.mxu2 }
 0x1e9   : > { %v802_v19 = vmul.f32 %v2952_v57, %v801_v25  ;;  %vm805_vm1 = vweird.f32 %v2952_v57  ;;  %v880_v6 = vmul.f32 %v2954_v14, %v3971_v53  ;;  %2955 = vrcp.f32 %v4011_v37 }
 0x1ea   : > { %vm4019_vm2 = vcmp.eq.f32.partialorder %v808_v40, 8.507059e+37  ;;  %v811_v22 = vor.u32 1.1754944e-38, %v810_v12  ;;  %vm884_vm3 = vweird.f32 %v3971_v53  ;;  %v916_v54 = vadd.f32 0.4994258, %v915_v13  ;;  %vm806_vm5 = vmor %vm804_vm0, %vm805_vm1 }
 0x1eb   : > { %v803_v38 = vadd.f32 %v2952_v57, %v802_v19  ;;  %v881_v7 = vsub.f32 1.0, %v880_v6  ;;  %vm4024_vm4 = vcmp.eq.f32.partialorder %v888_v52, 8.507059e+37  ;;  %v952_v23 = vadd.f32 0.014752088, %v951_v16 }
 0x1ec   : > { %v891_v40 = vor.u32 1.1754944e-38, %v890_v61  ;;  %v917_v0 = vmul.f32 %v916_v54, %v3651_v62  ;;  %v4032_v12 = vadd.f32 %v488_v36, %v3416_v17  ;;  %v1031_v25 = vmul.f32 %v1030_v8, %v3733_v28  ;;  %v4976_v54 = vld [vmem:[#allocation20_spill] sm:$0xff] }
 0x1ed   : > { %v807_v13 = vsel %vm806_vm5, %v2952_v57, %v803_v38  ;;  %v882_v19 = vmul.f32 %v2954_v14, %v881_v7  ;;  %vm885_vm6 = vweird.f32 %v2954_v14  ;;  %v4036_v52 = vadd.f32 %v537_v51, %v3418_v18 }
 0x1ee   : > { %v812_v16 = vsel %vm4019_vm2, %v811_v22, %v807_v13  ;;  %v4040_v6 = vadd.f32 1.0, %v917_v0  ;;  %v4043_v56 = vmul.f32 0.70710677, %v4032_v12  ;;  %v4046_v62 = vmul.f32 3.8918573e-05, %v3707_v43  ;;  %vm886_vm7 = vmor %vm884_vm3, %vm885_vm6 }
 0x1ef   : > { %v2956_v61 = vpop.eup %2955  ;;  %v813_v8 = vmul.f32 %v812_v16, %v4976_v54  ;;  %v883_v57 = vadd.f32 %v2954_v14, %v882_v19  ;;  %v4050_v38 = vmul.f32 0.70710677, %v4036_v52  ;;  %v953_v7 = vmul.f32 %v952_v23, %v3682_v11 }
 0x1f0   : > { %4975 = vst [vmem:[#allocation38_spill] sm:$0xff] %v4043_v56  ;;  %v840_v4 = vmul.f32 %v2956_v61, %v4011_v37  ;;  %vm844_vm8 = vweird.f32 %v4011_v37  ;;  %v848_v22 = vand.u32 2147483647, %v4011_v37  ;;  %2957 = vrcp.f32 %v4040_v6  ;;  %v490_v21 = vpop.f32.mrf.mxu2 }
 0x1f1   : > { %4977 = vst [vmem:[#allocation20_spill] sm:$0xff] %v4050_v38  ;;  %v2617_v36 = vclamps-f32 %v813_v8, 1.0  ;;  %v887_v51 = vsel %vm886_vm7, %v2954_v14, %v883_v57  ;;  %v850_v0 = vand.u32 2147483648, %v4011_v37  ;;  %v1032_v13 = vadd.f32 0.014752088, %v1031_v25  ;;  %v539_v8 = vpop.f32.mrf.mxu3 }
 0x1f2   : > { %v892_v19 = vsel %vm4024_vm4, %v891_v40, %v887_v51  ;;  %v841_v23 = vsub.f32 1.0, %v840_v4  ;;  %v1416_v53 = vmul.f32 %v4043_v56, %v4043_v56  ;;  %v1456_v16 = vmul.f32 %v4050_v38, %v4050_v38 }
 0x1f3   : > { %v893_v54 = vmul.f32 %v892_v19, %v3839_v33  ;;  %v1900_v60 = vadd.f32 1.0, %v2617_v36  ;;  %vm845_vm9 = vweird.f32 %v2956_v61  ;;  %v954_v14 = vadd.f32 0.112945676, %v953_v7 }
 0x1f4   : > { %v842_v57 = vmul.f32 %v2956_v61, %v841_v23  ;;  %v4067_v3 = vmin.f32 %v1416_v53, 16.0  ;;  %v4069_v25 = vmin.f32 %v1456_v16, 16.0  ;;  %v4072_v35 = vadd.f32 %v490_v21, %v3416_v17  ;;  %vm846_vm11 = vmor %vm844_vm8, %vm845_vm9 }
 0x1f5   : > { %v2619_v40 = vclamps-f32 %v893_v54, 1.0  ;;  %vm4074_vm10 = vcmp.eq.f32.partialorder %v848_v22, 8.507059e+37  ;;  %v851_v51 = vor.u32 1.1754944e-38, %v850_v0  ;;  %v928_v33 = vand.u32 2147483647, %v4040_v6  ;;  %v4980_v54 = vld [vmem:[#allocation15_spill] sm:$0xff] }
 0x1f6   : > { %v2958_v36 = vpop.eup %2957  ;;  %v843_v19 = vadd.f32 %v2956_v61, %v842_v57  ;;  %v1418_v7 = vmul.f32 2.1237322e-06, %v4067_v3  ;;  %v1458_v23 = vmul.f32 2.1237322e-06, %v4069_v25  ;;  %v4082_v53 = vadd.f32 %v539_v8, %v3418_v18  ;;  %v4981_v8 = vld [vmem:[#allocation17_spill] sm:$0xff] }
 0x1f7   : > { %v1902_v16 = vadd.f32 1.0, %v2619_v40  ;;  %v920_v21 = vmul.f32 %v2958_v36, %v4040_v6  ;;  %v4089_v22 = vmul.f32 0.70710677, %v4072_v35  ;;  %v955_v0 = vmul.f32 %v954_v14, %v3682_v11 }
 0x1f8   : > { %v1932_v57 = vmul.f32 %v1900_v60, %v4980_v54  ;;  %v847_v27 = vsel %vm846_vm11, %v2956_v61, %v843_v19  ;;  %v930_v15 = vand.u32 2147483648, %v4040_v6  ;;  %v1419_v48 = vadd.f32 0.00028619796, %v1418_v7 }
 0x1f9   : > { %v1934_v1 = vmul.f32 %v1902_v16, %v4981_v8  ;;  %v852_v40 = vsel %vm4074_vm10, %v851_v51, %v847_v27  ;;  %v921_v37 = vsub.f32 1.0, %v920_v21  ;;  %v1496_v38 = vmul.f32 %v4089_v22, %v4089_v22 }
 0x1fa   : > { %v853_v56 = vmul.f32 %v852_v40, %v4982_v63  ;;  %vm925_vm12 = vweird.f32 %v2958_v36  ;;  %v1459_v59 = vadd.f32 0.00028619796, %v1458_v23  ;;  %v4101_v14 = vmul.f32 0.70710677, %v4082_v53 }
 0x1fb   : > { %v1962_v60 = vpack.c.bf16 %v1934_v1, %v1932_v57  ;;  %v922_v61 = vmul.f32 %v2958_v36, %v921_v37  ;;  %v4103_v19 = vmin.f32 %v1496_v38, 16.0  ;;  %v956_v7 = vadd.f32 0.4994258, %v955_v0 }
 0x1fc   : > { %v1383_v16 = vadd.f32 0.05243302, %v3995_v50  ;;  %vm924_vm13 = vweird.f32 %v4040_v6  ;;  %v1420_v27 = vmul.f32 %v1419_v48, %v4067_v3  ;;  %v1536_v4 = vmul.f32 %v4101_v14, %v4101_v14 }
 0x1fd   : > { %2187 = vmatmul.bf16.gmra.mxu2 %v1962_v60  ;;  %v923_v63 = vadd.f32 %v2958_v36, %v922_v61  ;;  %2285 = vmatmul.bf16.gmra.mxu0 %v1962_v60  ;;  %v1498_v51 = vmul.f32 2.1237322e-06, %v4103_v19  ;;  %v957_v1 = vmul.f32 %v956_v7, %v3682_v11  ;;  %v1033_v38 = vmul.f32 %v1032_v13, %v3733_v28  ;;  %vm926_vm14 = vmor %vm924_vm13, %vm925_vm12  ;;  %v4983_v7 = vld [vmem:[#allocation21_spill] sm:$0xff] }
 0x1fe   : > { %v931_v23 = vor.u32 1.1754944e-38, %v930_v15  ;;  %v1460_v50 = vmul.f32 %v1459_v59, %v4069_v25  ;;  %v4115_v6 = vmin.f32 %v1536_v4, 16.0  ;;  %v990_v48 = vadd.f32 0.001143296, %v4046_v62  ;;  %v4984_v4 = vld [vmem:[#allocation23_spill] sm:$0xff] }
 0x1ff   : > { %v2618_v21 = vclamps-f32 %v853_v56, 1.0  ;;  %v927_v0 = vsel %vm926_vm14, %v2958_v36, %v923_v63  ;;  %vm929_vm15 = vcmp.eq.f32.partialorder %v928_v33, 8.507059e+37  ;;  %v4118_v54 = vadd.f32 1.0, %v957_v1 }
 0x200   : > { %v1346_v57 = vmul.f32 %v4001_v30, %v3905_v26  ;;  %v1384_v11 = vmul.f32 %v1383_v16, %v3923_v46  ;;  %v932_v13 = vsel %vm929_vm15, %v931_v23, %v927_v0  ;;  %v1034_v8 = vadd.f32 0.112945676, %v1033_v38  ;;  %v4985_v0 = vld [vmem:[#allocation16_spill] sm:$0xff] }
 0x201   : > { %v933_v15 = vmul.f32 %v932_v13, %v3872_v49  ;;  %v1421_v40 = vadd.f32 0.0036580483, %v1420_v27  ;;  %v1499_v59 = vadd.f32 0.00028619796, %v1498_v51  ;;  %2959 = vrcp.f32 %v4118_v54 }
 0x202   : > { %v4126_v62 = vmul.f32 0.5, %v3894_v44  ;;  %v1461_v56 = vadd.f32 0.0036580483, %v1460_v50  ;;  %v1538_v33 = vmul.f32 2.1237322e-06, %v4115_v6  ;;  %v991_v36 = vmul.f32 %v990_v48, %v3707_v43 }
 0x203   : > { %v1267_v30 = vadd.f32 1.1283791, %v3999_v47  ;;  %v1307_v37 = vadd.f32 1.1283791, %v4006_v31  ;;  %v2620_v60 = vclamps-f32 %v933_v15, 1.0  ;;  %v1901_v61 = vadd.f32 1.0, %v2618_v21 }
 0x204   : > { %v4134_v49 = vmul.f32 %v3990_v20, %v4983_v7  ;;  %v1347_v16 = vadd.f32 1.1283791, %v1346_v57  ;;  %v1385_v27 = vadd.f32 0.18741608, %v1384_v11  ;;  %v1035_v44 = vmul.f32 %v1034_v8, %v3733_v28  ;;  %v4986_v57 = vld [vmem:[#allocation18_spill] sm:$0xff] }
 0x205   : > { %v4139_v63 = vmul.f32 %v3992_v5, %v4984_v4  ;;  %v1903_v51 = vadd.f32 1.0, %v2620_v60  ;;  %v1422_v1 = vmul.f32 %v1421_v40, %v4067_v3  ;;  %v1500_v47 = vmul.f32 %v1499_v59, %v4103_v19 }
 0x206   : > { %v1462_v31 = vmul.f32 %v1461_v56, %v4069_v25  ;;  %v1539_v38 = vadd.f32 0.00028619796, %v1538_v33  ;;  %v1036_v23 = vadd.f32 0.4994258, %v1035_v44  ;;  %v992_v50 = vadd.f32 0.014752088, %v991_v36 }
 0x207   : > { %v2960_v20 = vpop.eup %2959  ;;  %v4145_v48 = vmul.f32 %v1267_v30, %v3869_v41  ;;  %v4148_v21 = vmul.f32 %v1307_v37, %v3876_v2  ;;  %v1933_v5 = vmul.f32 %v1901_v61, %v4985_v0  ;;  %v1935_v11 = vmul.f32 %v1903_v51, %v4986_v57 }
 0x208   : > { %v4153_v13 = vmul.f32 %v1347_v16, %v3888_v10  ;;  %v1386_v8 = vmul.f32 %v1385_v27, %v3923_v46  ;;  %v960_v15 = vmul.f32 %v2960_v20, %v4118_v54  ;;  %v1069_v40 = vmul.f32 3.8918573e-05, %v3753_v58 }
 0x209   : > { %v1963_v59 = vpack.c.bf16 %v1935_v11, %v1933_v5  ;;  %v1423_v56 = vadd.f32 0.05243302, %v1422_v1  ;;  %v1501_v41 = vadd.f32 0.0036580483, %v1500_v47  ;;  %v1037_v33 = vmul.f32 %v1036_v23, %v3733_v28 }
 0x20a   : > { %v1463_v2 = vadd.f32 0.05243302, %v1462_v31  ;;  %v1540_v36 = vmul.f32 %v1539_v38, %v4115_v6  ;;  %v961_v30 = vsub.f32 1.0, %v960_v15  ;;  %v993_v37 = vmul.f32 %v992_v50, %v3707_v43 }
 0x20b   : > { %2236 = vmatmul.bf16.gmra.mxu3 %v1963_v59  ;;  %2334 = vmatmul.bf16.gmra.mxu1 %v1963_v59  ;;  %vm965_vm0 = vweird.f32 %v2960_v20  ;;  %v968_v10 = vand.u32 2147483647, %v4118_v54  ;;  %v970_v60 = vand.u32 2147483648, %v4118_v54  ;;  %v4163_v61 = vadd.f32 1.0, %v1037_v33 }
 0x20c   : > { %v962_v7 = vmul.f32 %v2960_v20, %v961_v30  ;;  %v994_v16 = vadd.f32 0.112945676, %v993_v37  ;;  %v1070_v27 = vadd.f32 0.001143296, %v1069_v40  ;;  %v1109_v28 = vmul.f32 3.8918573e-05, %v3785_v9 }
 0x20d   : > { %v1387_v44 = vadd.f32 1.1283791, %v1386_v8  ;;  %v4167_v4 = vmul.f32 0.5, %v4032_v12  ;;  %v1502_v51 = vmul.f32 %v1501_v41, %v4103_v19  ;;  %2961 = vrcp.f32 %v4163_v61 }
 0x20e   : > { %v1541_v1 = vadd.f32 0.0036580483, %v1540_v36  ;;  %v963_v47 = vadd.f32 %v2960_v20, %v962_v7  ;;  %vm964_vm1 = vweird.f32 %v4118_v54  ;;  %v995_v31 = vmul.f32 %v994_v16, %v3707_v43 }
 0x20f   : > { %v1424_v38 = vmul.f32 %v1423_v56, %v4067_v3  ;;  %vm966_vm2 = vmor %vm964_vm1, %vm965_vm0  ;;  %v971_v23 = vor.u32 1.1754944e-38, %v970_v60  ;;  %v1071_v50 = vmul.f32 %v1070_v27, %v3753_v58  ;;  %v1110_v0 = vadd.f32 0.001143296, %v1109_v28 }
 0x210   : > { %v1464_v12 = vmul.f32 %v1463_v2, %v4069_v25  ;;  %v967_v5 = vsel %vm966_vm2, %v2960_v20, %v963_v47  ;;  %vm969_vm3 = vcmp.eq.f32.partialorder %v968_v10, 8.507059e+37  ;;  %v996_v57 = vadd.f32 0.4994258, %v995_v31 }
 0x211   : > { %v4178_v11 = vmul.f32 0.5, %v4036_v52  ;;  %v1503_v8 = vadd.f32 0.05243302, %v1502_v51  ;;  %v972_v54 = vsel %vm969_vm3, %v971_v23, %v967_v5  ;;  %v1072_v15 = vadd.f32 0.014752088, %v1071_v50 }
 0x212   : > { %v1542_v40 = vmul.f32 %v1541_v1, %v4115_v6  ;;  %v997_v59 = vmul.f32 %v996_v57, %v3707_v43  ;;  %v1111_v56 = vmul.f32 %v1110_v0, %v3785_v9  ;;  %v1189_v41 = vmul.f32 3.8918573e-05, %v3823_v29 }
 0x213   : > { %v2962_v33 = vpop.eup %2961  ;;  %v1425_v36 = vadd.f32 0.18741608, %v1424_v38  ;;  %v4185_v20 = vmul.f32 0.5, %v4072_v35  ;;  %v4188_v2 = vmul.f32 0.5, %v4082_v53  ;;  %v1073_v52 = vmul.f32 %v1072_v15, %v3753_v58 }
 0x214   : > { %v1465_v30 = vadd.f32 0.18741608, %v1464_v12  ;;  %v973_v37 = vmul.f32 %v972_v54, %v3932_v42  ;;  %v1040_v10 = vmul.f32 %v2962_v33, %v4163_v61  ;;  %v4193_v43 = vadd.f32 1.0, %v997_v59  ;;  %v542_v54 = vpop.f32.mrf.mxu3 }
 0x215   : > { %4987 = vst [vmem:[#allocation15_spill] sm:$0xff] %v4188_v2  ;;  %v4196_v60 = vmul.f32 %v1387_v44, %v3908_v45  ;;  %v1074_v7 = vadd.f32 0.112945676, %v1073_v52  ;;  %v1112_v16 = vadd.f32 0.014752088, %v1111_v56  ;;  %v1504_v35 = vmul.f32 %v1503_v8, %v4103_v19  ;;  %v493_v8 = vpop.f32.mrf.mxu2 }
 0x216   : > { %v1190_v27 = vadd.f32 0.001143296, %v1189_v41  ;;  %v1543_v28 = vadd.f32 0.05243302, %v1542_v40  ;;  %v1041_v53 = vsub.f32 1.0, %v1040_v10  ;;  %2963 = vrcp.f32 %v4193_v43 }
 0x217   : > { %v1048_v51 = vand.u32 2147483647, %v4163_v61  ;;  %v1050_v42 = vand.u32 2147483648, %v4163_v61  ;;  %v1075_v1 = vmul.f32 %v1074_v7, %v3753_v58  ;;  %v1113_v47 = vmul.f32 %v1112_v16, %v3785_v9 }
 0x218   : > { %v2621_v31 = vclamps-f32 %v973_v37, 1.0  ;;  %v1042_v45 = vmul.f32 %v2962_v33, %v1041_v53  ;;  %vm1045_vm4 = vweird.f32 %v2962_v33  ;;  %v1191_v44 = vmul.f32 %v1190_v27, %v3823_v29 }
 0x219   : > { %v4206_v38 = vmul.f32 %v1425_v36, %v4067_v3  ;;  %v4209_v23 = vmul.f32 %v1465_v30, %v4069_v25  ;;  %v1076_v50 = vadd.f32 0.4994258, %v1075_v1  ;;  %v1114_v0 = vadd.f32 0.112945676, %v1113_v47  ;;  %v4988_v1 = vld [vmem:[#allocation19_spill] sm:$0xff] }
 0x21a   : > { %v4211_v12 = vadd.f32 0.18741608, %v1504_v35  ;;  %v4214_v5 = vmul.f32 %v1543_v28, %v4115_v6  ;;  %v1043_v57 = vadd.f32 %v2962_v33, %v1042_v45  ;;  %vm1044_vm5 = vweird.f32 %v4163_v61 }
 0x21b   : > { %vm1046_vm6 = vmor %vm1044_vm5, %vm1045_vm4  ;;  %v1051_v15 = vor.u32 1.1754944e-38, %v1050_v42  ;;  %v1077_v40 = vmul.f32 %v1076_v50, %v3753_v58  ;;  %v4219_v59 = vadd.f32 %v493_v8, %v3416_v17  ;;  %v1192_v56 = vadd.f32 0.014752088, %v1191_v44 }
 0x21c   : > { %v2964_v41 = vpop.eup %2963  ;;  %v1047_v36 = vsel %vm1046_vm6, %v2962_v33, %v1043_v57  ;;  %vm1049_vm7 = vcmp.eq.f32.partialorder %v1048_v51, 8.507059e+37  ;;  %v1904_v52 = vadd.f32 1.0, %v2621_v31  ;;  %v4222_v30 = vadd.f32 %v542_v54, %v3418_v18  ;;  %v544_v8 = vpop.f32.mrf.mxu3 }
 0x21d   : > { %v1052_v37 = vsel %vm1049_vm7, %v1051_v15, %v1047_v36  ;;  %v1000_v61 = vmul.f32 %v2964_v41, %v4193_v43  ;;  %v4225_v10 = vadd.f32 1.0, %v1077_v40  ;;  %v1115_v7 = vmul.f32 %v1114_v0, %v3785_v9  ;;  %v495_v57 = vpop.f32.mrf.mxu2 }
 0x21e   : > { %v1053_v58 = vmul.f32 %v1052_v37, %v3957_v39  ;;  %vm1004_vm8 = vweird.f32 %v4193_v43  ;;  %v4231_v16 = vmul.f32 0.70710677, %v4219_v59  ;;  %v1149_v33 = vmul.f32 3.8918573e-05, %v3800_v24 }
 0x21f   : > { %v1001_v27 = vsub.f32 1.0, %v1000_v61  ;;  %v1008_v35 = vand.u32 2147483647, %v4193_v43  ;;  %2965 = vrcp.f32 %v4225_v10  ;;  %v1193_v28 = vmul.f32 %v1192_v56, %v3823_v29 }
 0x220   : > { %v2623_v53 = vclamps-f32 %v1053_v58, 1.0  ;;  %v1010_v51 = vand.u32 2147483648, %v4193_v43  ;;  %v1576_v39 = vmul.f32 %v4231_v16, %v4231_v16  ;;  %v4241_v42 = vmul.f32 0.70710677, %v4222_v30 }
 0x221   : > { %v1936_v47 = vmul.f32 %v1904_v52, %v4988_v1  ;;  %v1002_v31 = vmul.f32 %v2964_v41, %v1001_v27  ;;  %vm1005_vm9 = vweird.f32 %v2964_v41  ;;  %v1116_v45 = vadd.f32 0.4994258, %v1115_v7 }
 0x222   : > { %v1906_v44 = vadd.f32 1.0, %v2623_v53  ;;  %v4244_v50 = vmin.f32 %v1576_v39, 16.0  ;;  %v1616_v0 = vmul.f32 %v4241_v42, %v4241_v42  ;;  %v1150_v54 = vadd.f32 0.001143296, %v1149_v33  ;;  %vm1006_vm10 = vmor %vm1004_vm8, %vm1005_vm9 }
 0x223   : > { %v1003_v15 = vadd.f32 %v2964_v41, %v1002_v31  ;;  %v4249_v40 = vadd.f32 %v495_v57, %v3416_v17  ;;  %v4252_v56 = vadd.f32 %v544_v8, %v3418_v18  ;;  %v1194_v36 = vadd.f32 0.112945676, %v1193_v28 }
 0x224   : > { %v1938_v52 = vmul.f32 %v1906_v44, %v3834_v34  ;;  %v1578_v37 = vmul.f32 2.1237322e-06, %v4244_v50  ;;  %v4258_v61 = vmin.f32 %v1616_v0, 16.0  ;;  %v1117_v7 = vmul.f32 %v1116_v45, %v3785_v9 }
 0x225   : > { %4989 = vst [vmem:[#allocation17_spill] sm:$0xff] %v4252_v56  ;;  %v2966_v58 = vpop.eup %2965  ;;  %v1007_v33 = vsel %vm1006_vm10, %v2964_v41, %v1003_v15  ;;  %vm1009_vm11 = vcmp.eq.f32.partialorder %v1008_v35, 8.507059e+37  ;;  %v1011_v27 = vor.u32 1.1754944e-38, %v1010_v51  ;;  %v4262_v53 = vmul.f32 0.70710677, %v4249_v40 }
 0x226   : > { %v1964_v39 = vpack.c.bf16 %v1938_v52, %v1936_v47  ;;  %v1080_v28 = vmul.f32 %v2966_v58, %v4225_v10  ;;  %v1088_v34 = vand.u32 2147483647, %v4225_v10  ;;  %v1090_v43 = vand.u32 2147483648, %v4225_v10 }
 0x227   : > { %v1012_v1 = vsel %vm1009_vm11, %v1011_v27, %v1007_v33  ;;  %v1579_v31 = vadd.f32 0.00028619796, %v1578_v37  ;;  %v1618_v44 = vmul.f32 2.1237322e-06, %v4258_v61  ;;  %v1656_v9 = vmul.f32 %v4262_v53, %v4262_v53 }
 0x228   : > { %2192 = vmatmul.bf16.gmra.mxu2 %v1964_v39  ;;  %v1081_v41 = vsub.f32 1.0, %v1080_v28  ;;  %2290 = vmatmul.bf16.gmra.mxu0 %v1964_v39  ;;  %v4271_v35 = vmul.f32 0.70710677, %v4252_v56  ;;  %v4273_v51 = vadd.f32 1.0, %v1117_v7  ;;  %v1195_v47 = vmul.f32 %v1194_v36, %v3823_v29 }
 0x229   : > { %vm1085_vm12 = vweird.f32 %v2966_v58  ;;  %v1580_v45 = vmul.f32 %v1579_v31, %v4244_v50  ;;  %v1619_v0 = vadd.f32 0.00028619796, %v1618_v44  ;;  %v4277_v57 = vmin.f32 %v1656_v9, 16.0 }
 0x22a   : > { %v1013_v8 = vmul.f32 %v1012_v1, %v3944_v55  ;;  %v1082_v15 = vmul.f32 %v2966_v58, %v1081_v41  ;;  %v1696_v52 = vmul.f32 %v4271_v35, %v4271_v35  ;;  %2967 = vrcp.f32 %v4273_v51 }
 0x22b   : > { %v1427_v37 = vadd.f32 1.1283791, %v4206_v38  ;;  %v1581_v7 = vadd.f32 0.0036580483, %v1580_v45  ;;  %v1620_v33 = vmul.f32 %v1619_v0, %v4258_v61  ;;  %v1658_v36 = vmul.f32 2.1237322e-06, %v4277_v57 }
 0x22c   : > { %v1083_v27 = vadd.f32 %v2966_v58, %v1082_v15  ;;  %vm1084_vm13 = vweird.f32 %v4225_v10  ;;  %v4287_v39 = vmin.f32 %v1696_v52, 16.0  ;;  %v1196_v28 = vadd.f32 0.4994258, %v1195_v47  ;;  %v4990_v52 = vld [vmem:[#allocation25_spill] sm:$0xff] }
 0x22d   : > { %v1467_v55 = vadd.f32 1.1283791, %v4209_v23  ;;  %v1506_v1 = vmul.f32 %v4211_v12, %v4103_v19  ;;  %v1545_v31 = vadd.f32 0.18741608, %v4214_v5  ;;  %vm1086_vm14 = vmor %vm1084_vm13, %vm1085_vm12  ;;  %v1091_v38 = vor.u32 1.1754944e-38, %v1090_v43  ;;  %v4991_v43 = vld [vmem:[#allocation38_spill] sm:$0xff] }
 0x22e   : > { %v2622_v44 = vclamps-f32 %v1013_v8, 1.0  ;;  %v1087_v9 = vsel %vm1086_vm14, %v2966_v58, %v1083_v27  ;;  %vm1089_vm15 = vcmp.eq.f32.partialorder %v1088_v34, 8.507059e+37  ;;  %v1151_v41 = vmul.f32 %v1150_v54, %v3800_v24 }
 0x22f   : > { %v1092_v45 = vsel %vm1089_vm15, %v1091_v38, %v1087_v9  ;;  %v1582_v10 = vmul.f32 %v1581_v7, %v4244_v50  ;;  %v1621_v0 = vadd.f32 0.0036580483, %v1620_v33  ;;  %v1659_v47 = vadd.f32 0.00028619796, %v1658_v36 }
 0x230   : > { %v2968_v15 = vpop.eup %2967  ;;  %v1093_v23 = vmul.f32 %v1092_v45, %v3962_v32  ;;  %v1698_v12 = vmul.f32 2.1237322e-06, %v4287_v39  ;;  %v1197_v5 = vmul.f32 %v1196_v28, %v3823_v29  ;;  %v1229_v56 = vmul.f32 3.8918573e-05, %v4990_v52 }
 0x231   : > { %v4301_v8 = vmul.f32 %v1427_v37, %v4991_v43  ;;  %v1507_v58 = vadd.f32 1.1283791, %v1506_v1  ;;  %v1546_v54 = vmul.f32 %v1545_v31, %v4115_v6  ;;  %v1120_v34 = vmul.f32 %v2968_v15, %v4273_v51 }
 0x232   : > { %v2624_v7 = vclamps-f32 %v1093_v23, 1.0  ;;  %v1905_v33 = vadd.f32 1.0, %v2622_v44  ;;  %v4305_v36 = vadd.f32 1.0, %v1197_v5  ;;  %v1152_v27 = vadd.f32 0.014752088, %v1151_v41  ;;  %v4992_v44 = vld [vmem:[#allocation22_spill] sm:$0xff] }
 0x233   : > { %v1583_v32 = vadd.f32 0.05243302, %v1582_v10  ;;  %v1622_v38 = vmul.f32 %v1621_v0, %v4258_v61  ;;  %v1660_v29 = vmul.f32 %v1659_v47, %v4277_v57  ;;  %v1121_v28 = vsub.f32 1.0, %v1120_v34  ;;  %v4993_v41 = vld [vmem:[#allocation26_spill] sm:$0xff] }
 0x234   : > { %v1907_v9 = vadd.f32 1.0, %v2624_v7  ;;  %v1699_v45 = vadd.f32 0.00028619796, %v1698_v12  ;;  %2969 = vrcp.f32 %v4305_v36  ;;  %v1230_v37 = vadd.f32 0.001143296, %v1229_v56  ;;  %v4994_v56 = vld [vmem:[#allocation20_spill] sm:$0xff] }
 0x235   : > { %v1122_v1 = vmul.f32 %v2968_v15, %v1121_v28  ;;  %vm1124_vm0 = vweird.f32 %v4273_v51  ;;  %vm1125_vm1 = vweird.f32 %v2968_v15  ;;  %v1128_v31 = vand.u32 2147483647, %v4273_v51 }
 0x236   : > { %v1937_v23 = vmul.f32 %v1905_v33, %v4992_v44  ;;  %v1939_v10 = vmul.f32 %v1907_v9, %v4993_v41  ;;  %v1130_v0 = vand.u32 2147483648, %v4273_v51  ;;  %v1153_v47 = vmul.f32 %v1152_v27, %v3800_v24  ;;  %vm4326_vm2 = vmor %vm1124_vm0, %vm1125_vm1 }
 0x237   : > { %v1584_v5 = vmul.f32 %v1583_v32, %v4244_v50  ;;  %v1623_v12 = vadd.f32 0.05243302, %v1622_v38  ;;  %v1661_v43 = vadd.f32 0.0036580483, %v1660_v29  ;;  %v1123_v34 = vadd.f32 %v2968_v15, %v1122_v1 }
 0x238   : > { %v4318_v7 = vmul.f32 %v1467_v55, %v4994_v56  ;;  %v4321_v28 = vmul.f32 %v1507_v58, %v4089_v22  ;;  %v1965_v2 = vpack.c.bf16 %v1939_v10, %v1937_v23  ;;  %v1700_v33 = vmul.f32 %v1699_v45, %v4287_v39 }
 0x239   : > { %v1547_v27 = vadd.f32 1.1283791, %v1546_v54  ;;  %v4331_v32 = vmul.f32 0.5, %v4219_v59  ;;  %v4334_v38 = vmul.f32 0.5, %v4222_v30  ;;  %v1127_v22 = vsel %vm4326_vm2, %v2968_v15, %v1123_v34 }
 0x23a   : > { %v2970_v55 = vpop.eup %2969  ;;  %2241 = vmatmul.bf16.gmra.mxu3 %v1965_v2  ;;  %2339 = vmatmul.bf16.gmra.mxu1 %v1965_v2  ;;  %vm1129_vm3 = vcmp.eq.f32.partialorder %v1128_v31, 8.507059e+37  ;;  %v1131_v58 = vor.u32 1.1754944e-38, %v1130_v0  ;;  %v1154_v51 = vadd.f32 0.112945676, %v1153_v47  ;;  %v1231_v29 = vmul.f32 %v1230_v37, %v4990_v52  ;;  %v4998_v31 = vld [vmem:[#allocation30_spill] sm:$0xff] }
 0x23b   : > { %4997 = vst [vmem:[#allocation24_spill] sm:$0xff] %v4334_v38  ;;  %v1585_v45 = vadd.f32 0.18741608, %v1584_v5  ;;  %v1624_v54 = vmul.f32 %v1623_v12, %v4258_v61  ;;  %v1662_v59 = vmul.f32 %v1661_v43, %v4277_v57  ;;  %v1200_v1 = vmul.f32 %v2970_v55, %v4305_v36  ;;  %v4999_v12 = vld [vmem:[#allocation35_spill] sm:$0xff] }
 0x23c   : > { %v1701_v30 = vadd.f32 0.0036580483, %v1700_v33  ;;  %v1132_v44 = vsel %vm1129_vm3, %v1131_v58, %v1127_v22  ;;  %v1155_v23 = vmul.f32 %v1154_v51, %v3800_v24  ;;  %v1232_v15 = vadd.f32 0.014752088, %v1231_v29 }
 0x23d   : > { %v1201_v41 = vsub.f32 1.0, %v1200_v1  ;;  %vm1204_vm4 = vweird.f32 %v4305_v36  ;;  %v1208_v2 = vand.u32 2147483647, %v4305_v36  ;;  %v1269_v10 = vmul.f32 3.8918573e-05, %v4998_v31 }
 0x23e   : > { %v1210_v37 = vand.u32 2147483648, %v4305_v36  ;;  %v1156_v0 = vadd.f32 0.4994258, %v1155_v23  ;;  %v1233_v47 = vmul.f32 %v1232_v15, %v4990_v52  ;;  %v1349_v5 = vmul.f32 3.8918573e-05, %v3905_v26 }
 0x23f   : > { %v1133_v43 = vmul.f32 %v1132_v44, %v4999_v12  ;;  %v1202_v34 = vmul.f32 %v2970_v55, %v1201_v41  ;;  %vm1205_vm5 = vweird.f32 %v2970_v55  ;;  %v1270_v56 = vadd.f32 0.001143296, %v1269_v10 }
 0x240   : > { %v1663_v33 = vadd.f32 0.05243302, %v1662_v59  ;;  %v1157_v9 = vmul.f32 %v1156_v0, %v3800_v24  ;;  %v1234_v22 = vadd.f32 0.112945676, %v1233_v47  ;;  %v1350_v58 = vadd.f32 0.001143296, %v1349_v5  ;;  %vm1206_vm6 = vmor %vm1204_vm4, %vm1205_vm5 }
 0x241   : > { %v1586_v51 = vmul.f32 %v1585_v45, %v4244_v50  ;;  %v1702_v29 = vmul.f32 %v1701_v30, %v4287_v39  ;;  %v1203_v1 = vadd.f32 %v2970_v55, %v1202_v34  ;;  %v1271_v23 = vmul.f32 %v1270_v56, %v4998_v31 }
 0x242   : > { %v1211_v15 = vor.u32 1.1754944e-38, %v1210_v37  ;;  %v4356_v44 = vadd.f32 1.0, %v1157_v9  ;;  %v1235_v41 = vmul.f32 %v1234_v22, %v4990_v52  ;;  %v1351_v59 = vmul.f32 %v1350_v58, %v3905_v26 }
 0x243   : > { %v2625_v24 = vclamps-f32 %v1133_v43, 1.0  ;;  %v1207_v10 = vsel %vm1206_vm6, %v2970_v55, %v1203_v1  ;;  %vm1209_vm7 = vcmp.eq.f32.partialorder %v1208_v2, 8.507059e+37  ;;  %v1272_v0 = vadd.f32 0.014752088, %v1271_v23  ;;  %v547_v43 = vpop.f32.mrf.mxu3 }
 0x244   : > { %v4361_v45 = vmul.f32 0.5, %v4249_v40  ;;  %v1664_v30 = vmul.f32 %v1663_v33, %v4277_v57  ;;  %v1212_v47 = vsel %vm1209_vm7, %v1211_v15, %v1207_v10  ;;  %2971 = vrcp.f32 %v4356_v44  ;;  %v498_v40 = vpop.f32.mrf.mxu2 }
 0x245   : > { %v1703_v36 = vadd.f32 0.05243302, %v1702_v29  ;;  %v1213_v37 = vmul.f32 %v1212_v47, %v4134_v49  ;;  %v1236_v5 = vadd.f32 0.4994258, %v1235_v41  ;;  %v1273_v12 = vmul.f32 %v1272_v0, %v4998_v31  ;;  %v5005_v0 = vld [vmem:[#allocation27_spill] sm:$0xff]  ;;  %v5006_v47 = vld [vmem:[#allocation29_spill] sm:$0xff] }
 0x246   : > { %v4368_v34 = vmul.f32 %v1547_v27, %v4101_v14  ;;  %v4370_v55 = vadd.f32 1.1283791, %v1586_v51  ;;  %v4372_v2 = vadd.f32 0.18741608, %v1624_v54  ;;  %v1352_v56 = vadd.f32 0.014752088, %v1351_v59 }
 0x247   : > { %v2627_v33 = vclamps-f32 %v1213_v37, 1.0  ;;  %v1908_v9 = vadd.f32 1.0, %v2625_v24  ;;  %v1237_v22 = vmul.f32 %v1236_v5, %v4990_v52  ;;  %v4376_v58 = vadd.f32 %v498_v40, %v3416_v17  ;;  %v5002_v27 = vld [vmem:[#allocation31_spill] sm:$0xff] }
 0x248   : > { %v4378_v49 = vadd.f32 0.18741608, %v1664_v30  ;;  %v4381_v29 = vadd.f32 %v547_v43, %v3418_v18  ;;  %v1274_v14 = vadd.f32 0.112945676, %v1273_v12  ;;  %v1309_v51 = vmul.f32 3.8918573e-05, %v5002_v27 }
 0x249   : > { %5000 = vst [vmem:[#allocation21_spill] sm:$0xff] %v4376_v58  ;;  %v4385_v54 = vmul.f32 %v1703_v36, %v4287_v39  ;;  %v1910_v1 = vadd.f32 1.0, %v2627_v33  ;;  %v4387_v23 = vadd.f32 1.0, %v1237_v22  ;;  %v4390_v15 = vmul.f32 0.70710677, %v4376_v58 }
 0x24a   : > { %5001 = vst [vmem:[#allocation23_spill] sm:$0xff] %v4381_v29  ;;  %v2972_v52 = vpop.eup %2971  ;;  %v1168_v41 = vand.u32 2147483647, %v4356_v44  ;;  %v4394_v59 = vmul.f32 0.70710677, %v4381_v29  ;;  %v1275_v24 = vmul.f32 %v1274_v14, %v4998_v31  ;;  %v1353_v10 = vmul.f32 %v1352_v56, %v3905_v26 }
 0x24b   : > { %5003 = vst [vmem:[#allocation16_spill] sm:$0xff] %v4390_v15  ;;  %v1940_v30 = vmul.f32 %v1908_v9, %v5005_v0  ;;  %v1942_v36 = vmul.f32 %v1910_v1, %v5006_v47  ;;  %v1160_v37 = vmul.f32 %v2972_v52, %v4356_v44  ;;  %2973 = vrcp.f32 %v4387_v23  ;;  %v549_v0 = vpop.f32.mrf.mxu3 }
 0x24c   : > { %5004 = vst [vmem:[#allocation18_spill] sm:$0xff] %v4394_v59  ;;  %vm1164_vm8 = vweird.f32 %v4356_v44  ;;  %v1170_v5 = vand.u32 2147483648, %v4356_v44  ;;  %v1736_v12 = vmul.f32 %v4390_v15, %v4390_v15  ;;  %v1310_v40 = vadd.f32 0.001143296, %v1309_v51  ;;  %v500_v1 = vpop.f32.mrf.mxu2 }
 0x24d   : > { %v1966_v43 = vpack.c.bf16 %v1942_v36, %v1940_v30  ;;  %v1161_v33 = vsub.f32 1.0, %v1160_v37  ;;  %v1776_v56 = vmul.f32 %v4394_v59, %v4394_v59  ;;  %v1276_v9 = vadd.f32 0.4994258, %v1275_v24 }
 0x24e   : > { %vm1165_vm9 = vweird.f32 %v2972_v52  ;;  %vm4408_vm10 = vcmp.eq.f32.partialorder %v1168_v41, 8.507059e+37  ;;  %v4412_v14 = vmin.f32 %v1736_v12, 16.0  ;;  %v1354_v47 = vadd.f32 0.112945676, %v1353_v10 }
 0x24f   : > { %2197 = vmatmul.bf16.gmra.mxu2 %v1966_v43  ;;  %v1162_v29 = vmul.f32 %v2972_v52, %v1161_v33  ;;  %2295 = vmatmul.bf16.gmra.mxu0 %v1966_v43  ;;  %v4414_v51 = vmin.f32 %v1776_v56, 16.0  ;;  %v4417_v30 = vadd.f32 %v500_v1, %v3416_v17  ;;  %v4420_v24 = vadd.f32 %v549_v0, %v3418_v18  ;;  %vm1166_vm11 = vmor %vm1164_vm8, %vm1165_vm9 }
 0x250   : > { %v1171_v41 = vor.u32 1.1754944e-38, %v1170_v5  ;;  %v1738_v36 = vmul.f32 2.1237322e-06, %v4412_v14  ;;  %v1277_v37 = vmul.f32 %v1276_v9, %v4998_v31  ;;  %v1311_v12 = vmul.f32 %v1310_v40, %v5002_v27 }
 0x251   : > { %5009 = vst [vmem:[#allocation19_spill] sm:$0xff] %v4417_v30  ;;  %v2974_v59 = vpop.eup %2973  ;;  %v1163_v10 = vadd.f32 %v2972_v52, %v1162_v29  ;;  %v1248_v33 = vand.u32 2147483647, %v4387_v23  ;;  %v1778_v43 = vmul.f32 2.1237322e-06, %v4414_v51  ;;  %v1250_v18 = vand.u32 2147483648, %v4387_v23 }
 0x252   : > { %5010 = vst [vmem:[#allocation25_spill] sm:$0xff] %v4420_v24  ;;  %v4428_v56 = vmul.f32 0.70710677, %v4417_v30  ;;  %v1240_v17 = vmul.f32 %v2974_v59, %v4387_v23  ;;  %v1739_v31 = vadd.f32 0.00028619796, %v1738_v36  ;;  %v1355_v5 = vmul.f32 %v1354_v47, %v3905_v26 }
 0x253   : > { %v1167_v40 = vsel %vm1166_vm11, %v2972_v52, %v1163_v10  ;;  %v1779_v29 = vadd.f32 0.00028619796, %v1778_v43  ;;  %v4439_v1 = vmul.f32 0.70710677, %v4420_v24  ;;  %v4444_v58 = vadd.f32 1.0, %v1277_v37  ;;  %v5013_v10 = vld [vmem:[#allocation37_spill] sm:$0xff] }
 0x254   : > { %5011 = vst [vmem:[#allocation38_spill] sm:$0xff] %v4428_v56  ;;  %v1816_v9 = vmul.f32 %v4428_v56, %v4428_v56  ;;  %v1172_v0 = vsel %vm4408_vm10, %v1171_v41, %v1167_v40  ;;  %v1241_v44 = vsub.f32 1.0, %v1240_v17  ;;  %v1740_v30 = vmul.f32 %v1739_v31, %v4412_v14 }
 0x255   : > { %5012 = vst [vmem:[#allocation22_spill] sm:$0xff] %v4439_v1  ;;  %vm1245_vm12 = vweird.f32 %v2974_v59  ;;  %v1780_v36 = vmul.f32 %v1779_v29, %v4414_v51  ;;  %v1856_v52 = vmul.f32 %v4439_v1, %v4439_v1  ;;  %v1173_v43 = vmul.f32 %v1172_v0, %v5013_v10 }
 0x256   : > { %v4447_v47 = vmin.f32 %v1816_v9, 16.0  ;;  %v1242_v24 = vmul.f32 %v2974_v59, %v1241_v44  ;;  %v1741_v38 = vadd.f32 0.0036580483, %v1740_v30  ;;  %2975 = vrcp.f32 %v4444_v58 }
 0x257   : > { %v1626_v22 = vmul.f32 %v4372_v2, %v4258_v61  ;;  %v1666_v41 = vmul.f32 %v4378_v49, %v4277_v57  ;;  %v1781_v37 = vadd.f32 0.0036580483, %v1780_v36  ;;  %vm1244_vm13 = vweird.f32 %v4387_v23 }
 0x258   : > { %v1818_v17 = vmul.f32 2.1237322e-06, %v4447_v47  ;;  %v1243_v31 = vadd.f32 %v2974_v59, %v1242_v24  ;;  %v1742_v40 = vmul.f32 %v1741_v38, %v4412_v14  ;;  %v1356_v29 = vadd.f32 0.4994258, %v1355_v5  ;;  %vm1246_vm14 = vmor %vm1244_vm13, %vm1245_vm12 }
 0x259   : > { %v1705_v9 = vadd.f32 0.18741608, %v4385_v54  ;;  %v1251_v30 = vor.u32 1.1754944e-38, %v1250_v18  ;;  %v1782_v0 = vmul.f32 %v1781_v37, %v4414_v51  ;;  %v4463_v2 = vmin.f32 %v1856_v52, 16.0 }
 0x25a   : > { %v2626_v44 = vclamps-f32 %v1173_v43, 1.0  ;;  %v1247_v49 = vsel %vm1246_vm14, %v2974_v59, %v1243_v31  ;;  %vm1249_vm15 = vcmp.eq.f32.partialorder %v1248_v33, 8.507059e+37  ;;  %v1312_v36 = vadd.f32 0.014752088, %v1311_v12 }
 0x25b   : > { %v4467_v24 = vmul.f32 %v4370_v55, %v4231_v16  ;;  %v1252_v23 = vsel %vm1249_vm15, %v1251_v30, %v1247_v49  ;;  %v1743_v38 = vadd.f32 0.05243302, %v1742_v40  ;;  %v1819_v5 = vadd.f32 0.00028619796, %v1818_v17  ;;  %v5014_v49 = vld [vmem:[#allocation28_spill] sm:$0xff] }
 0x25c   : > { %v2976_v10 = vpop.eup %2975  ;;  %v1627_v54 = vadd.f32 1.1283791, %v1626_v22  ;;  %v1667_v1 = vadd.f32 1.1283791, %v1666_v41  ;;  %v1253_v18 = vmul.f32 %v1252_v23, %v4139_v63  ;;  %v1357_v37 = vmul.f32 %v1356_v29, %v3905_v26  ;;  %v5015_v23 = vld [vmem:[#allocation32_spill] sm:$0xff] }
 0x25d   : > { %v1706_v52 = vmul.f32 %v1705_v9, %v4287_v39  ;;  %v1783_v43 = vadd.f32 0.05243302, %v1782_v0  ;;  %v1858_v59 = vmul.f32 2.1237322e-06, %v4463_v2  ;;  %v1280_v12 = vmul.f32 %v2976_v10, %v4444_v58 }
 0x25e   : > { %v2628_v33 = vclamps-f32 %v1253_v18, 1.0  ;;  %v1909_v16 = vadd.f32 1.0, %v2626_v44  ;;  %v4474_v55 = vadd.f32 1.0, %v1357_v37  ;;  %v1313_v17 = vmul.f32 %v1312_v36, %v5002_v27 }
 0x25f   : > { %v1744_v22 = vmul.f32 %v1743_v38, %v4412_v14  ;;  %v1820_v41 = vmul.f32 %v1819_v5, %v4447_v47  ;;  %v1281_v63 = vsub.f32 1.0, %v1280_v12  ;;  %v1389_v26 = vmul.f32 3.8918573e-05, %v3923_v46 }
 0x260   : > { %v1911_v31 = vadd.f32 1.0, %v2628_v33  ;;  %v1288_v40 = vand.u32 2147483647, %v4444_v58  ;;  %v1290_v29 = vand.u32 2147483648, %v4444_v58  ;;  %2977 = vrcp.f32 %v4474_v55 }
 0x261   : > { %v1784_v9 = vmul.f32 %v1783_v43, %v4414_v51  ;;  %v1859_v30 = vadd.f32 0.00028619796, %v1858_v59  ;;  %v1282_v0 = vmul.f32 %v2976_v10, %v1281_v63  ;;  %vm1285_vm0 = vweird.f32 %v2976_v10 }
 0x262   : > { %v1707_v44 = vadd.f32 1.1283791, %v1706_v52  ;;  %v1941_v36 = vmul.f32 %v1909_v16, %v5014_v49  ;;  %v1943_v38 = vmul.f32 %v1911_v31, %v5015_v23  ;;  %v1314_v5 = vadd.f32 0.112945676, %v1313_v17 }
 0x263   : > { %v1745_v18 = vadd.f32 0.18741608, %v1744_v22  ;;  %v1821_v37 = vadd.f32 0.0036580483, %v1820_v41  ;;  %v1283_v12 = vadd.f32 %v2976_v10, %v1282_v0  ;;  %vm1284_vm1 = vweird.f32 %v4444_v58 }
 0x264   : > { %v4488_v33 = vmul.f32 %v1627_v54, %v4241_v42  ;;  %v1967_v56 = vpack.c.bf16 %v1943_v38, %v1941_v36  ;;  %vm1286_vm2 = vmor %vm1284_vm1, %vm1285_vm0  ;;  %v1291_v43 = vor.u32 1.1754944e-38, %v1290_v29  ;;  %v1390_v59 = vadd.f32 0.001143296, %v1389_v26 }
 0x265   : > { %v1785_v63 = vadd.f32 0.18741608, %v1784_v9  ;;  %v1860_v52 = vmul.f32 %v1859_v30, %v4463_v2  ;;  %v1287_v15 = vsel %vm1286_vm2, %v2976_v10, %v1283_v12  ;;  %vm1289_vm3 = vcmp.eq.f32.partialorder %v1288_v40, 8.507059e+37 }
 0x266   : > { %v2978_v16 = vpop.eup %2977  ;;  %v4492_v17 = vmul.f32 %v1667_v1, %v4262_v53  ;;  %2246 = vmatmul.bf16.gmra.mxu3 %v1967_v56  ;;  %2344 = vmatmul.bf16.gmra.mxu1 %v1967_v56  ;;  %v1292_v22 = vsel %vm1289_vm3, %v1291_v43, %v1287_v15  ;;  %v1315_v58 = vmul.f32 %v1314_v5, %v5002_v27  ;;  %v1429_v42 = vmul.f32 3.8918573e-05, %v4067_v3 }
 0x267   : > { %v4497_v54 = vmul.f32 %v1707_v44, %v4271_v35  ;;  %v1746_v41 = vmul.f32 %v1745_v18, %v4412_v14  ;;  %v1822_v26 = vmul.f32 %v1821_v37, %v4447_v47  ;;  %v1360_v10 = vmul.f32 %v2978_v16, %v4474_v55 }
 0x268   : > { %v1293_v31 = vmul.f32 %v1292_v22, %v4145_v48  ;;  %v1316_v53 = vadd.f32 0.4994258, %v1315_v58  ;;  %v1391_v1 = vmul.f32 %v1390_v59, %v3923_v46  ;;  %v1430_v56 = vadd.f32 0.001143296, %v1429_v42 }
 0x269   : > { %v4505_v15 = vmul.f32 %v1785_v63, %v4414_v51  ;;  %v1861_v40 = vadd.f32 0.0036580483, %v1860_v52  ;;  %v1361_v29 = vsub.f32 1.0, %v1360_v10  ;;  %v1509_v35 = vmul.f32 3.8918573e-05, %v4103_v19 }
 0x26a   : > { %v1370_v9 = vand.u32 2147483648, %v4474_v55  ;;  %v1317_v30 = vmul.f32 %v1316_v53, %v5002_v27  ;;  %v1392_v0 = vadd.f32 0.014752088, %v1391_v1  ;;  %v1431_v44 = vmul.f32 %v1430_v56, %v4067_v3 }
 0x26b   : > { %v1362_v49 = vmul.f32 %v2978_v16, %v1361_v29  ;;  %vm1365_vm4 = vweird.f32 %v2978_v16  ;;  %v1368_v48 = vand.u32 2147483647, %v4474_v55  ;;  %v1510_v36 = vadd.f32 0.001143296, %v1509_v35 }
 0x26c   : > { %v2629_v23 = vclamps-f32 %v1293_v31, 1.0  ;;  %v4512_v38 = vadd.f32 1.0, %v1317_v30  ;;  %v1393_v5 = vmul.f32 %v1392_v0, %v3923_v46  ;;  %v1432_v18 = vadd.f32 0.014752088, %v1431_v44 }
 0x26d   : > { %v1363_v37 = vadd.f32 %v2978_v16, %v1362_v49  ;;  %vm1364_vm5 = vweird.f32 %v4474_v55  ;;  %v1511_v12 = vmul.f32 %v1510_v36, %v4103_v19  ;;  %v1469_v27 = vmul.f32 3.8918573e-05, %v4069_v25 }
 0x26e   : > { %v4518_v43 = vadd.f32 1.1283791, %v1746_v41  ;;  %v1823_v59 = vadd.f32 0.05243302, %v1822_v26  ;;  %vm1366_vm6 = vmor %vm1364_vm5, %vm1365_vm4  ;;  %v1371_v63 = vor.u32 1.1754944e-38, %v1370_v9  ;;  %2979 = vrcp.f32 %v4512_v38 }
 0x26f   : > { %v1367_v52 = vsel %vm1366_vm6, %v2978_v16, %v1363_v37  ;;  %vm1369_vm7 = vcmp.eq.f32.partialorder %v1368_v48, 8.507059e+37  ;;  %v1394_v22 = vadd.f32 0.112945676, %v1393_v5  ;;  %v1433_v58 = vmul.f32 %v1432_v18, %v4067_v3 }
 0x270   : > { %v1372_v42 = vsel %vm1369_vm7, %v1371_v63, %v1367_v52  ;;  %v1912_v10 = vadd.f32 1.0, %v2629_v23  ;;  %v1512_v31 = vadd.f32 0.014752088, %v1511_v12  ;;  %v1470_v55 = vadd.f32 0.001143296, %v1469_v27 }
 0x271   : > { %v1862_v53 = vmul.f32 %v1861_v40, %v4463_v2  ;;  %v1373_v1 = vmul.f32 %v1372_v42, %v4153_v13  ;;  %v1395_v41 = vmul.f32 %v1394_v22, %v3923_v46  ;;  %v1434_v26 = vadd.f32 0.112945676, %v1433_v58  ;;  %v5016_v13 = vld [vmem:[#allocation33_spill] sm:$0xff]  ;;  %v5017_v22 = vld [vmem:[#allocation36_spill] sm:$0xff] }
 0x272   : > { %v4526_v56 = vmul.f32 %v1823_v59, %v4447_v47  ;;  %v1513_v16 = vmul.f32 %v1512_v31, %v4103_v19  ;;  %v1471_v29 = vmul.f32 %v1470_v55, %v4069_v25  ;;  %v1549_v35 = vmul.f32 3.8918573e-05, %v4115_v6 }
 0x273   : > { %v2631_v9 = vclamps-f32 %v1373_v1, 1.0  ;;  %v1328_v30 = vand.u32 2147483647, %v4512_v38  ;;  %v1396_v0 = vadd.f32 0.4994258, %v1395_v41  ;;  %v1435_v40 = vmul.f32 %v1434_v26, %v4067_v3 }
 0x274   : > { %v2980_v44 = vpop.eup %2979  ;;  %v1944_v49 = vmul.f32 %v1912_v10, %v5016_v13  ;;  %v1514_v48 = vadd.f32 0.112945676, %v1513_v16  ;;  %v1472_v36 = vadd.f32 0.014752088, %v1471_v29  ;;  %v1550_v23 = vadd.f32 0.001143296, %v1549_v35 }
 0x275   : > { %v1914_v5 = vadd.f32 1.0, %v2631_v9  ;;  %v1320_v18 = vmul.f32 %v2980_v44, %v4512_v38  ;;  %v1397_v37 = vmul.f32 %v1396_v0, %v3923_v46  ;;  %v1589_v12 = vmul.f32 3.8918573e-05, %v4244_v50 }
 0x276   : > { %v1436_v27 = vadd.f32 0.4994258, %v1435_v40  ;;  %v1515_v59 = vmul.f32 %v1514_v48, %v4103_v19  ;;  %v1473_v63 = vmul.f32 %v1472_v36, %v4069_v25  ;;  %v1551_v52 = vmul.f32 %v1550_v23, %v4115_v6 }
 0x277   : > { %v1946_v58 = vmul.f32 %v1914_v5, %v5017_v22  ;;  %v1321_v42 = vsub.f32 1.0, %v1320_v18  ;;  %v1330_v10 = vand.u32 2147483648, %v4512_v38  ;;  %v4542_v31 = vadd.f32 1.0, %v1397_v37 }
 0x278   : > { %v1437_v55 = vmul.f32 %v1436_v27, %v4067_v3  ;;  %v1516_v1 = vadd.f32 0.4994258, %v1515_v59  ;;  %v1474_v46 = vadd.f32 0.112945676, %v1473_v63  ;;  %v1552_v41 = vadd.f32 0.014752088, %v1551_v52 }
 0x279   : > { %v1968_v26 = vpack.c.bf16 %v1946_v58, %v1944_v49  ;;  %v1322_v16 = vmul.f32 %v2980_v44, %v1321_v42  ;;  %vm1325_vm8 = vweird.f32 %v2980_v44  ;;  %2981 = vrcp.f32 %v4542_v31 }
 0x27a   : > { %vm1324_vm9 = vweird.f32 %v4512_v38  ;;  %v4547_v29 = vadd.f32 1.0, %v1437_v55  ;;  %v1517_v35 = vmul.f32 %v1516_v1, %v4103_v19  ;;  %v1590_v9 = vadd.f32 0.001143296, %v1589_v12 }
 0x27b   : > { %2202 = vmatmul.bf16.gmra.mxu2 %v1968_v26  ;;  %v1323_v0 = vadd.f32 %v2980_v44, %v1322_v16  ;;  %v1331_v40 = vor.u32 1.1754944e-38, %v1330_v10  ;;  %2300 = vmatmul.bf16.gmra.mxu0 %v1968_v26  ;;  %v1475_v3 = vmul.f32 %v1474_v46, %v4069_v25  ;;  %v1553_v13 = vmul.f32 %v1552_v41, %v4115_v6  ;;  %vm1326_vm10 = vmor %vm1324_vm9, %vm1325_vm8 }
 0x27c   : > { %v1408_v49 = vand.u32 2147483647, %v4542_v31  ;;  %v1410_v48 = vand.u32 2147483648, %v4542_v31  ;;  %2983 = vrcp.f32 %v4547_v29  ;;  %v1669_v38 = vmul.f32 3.8918573e-05, %v4277_v57 }
 0x27d   : > { %v4556_v36 = vadd.f32 0.05243302, %v1862_v53  ;;  %v1327_v19 = vsel %vm1326_vm10, %v2980_v44, %v1323_v0  ;;  %vm1329_vm11 = vcmp.eq.f32.partialorder %v1328_v30, 8.507059e+37  ;;  %v4558_v23 = vadd.f32 1.0, %v1517_v35 }
 0x27e   : > { %v1332_v5 = vsel %vm1329_vm11, %v1331_v40, %v1327_v19  ;;  %v1476_v18 = vadd.f32 0.4994258, %v1475_v3  ;;  %v1554_v37 = vadd.f32 0.112945676, %v1553_v13  ;;  %v1591_v12 = vmul.f32 %v1590_v9, %v4244_v50 }
 0x27f   : > { %v2982_v27 = vpop.eup %2981  ;;  %v1333_v59 = vmul.f32 %v1332_v5, %v4148_v21  ;;  %vm1404_vm12 = vweird.f32 %v4542_v31  ;;  %v1448_v63 = vand.u32 2147483647, %v4547_v29  ;;  %2985 = vrcp.f32 %v4558_v23 }
 0x280   : > { %v1400_v53 = vmul.f32 %v2982_v27, %v4542_v31  ;;  %vm4566_vm13 = vcmp.eq.f32.partialorder %v1408_v49, 8.507059e+37  ;;  %v1411_v44 = vor.u32 1.1754944e-38, %v1410_v48  ;;  %v1670_v52 = vadd.f32 0.001143296, %v1669_v38 }
 0x281   : > { %v2630_v22 = vclamps-f32 %v1333_v59, 1.0  ;;  %v1450_v58 = vand.u32 2147483648, %v4547_v29  ;;  %v1477_v42 = vmul.f32 %v1476_v18, %v4069_v25  ;;  %v1555_v21 = vmul.f32 %v1554_v37, %v4115_v6  ;;  %v5024_v18 = vld [vmem:[#allocation34_spill] sm:$0xff] }
 0x282   : > { %v2984_v10 = vpop.eup %2983  ;;  %v1401_v55 = vsub.f32 1.0, %v1400_v53  ;;  %vm1444_vm14 = vweird.f32 %v4547_v29  ;;  %v1528_v1 = vand.u32 2147483647, %v4558_v23  ;;  %v1592_v46 = vadd.f32 0.014752088, %v1591_v12 }
 0x283   : > { %vm1405_vm15 = vweird.f32 %v2982_v27  ;;  %v1913_v41 = vadd.f32 1.0, %v2630_v22  ;;  %v1440_v26 = vmul.f32 %v2984_v10, %v4547_v29  ;;  %vm4576_vm0 = vcmp.eq.f32.partialorder %v1448_v63, 8.507059e+37 }
 0x284   : > { %v1530_v35 = vand.u32 2147483648, %v4558_v23  ;;  %v1402_v25 = vmul.f32 %v2982_v27, %v1401_v55  ;;  %v4581_v9 = vadd.f32 1.0, %v1477_v42  ;;  %v1556_v0 = vadd.f32 0.4994258, %v1555_v21  ;;  %vm1406_vm3 = vmor %vm1404_vm12, %vm1405_vm15 }
 0x285   : > { %v1593_v40 = vmul.f32 %v1592_v46, %v4244_v50  ;;  %v2986_v3 = vpop.eup %2985  ;;  %v1441_v13 = vsub.f32 1.0, %v1440_v26  ;;  %v1451_v49 = vor.u32 1.1754944e-38, %v1450_v58  ;;  %vm1524_vm1 = vweird.f32 %v4558_v23 }
 0x286   : > { %v1671_v48 = vmul.f32 %v1670_v52, %v4277_v57  ;;  %v1403_v38 = vadd.f32 %v2982_v27, %v1402_v25  ;;  %v1520_v19 = vmul.f32 %v2986_v3, %v4558_v23  ;;  %vm4587_vm2 = vcmp.eq.f32.partialorder %v1528_v1, 8.507059e+37 }
 0x287   : > { %2987 = vrcp.f32 %v4581_v9  ;;  %v1945_v37 = vmul.f32 %v1913_v41, %v5024_v18  ;;  %v1442_v12 = vmul.f32 %v2984_v10, %v1441_v13  ;;  %vm1445_vm4 = vweird.f32 %v2984_v10 }
 0x288   : > { %v1531_v59 = vor.u32 1.1754944e-38, %v1530_v35  ;;  %v1407_v63 = vsel %vm1406_vm3, %v2982_v27, %v1403_v38  ;;  %v1521_v53 = vsub.f32 1.0, %v1520_v19  ;;  %v1557_v52 = vmul.f32 %v1556_v0, %v4115_v6  ;;  %vm1446_vm5 = vmor %vm1444_vm14, %vm1445_vm4 }
 0x289   : > { %v1594_v22 = vadd.f32 0.112945676, %v1593_v40  ;;  %v1412_v58 = vsel %vm4566_vm13, %v1411_v44, %v1407_v63  ;;  %v1443_v42 = vadd.f32 %v2984_v10, %v1442_v12  ;;  %v1672_v21 = vadd.f32 0.014752088, %v1671_v48 }
 0x28a   : > { %v1629_v55 = vmul.f32 3.8918573e-05, %v4258_v61  ;;  %v1413_v31 = vmul.f32 %v1412_v58, %v4196_v60  ;;  %v1522_v1 = vmul.f32 %v2986_v3, %v1521_v53  ;;  %vm1525_vm6 = vweird.f32 %v2986_v3 }
 0x28b   : > { %v4603_v46 = vadd.f32 1.0, %v1557_v52  ;;  %v1447_v27 = vsel %vm1446_vm5, %v2984_v10, %v1443_v42  ;;  %vm1484_vm7 = vweird.f32 %v4581_v9  ;;  %v1488_v6 = vand.u32 2147483647, %v4581_v9  ;;  %vm1526_vm8 = vmor %vm1524_vm1, %vm1525_vm6 }
 0x28c   : > { %v1595_v30 = vmul.f32 %v1594_v22, %v4244_v50  ;;  %v2632_v41 = vclamps-f32 %v1413_v31, 1.0  ;;  %v1452_v26 = vsel %vm4576_vm0, %v1451_v49, %v1447_v27  ;;  %v1523_v60 = vadd.f32 %v2986_v3, %v1522_v1 }
 0x28d   : > { %v2988_v44 = vpop.eup %2987  ;;  %2989 = vrcp.f32 %v4603_v46  ;;  %v1453_v29 = vmul.f32 %v1452_v26, %v4301_v8  ;;  %v1490_v35 = vand.u32 2147483648, %v4581_v9  ;;  %v1673_v25 = vmul.f32 %v1672_v21, %v4277_v57 }
 0x28e   : > { %v1480_v10 = vmul.f32 %v2988_v44, %v4581_v9  ;;  %v1915_v0 = vadd.f32 1.0, %v2632_v41  ;;  %v1527_v40 = vsel %vm1526_vm8, %v2986_v3, %v1523_v60  ;;  %v1630_v13 = vadd.f32 0.001143296, %v1629_v55 }
 0x28f   : > { %v1709_v16 = vmul.f32 3.8918573e-05, %v4287_v39  ;;  %v2633_v49 = vclamps-f32 %v1453_v29, 1.0  ;;  %v1532_v48 = vsel %vm4587_vm2, %v1531_v59, %v1527_v40  ;;  %v1596_v8 = vadd.f32 0.4994258, %v1595_v30 }
 0x290   : > { %v1481_v38 = vsub.f32 1.0, %v1480_v10  ;;  %v1947_v23 = vmul.f32 %v1915_v0, %v4126_v62  ;;  %v1533_v19 = vmul.f32 %v1532_v48, %v4321_v28  ;;  %vm1485_vm9 = vweird.f32 %v2988_v44 }
 0x291   : > { %vm4622_vm10 = vcmp.eq.f32.partialorder %v1488_v6, 8.507059e+37  ;;  %v1916_v12 = vadd.f32 1.0, %v2633_v49  ;;  %v1597_v63 = vmul.f32 %v1596_v8, %v4244_v50  ;;  %v1674_v53 = vadd.f32 0.112945676, %v1673_v25  ;;  %vm1486_vm11 = vmor %vm1484_vm7, %vm1485_vm9 }
 0x292   : > { %v1482_v3 = vmul.f32 %v2988_v44, %v1481_v38  ;;  %v1969_v22 = vpack.c.bf16 %v1947_v23, %v1945_v37  ;;  %v2635_v5 = vclamps-f32 %v1533_v19, 1.0  ;;  %v1631_v59 = vmul.f32 %v1630_v13, %v4258_v61 }
 0x293   : > { %v2990_v52 = vpop.eup %2989  ;;  %v1710_v58 = vadd.f32 0.001143296, %v1709_v16  ;;  %v1491_v62 = vor.u32 1.1754944e-38, %v1490_v35  ;;  %v1568_v21 = vand.u32 2147483647, %v4603_v46  ;;  %v4633_v50 = vadd.f32 1.0, %v1597_v63 }
 0x294   : > { %v1483_v42 = vadd.f32 %v2988_v44, %v1482_v3  ;;  %v1560_v28 = vmul.f32 %v2990_v52, %v4603_v46  ;;  %2251 = vmatmul.bf16.gmra.mxu3 %v1969_v22  ;;  %2349 = vmatmul.bf16.gmra.mxu1 %v1969_v22  ;;  %v1918_v55 = vadd.f32 1.0, %v2635_v5  ;;  %v1675_v37 = vmul.f32 %v1674_v53, %v4277_v57 }
 0x295   : > { %v1632_v31 = vadd.f32 0.014752088, %v1631_v59  ;;  %v1570_v6 = vand.u32 2147483648, %v4603_v46  ;;  %v1711_v30 = vmul.f32 %v1710_v58, %v4287_v39  ;;  %v1948_v41 = vmul.f32 %v1916_v12, %v4167_v4 }
 0x296   : > { %v1487_v1 = vsel %vm1486_vm11, %v2988_v44, %v1483_v42  ;;  %v1561_v27 = vsub.f32 1.0, %v1560_v28  ;;  %v1950_v26 = vmul.f32 %v1918_v55, %v4185_v20  ;;  %2991 = vrcp.f32 %v4633_v50 }
 0x297   : > { %v1492_v60 = vsel %vm4622_vm10, %v1491_v62, %v1487_v1  ;;  %vm1565_vm12 = vweird.f32 %v2990_v52  ;;  %v1749_v44 = vmul.f32 3.8918573e-05, %v4412_v14  ;;  %v1676_v35 = vadd.f32 0.4994258, %v1675_v37 }
 0x298   : > { %v1493_v9 = vmul.f32 %v1492_v60, %v4318_v7  ;;  %v1562_v29 = vmul.f32 %v2990_v52, %v1561_v27  ;;  %v1970_v10 = vpack.c.bf16 %v1950_v26, %v1948_v41  ;;  %v1633_v25 = vmul.f32 %v1632_v31, %v4258_v61 }
 0x299   : > { %v1712_v0 = vadd.f32 0.014752088, %v1711_v30  ;;  %vm1564_vm13 = vweird.f32 %v4603_v46  ;;  %vm1569_vm14 = vcmp.eq.f32.partialorder %v1568_v21, 8.507059e+37  ;;  %v1571_v4 = vor.u32 1.1754944e-38, %v1570_v6  ;;  %v5027_v30 = vld [vmem:[#allocation15_spill] sm:$0xff] }
 0x29a   : > { %v1563_v40 = vadd.f32 %v2990_v52, %v1562_v29  ;;  %2207 = vmatmul.bf16.gmra.mxu2 %v1970_v10  ;;  %v2634_v20 = vclamps-f32 %v1493_v9, 1.0  ;;  %vm1566_vm15 = vmor %vm1564_vm13, %vm1565_vm12  ;;  %2305 = vmatmul.bf16.gmra.mxu0 %v1970_v10  ;;  %v1677_v7 = vmul.f32 %v1676_v35, %v4277_v57  ;;  %v1634_v13 = vadd.f32 0.112945676, %v1633_v25 }
 0x29b   : > { %v1713_v16 = vmul.f32 %v1712_v0, %v4287_v39  ;;  %v1610_v48 = vand.u32 2147483648, %v4633_v50  ;;  %v1750_v38 = vadd.f32 0.001143296, %v1749_v44  ;;  %v1829_v8 = vmul.f32 3.8918573e-05, %v4447_v47 }
 0x29c   : > { %v1567_v49 = vsel %vm1566_vm15, %v2990_v52, %v1563_v40  ;;  %v2992_v23 = vpop.eup %2991  ;;  %v4651_v46 = vadd.f32 1.0, %v1677_v7  ;;  %v1635_v18 = vmul.f32 %v1634_v13, %v4258_v61  ;;  %v1825_v3 = vadd.f32 0.18741608, %v4526_v56 }
 0x29d   : > { %v1572_v19 = vsel %vm1569_vm14, %v1571_v4, %v1567_v49  ;;  %v1714_v12 = vadd.f32 0.112945676, %v1713_v16  ;;  %v1600_v63 = vmul.f32 %v2992_v23, %v4633_v50  ;;  %vm1604_vm0 = vweird.f32 %v4633_v50 }
 0x29e   : > { %v1573_v57 = vmul.f32 %v1572_v19, %v4368_v34  ;;  %v1917_v53 = vadd.f32 1.0, %v2634_v20  ;;  %v1608_v52 = vand.u32 2147483647, %v4633_v50  ;;  %2993 = vrcp.f32 %v4651_v46 }
 0x29f   : > { %v1789_v22 = vmul.f32 3.8918573e-05, %v4414_v51  ;;  %v1601_v59 = vsub.f32 1.0, %v1600_v63  ;;  %v1636_v58 = vadd.f32 0.4994258, %v1635_v18  ;;  %v1715_v42 = vmul.f32 %v1714_v12, %v4287_v39 }
 0x2a0   : > { %v2636_v5 = vclamps-f32 %v1573_v57, 1.0  ;;  %vm1605_vm1 = vweird.f32 %v2992_v23  ;;  %v1611_v56 = vor.u32 1.1754944e-38, %v1610_v48  ;;  %v1751_v34 = vmul.f32 %v1750_v38, %v4412_v14 }
 0x2a1   : > { %v1830_v62 = vadd.f32 0.001143296, %v1829_v8  ;;  %v1602_v21 = vmul.f32 %v2992_v23, %v1601_v59  ;;  %v1637_v55 = vmul.f32 %v1636_v58, %v4258_v61  ;;  %v1716_v37 = vadd.f32 0.4994258, %v1715_v42  ;;  %vm1606_vm2 = vmor %vm1604_vm0, %vm1605_vm1  ;;  %v5034_v59 = vld [vmem:[#allocation38_spill] sm:$0xff] }
 0x2a2   : > { %v1919_v28 = vadd.f32 1.0, %v2636_v5  ;;  %v1949_v31 = vmul.f32 %v1917_v53, %v4178_v11  ;;  %v1752_v1 = vadd.f32 0.014752088, %v1751_v34  ;;  %v1790_v6 = vadd.f32 0.001143296, %v1789_v22 }
 0x2a3   : > { %v1831_v27 = vmul.f32 %v1830_v62, %v4447_v47  ;;  %v1603_v26 = vadd.f32 %v2992_v23, %v1602_v21  ;;  %v4667_v60 = vadd.f32 1.0, %v1637_v55  ;;  %v1717_v9 = vmul.f32 %v1716_v37, %v4287_v39 }
 0x2a4   : > { %v1951_v41 = vmul.f32 %v1919_v28, %v5027_v30  ;;  %v2994_v29 = vpop.eup %2993  ;;  %v1753_v61 = vmul.f32 %v1752_v1, %v4412_v14  ;;  %v1791_v11 = vmul.f32 %v1790_v6, %v4414_v51  ;;  %v1869_v10 = vmul.f32 3.8918573e-05, %v4463_v2 }
 0x2a5   : > { %v1832_v44 = vadd.f32 0.014752088, %v1831_v27  ;;  %v1607_v25 = vsel %vm1606_vm2, %v2992_v23, %v1603_v26  ;;  %vm1609_vm3 = vcmp.eq.f32.partialorder %v1608_v52, 8.507059e+37  ;;  %v1680_v0 = vmul.f32 %v2994_v29, %v4651_v46 }
 0x2a6   : > { %v1971_v35 = vpack.c.bf16 %v1951_v41, %v1949_v31  ;;  %v4679_v39 = vmul.f32 %v4556_v36, %v4463_v2  ;;  %v1612_v40 = vsel %vm1609_vm3, %v1611_v56, %v1607_v25  ;;  %v1688_v50 = vand.u32 2147483647, %v4651_v46 }
 0x2a7   : > { %2995 = vrcp.f32 %v4667_v60  ;;  %v1613_v4 = vmul.f32 %v1612_v40, %v4467_v24  ;;  %v1681_v20 = vsub.f32 1.0, %v1680_v0  ;;  %v1690_v7 = vand.u32 2147483648, %v4651_v46 }
 0x2a8   : > { %2256 = vmatmul.bf16.gmra.mxu3 %v1971_v35  ;;  %2354 = vmatmul.bf16.gmra.mxu1 %v1971_v35  ;;  %v4685_v13 = vadd.f32 1.0, %v1717_v9  ;;  %v1754_v16 = vadd.f32 0.112945676, %v1753_v61  ;;  %v1833_v49 = vmul.f32 %v1832_v44, %v4447_v47  ;;  %v1792_v48 = vadd.f32 0.014752088, %v1791_v11 }
 0x2a9   : > { %v1870_v36 = vadd.f32 0.001143296, %v1869_v10  ;;  %v1682_v38 = vmul.f32 %v2994_v29, %v1681_v20  ;;  %vm1685_vm4 = vweird.f32 %v2994_v29  ;;  %v1648_v8 = vand.u32 2147483647, %v4667_v60 }
 0x2aa   : > { %2997 = vrcp.f32 %v4685_v13  ;;  %v4691_v23 = vmul.f32 %v1825_v3, %v4447_v47  ;;  %vm1684_vm5 = vweird.f32 %v4651_v46  ;;  %vm4694_vm6 = vcmp.eq.f32.partialorder %v1688_v50, 8.507059e+37 }
 0x2ab   : > { %v1755_v19 = vmul.f32 %v1754_v16, %v4412_v14  ;;  %v2637_v18 = vclamps-f32 %v1613_v4, 1.0  ;;  %v1683_v12 = vadd.f32 %v2994_v29, %v1682_v38  ;;  %v1834_v57 = vadd.f32 0.112945676, %v1833_v49  ;;  %vm1686_vm7 = vmor %vm1684_vm5, %vm1685_vm4 }
 0x2ac   : > { %v1793_v63 = vmul.f32 %v1792_v48, %v4414_v51  ;;  %v1691_v52 = vor.u32 1.1754944e-38, %v1690_v7  ;;  %vm1644_vm8 = vweird.f32 %v4667_v60  ;;  %v1871_v22 = vmul.f32 %v1870_v36, %v4463_v2 }
 0x2ad   : > { %v2996_v53 = vpop.eup %2995  ;;  %v1756_v3 = vadd.f32 0.4994258, %v1755_v19  ;;  %v1687_v46 = vsel %vm1686_vm7, %v2994_v29, %v1683_v12  ;;  %vm4703_vm9 = vcmp.eq.f32.partialorder %v1648_v8, 8.507059e+37  ;;  %v1650_v58 = vand.u32 2147483648, %v4667_v60  ;;  %v5032_v12 = vld [vmem:[#allocation17_spill] sm:$0xff] }
 0x2ae   : > { %v1640_v5 = vmul.f32 %v2996_v53, %v4667_v60  ;;  %v1692_v42 = vsel %vm4694_vm6, %v1691_v52, %v1687_v46  ;;  %v1835_v34 = vmul.f32 %v1834_v57, %v4447_v47  ;;  %v1794_v62 = vadd.f32 0.112945676, %v1793_v63  ;;  %v5033_v63 = vld [vmem:[#allocation16_spill] sm:$0xff] }
 0x2af   : > { %v1757_v56 = vmul.f32 %v1756_v3, %v4412_v14  ;;  %v1693_v21 = vmul.f32 %v1692_v42, %v4492_v17  ;;  %v1920_v55 = vadd.f32 1.0, %v2637_v18  ;;  %v1872_v31 = vadd.f32 0.014752088, %v1871_v22 }
 0x2b0   : > { %v2998_v28 = vpop.eup %2997  ;;  %v1641_v37 = vsub.f32 1.0, %v1640_v5  ;;  %vm1645_vm10 = vweird.f32 %v2996_v53  ;;  %v1836_v6 = vadd.f32 0.4994258, %v1835_v34  ;;  %v1795_v26 = vmul.f32 %v1794_v62, %v4414_v51  ;;  %v2281_v62 = vpop.f32.mrf.mxu0 }
 0x2b1   : > { %v1720_v1 = vmul.f32 %v2998_v28, %v4685_v13  ;;  %v4714_v27 = vadd.f32 1.0, %v1757_v56  ;;  %v2639_v30 = vclamps-f32 %v1693_v21, 1.0  ;;  %v1873_v14 = vmul.f32 %v1872_v31, %v4463_v2  ;;  %vm1646_vm11 = vmor %vm1644_vm8, %vm1645_vm10 }
 0x2b2   : > { %v1642_v41 = vmul.f32 %v2996_v53, %v1641_v37  ;;  %v1651_v9 = vor.u32 1.1754944e-38, %v1650_v58  ;;  %v1728_v61 = vand.u32 2147483647, %v4685_v13  ;;  %v1730_v11 = vand.u32 2147483648, %v4685_v13 }
 0x2b3   : > { %v1721_v29 = vsub.f32 1.0, %v1720_v1  ;;  %2999 = vrcp.f32 %v4714_v27  ;;  %v1922_v17 = vadd.f32 1.0, %v2639_v30  ;;  %v1837_v10 = vmul.f32 %v1836_v6, %v4447_v47  ;;  %v2183_v1 = vpop.f32.mrf.mxu2  ;;  %v2232_v6 = vpop.f32.mrf.mxu3 }
 0x2b4   : > { %v1643_v44 = vadd.f32 %v2996_v53, %v1642_v41  ;;  %vm1725_vm12 = vweird.f32 %v2998_v28  ;;  %v1796_v25 = vadd.f32 0.4994258, %v1795_v26  ;;  %v1874_v0 = vadd.f32 0.112945676, %v1873_v14  ;;  %v5037_v41 = vld [vmem:[#allocation24_spill] sm:$0xff] }
 0x2b5   : > { %v1722_v35 = vmul.f32 %v2998_v28, %v1721_v29  ;;  %v1952_v40 = vmul.f32 %v1920_v55, %v4331_v32  ;;  %v1954_v50 = vmul.f32 %v1922_v17, %v4361_v45  ;;  %v4727_v20 = vadd.f32 1.0, %v1837_v10 }
 0x2b6   : > { %v1647_v4 = vsel %vm1646_vm11, %v2996_v53, %v1643_v44  ;;  %vm1724_vm13 = vweird.f32 %v4685_v13  ;;  %v1797_v47 = vmul.f32 %v1796_v25, %v4414_v51  ;;  %v1731_v48 = vor.u32 1.1754944e-38, %v1730_v11 }
 0x2b7   : > { %v1652_v7 = vsel %vm4703_vm9, %v1651_v9, %v1647_v4  ;;  %v1723_v16 = vadd.f32 %v2998_v28, %v1722_v35  ;;  %v1972_v60 = vpack.c.bf16 %v1954_v50, %v1952_v40  ;;  %vm1726_vm14 = vmor %vm1724_vm13, %vm1725_vm12  ;;  %3001 = vrcp.f32 %v4727_v20 }
 0x2b8   : > { %v1653_v49 = vmul.f32 %v1652_v7, %v4488_v33  ;;  %vm1729_vm15 = vcmp.eq.f32.partialorder %v1728_v61, 8.507059e+37  ;;  %v4735_v36 = vadd.f32 1.0, %v1797_v47  ;;  %v1875_v38 = vmul.f32 %v1874_v0, %v4463_v2 }
 0x2b9   : > { %v3000_v32 = vpop.eup %2999  ;;  %v1727_v45 = vsel %vm1726_vm14, %v2998_v28, %v1723_v16  ;;  %v1827_v8 = vadd.f32 1.1283791, %v4691_v23  ;;  %2212 = vmatmul.bf16.gmra.mxu2 %v1972_v60  ;;  %2310 = vmatmul.bf16.gmra.mxu0 %v1972_v60  ;;  %v1768_v19 = vand.u32 2147483647, %v4714_v27  ;;  %v1770_v18 = vand.u32 2147483648, %v4714_v27  ;;  %v2330_v28 = vpop.f32.mrf.mxu1 }
 0x2ba   : > { %v2638_v13 = vclamps-f32 %v1653_v49, 1.0  ;;  %v1732_v24 = vsel %vm1729_vm15, %v1731_v48, %v1727_v45  ;;  %v1760_v51 = vmul.f32 %v3000_v32, %v4714_v27  ;;  %3003 = vrcp.f32 %v4735_v36 }
 0x2bb   : > { %v1733_v33 = vmul.f32 %v1732_v24, %v4497_v54  ;;  %v579_v57 = vmul.f32 0.5, %v5032_v12  ;;  %v1748_v53 = vmul.f32 %v4518_v43, %v5033_v63  ;;  %v4748_v23 = vadd.f32 1.1283791, %v4505_v15  ;;  %v2185_v24 = vpop.f32.mrf.mxu2 }
 0x2bc   : > { %v1761_v52 = vsub.f32 1.0, %v1760_v51  ;;  %v4751_v3 = vadd.f32 0.18741608, %v4679_v39  ;;  %v1921_v54 = vadd.f32 1.0, %v2638_v13  ;;  %v1876_v46 = vadd.f32 0.4994258, %v1875_v38  ;;  %v2234_v51 = vpop.f32.mrf.mxu3 }
 0x2bd   : > { %v2640_v22 = vclamps-f32 %v1733_v33, 1.0  ;;  %v3002_v5 = vpop.eup %3001  ;;  %v1828_v58 = vmul.f32 %v1827_v8, %v5034_v59  ;;  %vm1764_vm0 = vweird.f32 %v4714_v27  ;;  %vm1765_vm1 = vweird.f32 %v3000_v32  ;;  %v2008_v39 = vld [vmem:[%s4893_s4] sm:$0x3] }
 0x2be   : > { %v1762_v42 = vmul.f32 %v3000_v32, %v1761_v52  ;;  %vm4755_vm2 = vcmp.eq.f32.partialorder %v1768_v19, 8.507059e+37  ;;  %v1771_v15 = vor.u32 1.1754944e-38, %v1770_v18  ;;  %v1840_v34 = vmul.f32 %v3002_v5, %v4727_v20  ;;  %vm1766_vm3 = vmor %vm1764_vm0, %vm1765_vm1 }
 0x2bf   : > { %v1923_v56 = vadd.f32 1.0, %v2640_v22  ;;  %v1848_v55 = vand.u32 2147483647, %v4727_v20  ;;  %v1877_v37 = vmul.f32 %v1876_v46, %v4463_v2  ;;  %v4765_v31 = vperm.slane %v2008_v39, 1  ;;  %v5038_v22 = vld [vmem:[#allocation21_spill] sm:$0xff] }
 0x2c0   : > { %v1763_v21 = vadd.f32 %v3000_v32, %v1762_v42  ;;  %v3004_v30 = vpop.eup %3003  ;;  %v1953_v26 = vmul.f32 %v1921_v54, %v5037_v41  ;;  %v1841_v9 = vsub.f32 1.0, %v1840_v34  ;;  %v1850_v29 = vand.u32 2147483648, %v4727_v20 }
 0x2c1   : > { %v1955_v14 = vmul.f32 %v1923_v56, %v579_v57  ;;  %v1800_v17 = vmul.f32 %v3004_v30, %v4735_v36  ;;  %v4773_v44 = vadd.f32 1.0, %v1877_v37  ;;  %v4775_v11 = vperm.slane %v2008_v39, 0  ;;  %v2332_v45 = vpop.f32.mrf.mxu1  ;;  %v5040_v56 = vld [vmem:[#allocation18_spill] sm:$0xff] }
 0x2c2   : > { %v1767_v61 = vsel %vm1766_vm3, %v3000_v32, %v1763_v21  ;;  %v1842_v25 = vmul.f32 %v3002_v5, %v1841_v9  ;;  %vm1845_vm4 = vweird.f32 %v3002_v5  ;;  %v2282_v27 = vadd.f32 %v2281_v62, %v4765_v31  ;;  %v2283_v32 = vpop.f32.mrf.mxu0 }
 0x2c3   : > { %v1973_v10 = vpack.c.bf16 %v1955_v14, %v1953_v26  ;;  %v1772_v35 = vsel %vm4755_vm2, %v1771_v15, %v1767_v61  ;;  %v1801_v40 = vsub.f32 1.0, %v1800_v17  ;;  %3005 = vrcp.f32 %v4773_v44  ;;  %v2188_v14 = vpop.f32.mrf.mxu2  ;;  %v5041_v17 = vld [vmem:[#allocation22_spill] sm:$0xff] }
 0x2c4   : > { %v1773_v0 = vmul.f32 %v1772_v35, %v1748_v53  ;;  %v1843_v50 = vadd.f32 %v3002_v5, %v1842_v25  ;;  %vm1844_vm5 = vweird.f32 %v4727_v20  ;;  %v1851_v4 = vor.u32 1.1754944e-38, %v1850_v29 }
 0x2c5   : > { %2261 = vmatmul.bf16.gmra.mxu3 %v1973_v10  ;;  %2359 = vmatmul.bf16.gmra.mxu1 %v1973_v10  ;;  %v1810_v7 = vand.u32 2147483648, %v4735_v36  ;;  %vm1846_vm6 = vmor %vm1844_vm5, %vm1845_vm4  ;;  %v1802_v47 = vmul.f32 %v3004_v30, %v1801_v40  ;;  %vm1805_vm7 = vweird.f32 %v3004_v30  ;;  %v2184_v60 = vadd.f32 %v2183_v1, %v4775_v11 }
 0x2c6   : > { %v2641_v16 = vclamps-f32 %v1773_v0, 1.0  ;;  %v1847_v49 = vsel %vm1846_vm6, %v3002_v5, %v1843_v50  ;;  %vm1849_vm8 = vcmp.eq.f32.partialorder %v1848_v55, 8.507059e+37  ;;  %vm1804_vm9 = vweird.f32 %v4735_v36 }
 0x2c7   : > { %v1808_v48 = vand.u32 2147483647, %v4735_v36  ;;  %v1852_v38 = vsel %vm1849_vm8, %v1851_v4, %v1847_v49  ;;  %v1803_v8 = vadd.f32 %v3004_v30, %v1802_v47  ;;  %v2331_v20 = vadd.f32 %v2330_v28, %v2282_v27  ;;  %vm1806_vm10 = vmor %vm1804_vm9, %vm1805_vm7 }
 0x2c8   : > { %v2233_v13 = vadd.f32 %v2232_v6, %v2184_v60  ;;  %v1866_v33 = vmul.f32 %v4751_v3, %v4463_v2  ;;  %v1853_v19 = vmul.f32 %v1852_v38, %v1828_v58  ;;  %v2284_v18 = vadd.f32 %v2283_v32, %v4765_v31  ;;  %v5039_v2 = vld [vmem:[#allocation19_spill] sm:$0xff] }
 0x2c9   : > { %v2186_v12 = vadd.f32 %v2185_v24, %v4775_v11  ;;  %v3006_v36 = vpop.eup %3005  ;;  %v1924_v57 = vadd.f32 1.0, %v2641_v16  ;;  %v1807_v63 = vsel %vm1806_vm10, %v3004_v30, %v1803_v8  ;;  %v1811_v53 = vor.u32 1.1754944e-38, %v1810_v7  ;;  %v2335_v41 = vpop.f32.mrf.mxu1  ;;  %v5043_v8 = vld [vmem:[#allocation25_spill] sm:$0xff] }
 0x2ca   : > { %v2370_v52 = vpack.c.bf16 %v2331_v20, %v2233_v13  ;;  %v580_v54 = vmul.f32 0.5, %v5038_v22  ;;  %v2643_v46 = vclamps-f32 %v1853_v19, 1.0  ;;  %vm1809_vm11 = vcmp.eq.f32.partialorder %v1808_v48, 8.507059e+37  ;;  %v2286_v30 = vpop.f32.mrf.mxu0 }
 0x2cb   : > { %v1880_v5 = vmul.f32 %v3006_v36, %v4773_v44  ;;  %v582_v3 = vmul.f32 0.5, %v5039_v2  ;;  %v1812_v59 = vsel %vm1809_vm11, %v1811_v53, %v1807_v63  ;;  %v2333_v58 = vadd.f32 %v2332_v45, %v2284_v18  ;;  %v2190_v48 = vpop.f32.mrf.mxu2  ;;  %v5042_v45 = vld [vmem:[#allocation23_spill] sm:$0xff] }
 0x2cc   : > { %2386 = vst [vmem:[%s4796_s3] sm:$0xff] %v2370_v52  ;;  %v2235_v42 = vadd.f32 %v2234_v51, %v2186_v12  ;;  %v1788_v43 = vmul.f32 %v4748_v23, %v5040_v56  ;;  %v1867_v15 = vadd.f32 1.1283791, %v1866_v33  ;;  %v1926_v34 = vadd.f32 1.0, %v2643_v46  ;;  %v2237_v23 = vpop.f32.mrf.mxu3 }
 0x2cd   : > { %v1881_v39 = vsub.f32 1.0, %v1880_v5  ;;  %v1956_v62 = vmul.f32 %v1924_v57, %v580_v54  ;;  %v1888_v28 = vand.u32 2147483647, %v4773_v44  ;;  %v1890_v21 = vand.u32 2147483648, %v4773_v44 }
 0x2ce   : > { %v2371_v55 = vpack.c.bf16 %v2333_v58, %v2235_v42  ;;  %v1958_v37 = vmul.f32 %v1926_v34, %v582_v3  ;;  %v1813_v1 = vmul.f32 %v1812_v59, %v1788_v43  ;;  %vm1885_vm12 = vweird.f32 %v3006_v36 }
 0x2cf   : > { %v1882_v6 = vmul.f32 %v3006_v36, %v1881_v39  ;;  %v2287_v26 = vadd.f32 %v2286_v30, %v4765_v31  ;;  %vm1884_vm13 = vweird.f32 %v4773_v44  ;;  %v2189_v61 = vadd.f32 %v2188_v14, %v4775_v11 }
 0x2d0   : > { %2387 = vst [vmem:[%s4796_s3 + $0x8] sm:$0xff] %v2371_v55  ;;  %v1974_v9 = vpack.c.bf16 %v1958_v37, %v1956_v62  ;;  %v1868_v10 = vmul.f32 %v1867_v15, %v5041_v17  ;;  %vm1886_vm14 = vmor %vm1884_vm13, %vm1885_vm12  ;;  %vm1889_vm15 = vcmp.eq.f32.partialorder %v1888_v28, 8.507059e+37  ;;  %v1891_v35 = vor.u32 1.1754944e-38, %v1890_v21 }
 0x2d1   : > { %v1883_v29 = vadd.f32 %v3006_v36, %v1882_v6  ;;  %v2642_v25 = vclamps-f32 %v1813_v1, 1.0  ;;  %v2336_v40 = vadd.f32 %v2335_v41, %v2287_v26  ;;  %v2238_v27 = vadd.f32 %v2237_v23, %v2189_v61  ;;  %v2337_v60 = vpop.f32.mrf.mxu1 }
 0x2d2   : > { %2217 = vmatmul.bf16.gmra.mxu2 %v1974_v9  ;;  %2315 = vmatmul.bf16.gmra.mxu0 %v1974_v9  ;;  %v2288_v44 = vpop.f32.mrf.mxu0  ;;  %v581_v38 = vmul.f32 0.5, %v5042_v45  ;;  %v583_v20 = vmul.f32 0.5, %v5043_v8  ;;  %v2191_v24 = vadd.f32 %v2190_v48, %v4775_v11 }
 0x2d3   : > { %v1887_v0 = vsel %vm1886_vm14, %v3006_v36, %v1883_v29  ;;  %v2372_v7 = vpack.c.bf16 %v2336_v40, %v2238_v27  ;;  %v1925_v47 = vadd.f32 1.0, %v2642_v25  ;;  %v2289_v49 = vadd.f32 %v2288_v44, %v4765_v31  ;;  %v2193_v52 = vpop.f32.mrf.mxu2 }
 0x2d4   : > { %v1892_v50 = vsel %vm1889_vm15, %v1891_v35, %v1887_v0  ;;  %v2239_v32 = vpop.f32.mrf.mxu3  ;;  %v2194_v54 = vadd.f32 %v2193_v52, %v4775_v11 }
 0x2d5   : > { %v1893_v4 = vmul.f32 %v1892_v50, %v1868_v10  ;;  %2388 = vst [vmem:[%s4796_s3 + $0x10] sm:$0xff] %v2372_v7  ;;  %v1957_v51 = vmul.f32 %v1925_v47, %v581_v38  ;;  %v2338_v19 = vadd.f32 %v2337_v60, %v2289_v49  ;;  %v2240_v18 = vadd.f32 %v2239_v32, %v2191_v24 }
 0x2d7   : > { %v2644_v16 = vclamps-f32 %v1893_v4, 1.0  ;;  %v2373_v36 = vpack.c.bf16 %v2338_v19, %v2240_v18 }
 0x2d9   : > { %v1927_v13 = vadd.f32 1.0, %v2644_v16  ;;  %2389 = vst [vmem:[%s4796_s3 + $0x18] sm:$0xff] %v2373_v36  ;;  %v2340_v63 = vpop.f32.mrf.mxu1 }
 0x2da   : > { %v2291_v57 = vpop.f32.mrf.mxu0 }
 0x2db   : > { %v1959_v33 = vmul.f32 %v1927_v13, %v583_v20  ;;  %v2292_v53 = vadd.f32 %v2291_v57, %v4765_v31  ;;  %v2195_v42 = vpop.f32.mrf.mxu2 }
 0x2dc   : > { %v2242_v22 = vpop.f32.mrf.mxu3  ;;  %v2196_v43 = vadd.f32 %v2195_v42, %v4775_v11 }
 0x2dd   : > { %v1975_v12 = vpack.c.bf16 %v1959_v33, %v1957_v51  ;;  %v2341_v46 = vadd.f32 %v2340_v63, %v2292_v53  ;;  %v2243_v5 = vadd.f32 %v2242_v22, %v2194_v54 }
 0x2df   : > { %2266 = vmatmul.bf16.gmra.mxu3 %v1975_v12  ;;  %2364 = vmatmul.bf16.gmra.mxu1 %v1975_v12  ;;  %v2374_v2 = vpack.c.bf16 %v2341_v46, %v2243_v5 }
 0x2e1   : > { %2390 = vst [vmem:[%s4796_s3 + $0x20] sm:$0xff] %v2374_v2  ;;  %v2342_v59 = vpop.f32.mrf.mxu1 }
 0x2e2   : > { %v2293_v3 = vpop.f32.mrf.mxu0 }
 0x2e3   : > { %v2294_v58 = vadd.f32 %v2293_v3, %v4765_v31  ;;  %v2198_v55 = vpop.f32.mrf.mxu2 }
 0x2e4   : > { %v2244_v56 = vpop.f32.mrf.mxu3  ;;  %v2199_v1 = vadd.f32 %v2198_v55, %v4775_v11 }
 0x2e5   : > { %v2343_v15 = vadd.f32 %v2342_v59, %v2294_v58  ;;  %v2245_v34 = vadd.f32 %v2244_v56, %v2196_v43 }
 0x2e7   : > { %v2375_v39 = vpack.c.bf16 %v2343_v15, %v2245_v34 }
 0x2e9   : > { %2391 = vst [vmem:[%s4796_s3 + $0x28] sm:$0xff] %v2375_v39  ;;  %v2345_v28 = vpop.f32.mrf.mxu1 }
 0x2ea   : > { %v2296_v62 = vpop.f32.mrf.mxu0 }
 0x2eb   : > { %v2297_v21 = vadd.f32 %v2296_v62, %v4765_v31  ;;  %v2200_v23 = vpop.f32.mrf.mxu2 }
 0x2ec   : > { %v2247_v37 = vpop.f32.mrf.mxu3  ;;  %v2201_v9 = vadd.f32 %v2200_v23, %v4775_v11 }
 0x2ed   : > { %v2346_v6 = vadd.f32 %v2345_v28, %v2297_v21  ;;  %v2248_v30 = vadd.f32 %v2247_v37, %v2199_v1 }
 0x2ef   : > { %v2376_v41 = vpack.c.bf16 %v2346_v6, %v2248_v30 }
 0x2f1   : > { %2392 = vst [vmem:[%s4796_s3 + $0x30] sm:$0xff] %v2376_v41  ;;  %v2347_v29 = vpop.f32.mrf.mxu1 }
 0x2f2   : > { %v2298_v26 = vpop.f32.mrf.mxu0 }
 0x2f3   : > { %v2299_v14 = vadd.f32 %v2298_v26, %v4765_v31 }
 0x2f4   : > { %v2249_v61 = vpop.f32.mrf.mxu3 }
 0x2f5   : > { %v2348_v17 = vadd.f32 %v2347_v29, %v2299_v14  ;;  %v2250_v10 = vadd.f32 %v2249_v61, %v2201_v9 }
 0x2f7   : > { %v2377_v35 = vpack.c.bf16 %v2348_v17, %v2250_v10 }
 0x2f9   : > { %2393 = vst [vmem:[%s4796_s3 + $0x38] sm:$0xff] %v2377_v35 }
 0x2fa   : > { %v2301_v25 = vpop.f32.mrf.mxu0 }
 0x2fb   : > { %v2302_v40 = vadd.f32 %v2301_v25, %v4765_v31 }
 0x2fe   : > { %v2203_v0 = vpop.f32.mrf.mxu2 }
 0x2ff   : > { %v2204_v50 = vadd.f32 %v2203_v0, %v4775_v11 }
 0x302   : > { %v2303_v47 = vpop.f32.mrf.mxu0 }
 0x303   : > { %v2304_v49 = vadd.f32 %v2303_v47, %v4765_v31 }
 0x306   : > { %v2205_v44 = vpop.f32.mrf.mxu2 }
 0x307   : > { %v2206_v48 = vadd.f32 %v2205_v44, %v4775_v11 }
 0x311   : > { %v2350_v27 = vpop.f32.mrf.mxu1 }
 0x312   : > { %v2351_v7 = vadd.f32 %v2350_v27, %v2302_v40 }
 0x317   : > { %v2252_v4 = vpop.f32.mrf.mxu3  ;;  %v2306_v13 = vpop.f32.mrf.mxu0 }
 0x318   : > { %v2253_v16 = vadd.f32 %v2252_v4, %v2204_v50  ;;  %v2307_v51 = vadd.f32 %v2306_v13, %v4765_v31 }
 0x319   : > { %v2352_v32 = vpop.f32.mrf.mxu1 }
 0x31a   : > { %v2378_v60 = vpack.c.bf16 %v2351_v7, %v2253_v16  ;;  %v2353_v38 = vadd.f32 %v2352_v32, %v2304_v49 }
 0x31c   : > { %2394 = vst [vmem:[%s4796_s3 + $0x40] sm:$0xff] %v2378_v60 }
 0x31d   : > { %v2208_v24 = vpop.f32.mrf.mxu2 }
 0x31e   : > { %v2209_v33 = vadd.f32 %v2208_v24, %v4775_v11 }
 0x31f   : > { %v2254_v45 = vpop.f32.mrf.mxu3  ;;  %v2308_v57 = vpop.f32.mrf.mxu0 }
 0x320   : > { %v2255_v8 = vadd.f32 %v2254_v45, %v2206_v48  ;;  %v2309_v52 = vadd.f32 %v2308_v57, %v4765_v31 }
 0x322   : > { %v2379_v20 = vpack.c.bf16 %v2353_v38, %v2255_v8 }
 0x324   : > { %2395 = vst [vmem:[%s4796_s3 + $0x48] sm:$0xff] %v2379_v20 }
 0x325   : > { %v2355_v19 = vpop.f32.mrf.mxu1  ;;  %v2210_v63 = vpop.f32.mrf.mxu2 }
 0x326   : > { %v2356_v12 = vadd.f32 %v2355_v19, %v2307_v51  ;;  %v2211_v22 = vadd.f32 %v2210_v63, %v4775_v11 }
 0x32b   : > { %v2257_v18 = vpop.f32.mrf.mxu3 }
 0x32c   : > { %v2258_v36 = vadd.f32 %v2257_v18, %v2209_v33 }
 0x32d   : > { %v2357_v54 = vpop.f32.mrf.mxu1 }
 0x32e   : > { %v2380_v53 = vpack.c.bf16 %v2356_v12, %v2258_v36  ;;  %v2358_v5 = vadd.f32 %v2357_v54, %v2309_v52 }
 0x330   : > { %2396 = vst [vmem:[%s4796_s3 + $0x50] sm:$0xff] %v2380_v53 }
 0x333   : > { %v2259_v46 = vpop.f32.mrf.mxu3 }
 0x334   : > { %v2260_v2 = vadd.f32 %v2259_v46, %v2211_v22 }
 0x336   : > { %v2381_v3 = vpack.c.bf16 %v2358_v5, %v2260_v2  ;;  %v2311_v59 = vpop.f32.mrf.mxu0 }
 0x337   : > { %v2312_v42 = vadd.f32 %v2311_v59, %v4765_v31 }
 0x338   : > { %2397 = vst [vmem:[%s4796_s3 + $0x58] sm:$0xff] %v2381_v3 }
 0x33c   : > { %v2213_v58 = vpop.f32.mrf.mxu2 }
 0x33d   : > { %v2214_v56 = vadd.f32 %v2213_v58, %v4775_v11 }
 0x33e   : > { %v2313_v62 = vpop.f32.mrf.mxu0 }
 0x33f   : > { %v2314_v55 = vadd.f32 %v2313_v62, %v4765_v31 }
 0x342   : > { %v2360_v43 = vpop.f32.mrf.mxu1 }
 0x343   : > { %v2361_v34 = vadd.f32 %v2360_v43, %v2312_v42 }
 0x344   : > { %v2215_v28 = vpop.f32.mrf.mxu2 }
 0x345   : > { %v2216_v37 = vadd.f32 %v2215_v28, %v4775_v11 }
 0x348   : > { %v2262_v15 = vpop.f32.mrf.mxu3 }
 0x349   : > { %v2263_v39 = vadd.f32 %v2262_v15, %v2214_v56 }
 0x34a   : > { %v2362_v1 = vpop.f32.mrf.mxu1 }
 0x34b   : > { %v2382_v21 = vpack.c.bf16 %v2361_v34, %v2263_v39  ;;  %v2363_v30 = vadd.f32 %v2362_v1, %v2314_v55 }
 0x34d   : > { %2398 = vst [vmem:[%s4796_s3 + $0x60] sm:$0xff] %v2382_v21 }
 0x34f   : > { %v2316_v14 = vpop.f32.mrf.mxu0 }
 0x350   : > { %v2264_v6 = vpop.f32.mrf.mxu3  ;;  %v2317_v9 = vadd.f32 %v2316_v14, %v4765_v31 }
 0x351   : > { %v2265_v41 = vadd.f32 %v2264_v6, %v2216_v37 }
 0x353   : > { %v2383_v26 = vpack.c.bf16 %v2363_v30, %v2265_v41 }
 0x355   : > { %2399 = vst [vmem:[%s4796_s3 + $0x68] sm:$0xff] %v2383_v26  ;;  %v2218_v23 = vpop.f32.mrf.mxu2 }
 0x356   : > { %v2219_v29 = vadd.f32 %v2218_v23, %v4775_v11 }
 0x357   : > { %v2318_v25 = vpop.f32.mrf.mxu0 }
 0x358   : > { %v2319_v27 = vadd.f32 %v2318_v25, %v4765_v31 }
 0x35c   : > { %v2365_v61 = vpop.f32.mrf.mxu1 }
 0x35d   : > { %v2366_v10 = vadd.f32 %v2365_v61, %v2317_v9  ;;  %v2220_v0 = vpop.f32.mrf.mxu2 }
 0x35e   : > { %v2221_v50 = vadd.f32 %v2220_v0, %v4775_v11 }
 0x362   : > { %v2267_v17 = vpop.f32.mrf.mxu3 }
 0x363   : > { %v2268_v35 = vadd.f32 %v2267_v17, %v2219_v29 }
 0x364   : > { %v2367_v4 = vpop.f32.mrf.mxu1 }
 0x365   : > { %v2384_v40 = vpack.c.bf16 %v2366_v10, %v2268_v35  ;;  %v2368_v16 = vadd.f32 %v2367_v4, %v2319_v27 }
 0x367   : > { %2400 = vst [vmem:[%s4796_s3 + $0x70] sm:$0xff] %v2384_v40 }
 0x36a   : > { %v2269_v7 = vpop.f32.mrf.mxu3 }
 0x36b   : > { %v2270_v47 = vadd.f32 %v2269_v7, %v2221_v50 }
 0x36d   : > { %v2385_v44 = vpack.c.bf16 %v2368_v16, %v2270_v47 }
 0x36f   : > { %2401 = vst [vmem:[%s4796_s3 + $0x78] sm:$0xff] %v2385_v44 }
 0x370   : > { %3154 = shalt.err (!%p3151_p0)
}
 0x371   : > { %s3224_s10 = smov 128   ;;  %s3225_s13 = smov 8  }
 0x372   : > { %2860 = dma.vmem_to_hbm [thread:$0]  (%p3357_p5), %s2418_s17, 2048, %s2420_s24, %s2403_s21, %s3224_s10, %s3224_s10, %s3225_s13  }
 0x373 PF: > { %s2434_s1 = sand.u32 1, %s3197_s18   ;;  %p2877_p3 = pnand %p2539_p11, %p3305_p6 }
 0x374   : > { %s2435_s2 = scalar_lea.sflag [#allocation4], %s2434_s1 }
 0x375   : > { %p2878_p7 = pneg %p2877_p3 }
 0x377   : > { %3192 = dma.done.wait (%p2878_p7), %s2435_s2, 2048  }
 0x378   : > { %3194 = vsyncadd (%p2878_p7), %s2435_s2, 4294965248  ;;  %s23_s23 = sadd.s32 1, %s3217_s23   ;;  %s5044_s18 = smov %s3201_s19 }
 0x379   : > { %p20_p9 = scmp.ge.s32.totalorder %s23_s23, 4   ;;  %s5045_s19 = smov %s3205_s20 }
 0x37a   : > { %s5046_s20 = smov %s3366_s25  ;;  %s5047_s21 = smov %s3213_s22 }
 0x37b   : > { %s5048_s22 = smov %s5050_s7  ;;  %22 = sbr.rel (!%p20_p9) target bundleno = 12 (0xc), region = 97 }
 0x380   :  { %2441 = vsyncpa [#allocation3], 1 }
 0x381   :  { %2443 = vsyncpa [#allocation3 + $0x1], 1 }
 0x382   :  { %2444 = vsyncpa [#allocation6], 1 }
 0x383   :  { %2445 = vsyncpa [#allocation9], 1 }
 0x384   :  { %2446 = vsyncpa [#allocation4], 1 }
 0x385   :  { %2448 = vsyncpa [#allocation4 + $0x1], 1 }

</bundles_post_ra>
